<compile_context>
chip_gen: v7x
topology: tpu7x:2x2x1
jax: 0.10.0
libtpu: 0.0.40
codegen_flags: <defaults>
</compile_context>

<pallas_src>
import jax
import jax.numpy as jnp
from jax.experimental import pallas as pl
from jax.experimental.pallas import tpu as pltpu


OC_PAD = 128          # conv output channels padded to a full 128-lane register
TILE_M = 256          # row tile for gridded stages (multiple of 8 / 16)
VMEM_LIMIT = 32 * 1024 * 1024   # fits v7x (64 MiB phys) / v6e / v5e comfortably
CONV_CFG = ((32, 1, 5), (64, 32, 3), (128, 64, 3))   # (out_ch, in_ch, kernel)


def _compiler_params():
    return pltpu.CompilerParams(
        dimension_semantics=("parallel",),
        vmem_limit_bytes=VMEM_LIMIT,
    )


# ----------------------------- Pallas kernels ------------------------------

def conv_pool_bn_kernel(win_ref, w_ref, b_ref, scale_ref, shift_ref, o_ref):
    """Fused conv(im2col matmul)+bias+ReLU -> 2x2 max pool -> BatchNorm affine.

    win_ref   : (4, tile_m, K) bf16 -- im2col patches for the 4 window slots
    w_ref     : (K, 128)       bf16 -- conv weight, OC zero-padded to 128 lanes
    b_ref     : (1, 128)       f32
    scale_ref : (1, 128)       f32  -- gamma / sqrt(var + eps)
    shift_ref : (1, 128)       f32  -- beta - mean * scale
    o_ref     : (tile_m, 128)  bf16 -- pooled + normalized output
    """
    w = w_ref[...]
    b = b_ref[...]
    m = None
    for s in range(4):                       # static unroll over 2x2 window slots
        y = jnp.dot(win_ref[s], w, preferred_element_type=jnp.float32) + b
        y = jnp.maximum(y, 0.0)              # ReLU (f32 elementwise)
        m = y if m is None else jnp.maximum(m, y)
    o_ref[...] = (m * scale_ref[...] + shift_ref[...]).astype(o_ref.dtype)


def make_mlp_head_kernel(n_layers):
    """Fused MLP head: (dropout=identity, Linear, ReLU)*... , Linear, log_softmax."""
    def kernel(*refs):
        x_ref, o_ref = refs[0], refs[-1]
        h = x_ref[...]
        for i in range(n_layers):
            w = refs[1 + 2 * i][...]         # (in, out) bf16
            b = refs[2 + 2 * i][...]         # (1, out)  f32
            h = jnp.dot(h.astype(jnp.bfloat16), w,
                        preferred_element_type=jnp.float32) + b
            if i < n_layers - 1:
                h = jnp.maximum(h, 0.0)      # ReLU (dropout is identity in eval)
        zmax = jnp.max(h, axis=-1, keepdims=True)
        e = jnp.exp(h - zmax)
        o_ref[...] = h - zmax - jnp.log(jnp.sum(e, axis=-1, keepdims=True))
    return kernel


# ------------------------------ glue helpers -------------------------------

def _im2col_pooled(x, k):
    """NHWC x -> (4, N*Hp*Wp, C*k*k) im2col patches grouped by 2x2 pool slot.

    Column order is (c, kh, kw), matching w.reshape(OC, IC*KH*KW).
    Pool uses floor(OH/2) like PyTorch MaxPool2d(2).
    """
    N, H, W, C = x.shape
    OH, OW = H - k + 1, W - k + 1
    Hp, Wp = OH // 2, OW // 2
    slots = []
    for ph in range(2):
        for pw in range(2):
            taps = []
            for kh in range(k):
                for kw in range(k):
                    taps.append(
                        x[:, ph + kh: ph + kh + 2 * Hp: 2,
                             pw + kw: pw + kw + 2 * Wp: 2, :])   # (N, Hp, Wp, C)
            t = jnp.stack(taps, axis=-1)                         # (N, Hp, Wp, C, k*k)
            slots.append(t.reshape(N * Hp * Wp, C * k * k))
    return jnp.stack(slots, axis=0), Hp, Wp                      # (4, Mp, C*k*k)


def _conv_stage(win, w, b, scale, shift):
    _, Mp, K = win.shape
    tile_m = Mp if Mp <= TILE_M else TILE_M
    return pl.pallas_call(
        conv_pool_bn_kernel,
        out_shape=jax.ShapeDtypeStruct((Mp, OC_PAD), jnp.bfloat16),
        grid=(pl.cdiv(Mp, tile_m),),
        in_specs=[
            pl.BlockSpec((4, tile_m, K), lambda i: (0, i, 0)),
            pl.BlockSpec((K, OC_PAD), lambda i: (0, 0)),
            pl.BlockSpec((1, OC_PAD), lambda i: (0, 0)),
            pl.BlockSpec((1, OC_PAD), lambda i: (0, 0)),
            pl.BlockSpec((1, OC_PAD), lambda i: (0, 0)),
        ],
        out_specs=pl.BlockSpec((tile_m, OC_PAD), lambda i: (i, 0)),
        compiler_params=_compiler_params(),
    )(win, w, b, scale, shift)


def _mlp_head(x, fc_params):
    N, D = x.shape
    n_layers = len(fc_params)
    out_dim = fc_params[-1][0].shape[1]
    tile_n = N if N <= TILE_M else TILE_M
    flat = []
    in_specs = [pl.BlockSpec((tile_n, D), lambda i: (i, 0))]
    for (w, b) in fc_params:
        flat += [w, b]
        in_specs.append(pl.BlockSpec(w.shape, lambda i: (0, 0)))
        in_specs.append(pl.BlockSpec(b.shape, lambda i: (0, 0)))
    return pl.pallas_call(
        make_mlp_head_kernel(n_layers),
        out_shape=jax.ShapeDtypeStruct((N, out_dim), jnp.float32),
        grid=(pl.cdiv(N, tile_n),),
        in_specs=in_specs,
        out_specs=pl.BlockSpec((tile_n, out_dim), lambda i: (i, 0)),
        compiler_params=_compiler_params(),
    )(x, *flat)


# ------------------------------ forward pass -------------------------------

@jax.jit
def net_forward(x_nchw, params):
    """x_nchw: (N, 1, 28, 28) float32 -> (N, num_classes) log-probabilities."""
    x = jnp.transpose(x_nchw, (0, 2, 3, 1)).astype(jnp.bfloat16)   # NHWC, bf16
    N = x.shape[0]

    # --- fused conv / relu / maxpool / bn stages (one pallas_call each) ---
    for (oc, _ic, k), (w, b, scale, shift) in zip(CONV_CFG, params["conv_stages"]):
        win, Hp, Wp = _im2col_pooled(x, k)                 # (4, N*Hp*Wp, IC*k*k)
        y = _conv_stage(win, w, b, scale, shift)           # (N*Hp*Wp, 128) bf16
        x = y.reshape(N, Hp, Wp, OC_PAD)[..., :oc]         # drop padded channels

    # --- flatten exactly like PyTorch x.view(N, -1) on NCHW ---
    x = jnp.transpose(x, (0, 3, 1, 2)).reshape(N, -1)      # (N, 128)

    # --- fused MLP head (dropout is identity in eval mode) ---
    return _mlp_head(x, params["fc"])


# --------------------------- deterministic init ----------------------------

def init_params(key, layers):
    layers = list(layers)
    layers[0] = 128  # as in Net.__init__

    def conv_init(k, oc, ic, ksz):
        k1, k2 = jax.random.split(k)
        fan_in = ic * ksz * ksz
        w = jax.random.uniform(k1, (oc, ic, ksz, ksz), jnp.float32, -1.0, 1.0)
        w = w * (6.0 / fan_in) ** 0.5
        b = jax.random.uniform(k2, (oc,), jnp.float32, -1.0, 1.0) * (1.0 / fan_in) ** 0.5
        return w, b

    def bn_init(k, c):
        k1, k2, k3, k4 = jax.random.split(k, 4)
        gamma = jax.random.uniform(k1, (c,), jnp.float32, 0.5, 1.5)
        beta = 0.1 * jax.random.normal(k2, (c,), jnp.float32)
        mean = 0.1 * jax.random.normal(k3, (c,), jnp.float32)
        var = jax.random.uniform(k4, (c,), jnp.float32, 0.5, 1.5)
        eps = 1e-5
        scale = gamma / jnp.sqrt(var + eps)
        shift = beta - mean * scale
        return scale, shift

    def pad_row(v):           # (c,) -> (1, OC_PAD) f32, zero padded
        return jnp.pad(v, (0, OC_PAD - v.shape[0]))[None, :].astype(jnp.float32)

    keys = jax.random.split(key, 8)
    conv_stages = []
    for i, (oc, ic, ksz) in enumerate(CONV_CFG):
        w, b = conv_init(keys[i], oc, ic, ksz)
        scale, shift = bn_init(keys[3 + i], oc)
        # Pre-reshape/transpose ONCE: (oc, ic, kh, kw) -> (ic*k*k, oc) -> pad to 128 lanes.
        w_mat = w.reshape(oc, ic * ksz * ksz).T
        w_mat = jnp.pad(w_mat, ((0, 0), (0, OC_PAD - oc))).astype(jnp.bfloat16)
        conv_stages.append((w_mat, pad_row(b), pad_row(scale), pad_row(shift)))

    fc = []
    fkeys = jax.random.split(keys[6], len(layers) - 1)
    for kk, (fin, fout) in zip(fkeys, zip(layers, layers[1:])):
        k1, k2 = jax.random.split(kk)
        # kaiming_uniform_ (relu): bound = sqrt(6 / fan_in)
        w = jax.random.uniform(k1, (fout, fin), jnp.float32, -1.0, 1.0) * (6.0 / fin) ** 0.5
        b = jax.random.uniform(k2, (fout,), jnp.float32, -1.0, 1.0) * (1.0 / fin) ** 0.5
        fc.append((w.T.astype(jnp.bfloat16), b[None, :].astype(jnp.float32)))

    return {"conv_stages": conv_stages, "fc": fc}


# ---------------------------------- main -----------------------------------

if __name__ == "__main__":
    key = jax.random.PRNGKey(0)
    k_params, k_x = jax.random.split(key)

    # layers=[784, 32, 10] -> Net forces layers[0]=128; input must be 28x28 so
    # the conv/pool stack flattens to exactly 128 features.
    params = init_params(k_params, layers=[784, 32, 10])
    x = jax.random.normal(k_x, (2, 1, 28, 28), jnp.float32)

    out = net_forward(x, params)
    out = jax.block_until_ready(out)

    assert out.shape == (2, 10), out.shape
    # sanity: rows of log_softmax should exp-sum to ~1
    assert jnp.allclose(jnp.exp(out).sum(axis=1), 1.0, atol=1e-4)
    print("KERNEL_OK")
</pallas_src>

<mosaic_0001>
module attributes {stable_mosaic.version = 11 : i64} {
  func.func @conv_pool_bn_kernel(%arg0: i32, %arg1: memref<4x256x25xbf16, #tpu.memory_space<vmem>>, %arg2: memref<25x128xbf16, #tpu.memory_space<vmem>>, %arg3: memref<1x128xf32, #tpu.memory_space<vmem>>, %arg4: memref<1x128xf32, #tpu.memory_space<vmem>>, %arg5: memref<1x128xf32, #tpu.memory_space<vmem>>, %arg6: memref<256x128xbf16, #tpu.memory_space<vmem>>) attributes {dimension_semantics = [#tpu.dimension_semantics<parallel>], iteration_bounds = array<i64: 2>, scalar_prefetch = 0 : i64, scratch_operands = 0 : i64, tpu.core_type = #tpu.core_type<tc>, window_params = [{transform_indices = @transform_0, window_bounds = array<i64: 4, 256, 25>}, {pipeline_mode = #tpu.pipeline_mode<synchronous>, transform_indices = @transform_1, window_bounds = array<i64: 25, 128>}, {pipeline_mode = #tpu.pipeline_mode<synchronous>, transform_indices = @transform_2, window_bounds = array<i64: 1, 128>}, {pipeline_mode = #tpu.pipeline_mode<synchronous>, transform_indices = @transform_3, window_bounds = array<i64: 1, 128>}, {pipeline_mode = #tpu.pipeline_mode<synchronous>, transform_indices = @transform_4, window_bounds = array<i64: 1, 128>}, {transform_indices = @transform_5, window_bounds = array<i64: 256, 128>}]} {
    %c0 = arith.constant 0 : index
    %c0_0 = arith.constant 0 : index
    %0 = vector.load %arg2[%c0, %c0_0] : memref<25x128xbf16, #tpu.memory_space<vmem>>, vector<25x128xbf16>
    %c0_1 = arith.constant 0 : index
    %c0_2 = arith.constant 0 : index
    %1 = vector.load %arg3[%c0_1, %c0_2] : memref<1x128xf32, #tpu.memory_space<vmem>>, vector<1x128xf32>
    %c0_3 = arith.constant 0 : index
    %c0_4 = arith.constant 0 : index
    %c0_5 = arith.constant 0 : index
    %2 = vector.load %arg1[%c0_3, %c0_4, %c0_5] : memref<4x256x25xbf16, #tpu.memory_space<vmem>>, vector<1x256x25xbf16>
    %3 = vector.shape_cast %2 : vector<1x256x25xbf16> to vector<256x25xbf16>
    %cst = arith.constant dense<0.000000e+00> : vector<256x128xf32>
    %4 = tpu.matmul %3, %0, %cst {dimension_numbers = #tpu.dot_dimension_numbers<[1], [0], [0], [1], [0, 0, 1, 1], [], []>} : vector<256x25xbf16>, vector<25x128xbf16>, vector<256x128xf32> -> vector<256x128xf32>
    %5 = vector.broadcast %1 : vector<1x128xf32> to vector<256x128xf32>
    %6 = arith.addf %4, %5 : vector<256x128xf32>
    %cst_6 = arith.constant 0.000000e+00 : f32
    %7 = vector.broadcast %cst_6 : f32 to vector<256x128xf32>
    %8 = arith.maximumf %6, %7 : vector<256x128xf32>
    %c1 = arith.constant 1 : index
    %c0_7 = arith.constant 0 : index
    %c0_8 = arith.constant 0 : index
    %9 = vector.load %arg1[%c1, %c0_7, %c0_8] : memref<4x256x25xbf16, #tpu.memory_space<vmem>>, vector<1x256x25xbf16>
    %10 = vector.shape_cast %9 : vector<1x256x25xbf16> to vector<256x25xbf16>
    %cst_9 = arith.constant dense<0.000000e+00> : vector<256x128xf32>
    %11 = tpu.matmul %10, %0, %cst_9 {dimension_numbers = #tpu.dot_dimension_numbers<[1], [0], [0], [1], [0, 0, 1, 1], [], []>} : vector<256x25xbf16>, vector<25x128xbf16>, vector<256x128xf32> -> vector<256x128xf32>
    %12 = vector.broadcast %1 : vector<1x128xf32> to vector<256x128xf32>
    %13 = arith.addf %11, %12 : vector<256x128xf32>
    %cst_10 = arith.constant 0.000000e+00 : f32
    %14 = vector.broadcast %cst_10 : f32 to vector<256x128xf32>
    %15 = arith.maximumf %13, %14 : vector<256x128xf32>
    %16 = arith.maximumf %8, %15 : vector<256x128xf32>
    %c2 = arith.constant 2 : index
    %c0_11 = arith.constant 0 : index
    %c0_12 = arith.constant 0 : index
    %17 = vector.load %arg1[%c2, %c0_11, %c0_12] : memref<4x256x25xbf16, #tpu.memory_space<vmem>>, vector<1x256x25xbf16>
    %18 = vector.shape_cast %17 : vector<1x256x25xbf16> to vector<256x25xbf16>
    %cst_13 = arith.constant dense<0.000000e+00> : vector<256x128xf32>
    %19 = tpu.matmul %18, %0, %cst_13 {dimension_numbers = #tpu.dot_dimension_numbers<[1], [0], [0], [1], [0, 0, 1, 1], [], []>} : vector<256x25xbf16>, vector<25x128xbf16>, vector<256x128xf32> -> vector<256x128xf32>
    %20 = vector.broadcast %1 : vector<1x128xf32> to vector<256x128xf32>
    %21 = arith.addf %19, %20 : vector<256x128xf32>
    %cst_14 = arith.constant 0.000000e+00 : f32
    %22 = vector.broadcast %cst_14 : f32 to vector<256x128xf32>
    %23 = arith.maximumf %21, %22 : vector<256x128xf32>
    %24 = arith.maximumf %16, %23 : vector<256x128xf32>
    %c3 = arith.constant 3 : index
    %c0_15 = arith.constant 0 : index
    %c0_16 = arith.constant 0 : index
    %25 = vector.load %arg1[%c3, %c0_15, %c0_16] : memref<4x256x25xbf16, #tpu.memory_space<vmem>>, vector<1x256x25xbf16>
    %26 = vector.shape_cast %25 : vector<1x256x25xbf16> to vector<256x25xbf16>
    %cst_17 = arith.constant dense<0.000000e+00> : vector<256x128xf32>
    %27 = tpu.matmul %26, %0, %cst_17 {dimension_numbers = #tpu.dot_dimension_numbers<[1], [0], [0], [1], [0, 0, 1, 1], [], []>} : vector<256x25xbf16>, vector<25x128xbf16>, vector<256x128xf32> -> vector<256x128xf32>
    %28 = vector.broadcast %1 : vector<1x128xf32> to vector<256x128xf32>
    %29 = arith.addf %27, %28 : vector<256x128xf32>
    %cst_18 = arith.constant 0.000000e+00 : f32
    %30 = vector.broadcast %cst_18 : f32 to vector<256x128xf32>
    %31 = arith.maximumf %29, %30 : vector<256x128xf32>
    %32 = arith.maximumf %24, %31 : vector<256x128xf32>
    %c0_19 = arith.constant 0 : index
    %c0_20 = arith.constant 0 : index
    %33 = vector.load %arg4[%c0_19, %c0_20] : memref<1x128xf32, #tpu.memory_space<vmem>>, vector<1x128xf32>
    %34 = vector.broadcast %33 : vector<1x128xf32> to vector<256x128xf32>
    %35 = arith.mulf %32, %34 : vector<256x128xf32>
    %c0_21 = arith.constant 0 : index
    %c0_22 = arith.constant 0 : index
    %36 = vector.load %arg5[%c0_21, %c0_22] : memref<1x128xf32, #tpu.memory_space<vmem>>, vector<1x128xf32>
    %37 = vector.broadcast %36 : vector<1x128xf32> to vector<256x128xf32>
    %38 = arith.addf %35, %37 : vector<256x128xf32>
    %39 = arith.truncf %38 : vector<256x128xf32> to vector<256x128xbf16>
    %c0_23 = arith.constant 0 : index
    %c0_24 = arith.constant 0 : index
    %40 = vector.load %arg6[%c0_23, %c0_24] : memref<256x128xbf16, #tpu.memory_space<vmem>>, vector<256x128xbf16>
    tpu.vector_store %arg6[%c0_23, %c0_24], %39 {strides = array<i32>} : memref<256x128xbf16, #tpu.memory_space<vmem>>, vector<256x128xbf16>,
    return
  }
  func.func @transform_0(%arg0: i32) -> (i32, i32, i32) {
    %c0_i32 = arith.constant 0 : i32
    %c0_i32_0 = arith.constant 0 : i32
    %c0_i32_1 = arith.constant 0 : i32
    return %c0_i32, %arg0, %c0_i32_0 : i32, i32, i32
  }
  func.func @transform_1(%arg0: i32) -> (i32, i32) {
    %c0_i32 = arith.constant 0 : i32
    %c0_i32_0 = arith.constant 0 : i32
    %c0_i32_1 = arith.constant 0 : i32
    return %c0_i32, %c0_i32_0 : i32, i32
  }
  func.func @transform_2(%arg0: i32) -> (i32, i32) {
    %c0_i32 = arith.constant 0 : i32
    %c0_i32_0 = arith.constant 0 : i32
    %c0_i32_1 = arith.constant 0 : i32
    return %c0_i32, %c0_i32_0 : i32, i32
  }
  func.func @transform_3(%arg0: i32) -> (i32, i32) {
    %c0_i32 = arith.constant 0 : i32
    %c0_i32_0 = arith.constant 0 : i32
    %c0_i32_1 = arith.constant 0 : i32
    return %c0_i32, %c0_i32_0 : i32, i32
  }
  func.func @transform_4(%arg0: i32) -> (i32, i32) {
    %c0_i32 = arith.constant 0 : i32
    %c0_i32_0 = arith.constant 0 : i32
    %c0_i32_1 = arith.constant 0 : i32
    return %c0_i32, %c0_i32_0 : i32, i32
  }
  func.func @transform_5(%arg0: i32) -> (i32, i32) {
    %c0_i32 = arith.constant 0 : i32
    %c0_i32_0 = arith.constant 0 : i32
    return %arg0, %c0_i32 : i32, i32
  }
}

module attributes {stable_mosaic.version = 11 : i64} {
  func.func @conv_pool_bn_kernel(%arg0: i32, %arg1: memref<4x50x288xbf16, #tpu.memory_space<vmem>>, %arg2: memref<288x128xbf16, #tpu.memory_space<vmem>>, %arg3: memref<1x128xf32, #tpu.memory_space<vmem>>, %arg4: memref<1x128xf32, #tpu.memory_space<vmem>>, %arg5: memref<1x128xf32, #tpu.memory_space<vmem>>, %arg6: memref<50x128xbf16, #tpu.memory_space<vmem>>) attributes {dimension_semantics = [#tpu.dimension_semantics<parallel>], iteration_bounds = array<i64: 1>, scalar_prefetch = 0 : i64, scratch_operands = 0 : i64, tpu.core_type = #tpu.core_type<tc>, window_params = [{transform_indices = @transform_0, window_bounds = array<i64: 4, 50, 288>}, {pipeline_mode = #tpu.pipeline_mode<synchronous>, transform_indices = @transform_1, window_bounds = array<i64: 288, 128>}, {pipeline_mode = #tpu.pipeline_mode<synchronous>, transform_indices = @transform_2, window_bounds = array<i64: 1, 128>}, {pipeline_mode = #tpu.pipeline_mode<synchronous>, transform_indices = @transform_3, window_bounds = array<i64: 1, 128>}, {pipeline_mode = #tpu.pipeline_mode<synchronous>, transform_indices = @transform_4, window_bounds = array<i64: 1, 128>}, {transform_indices = @transform_5, window_bounds = array<i64: 50, 128>}]} {
    %c0 = arith.constant 0 : index
    %c0_0 = arith.constant 0 : index
    %0 = vector.load %arg2[%c0, %c0_0] : memref<288x128xbf16, #tpu.memory_space<vmem>>, vector<288x128xbf16>
    %c0_1 = arith.constant 0 : index
    %c0_2 = arith.constant 0 : index
    %1 = vector.load %arg3[%c0_1, %c0_2] : memref<1x128xf32, #tpu.memory_space<vmem>>, vector<1x128xf32>
    %c0_3 = arith.constant 0 : index
    %c0_4 = arith.constant 0 : index
    %c0_5 = arith.constant 0 : index
    %2 = vector.load %arg1[%c0_3, %c0_4, %c0_5] : memref<4x50x288xbf16, #tpu.memory_space<vmem>>, vector<1x50x288xbf16>
    %3 = vector.shape_cast %2 : vector<1x50x288xbf16> to vector<50x288xbf16>
    %cst = arith.constant dense<0.000000e+00> : vector<50x128xf32>
    %4 = tpu.matmul %3, %0, %cst {dimension_numbers = #tpu.dot_dimension_numbers<[1], [0], [0], [1], [0, 0, 1, 1], [], []>} : vector<50x288xbf16>, vector<288x128xbf16>, vector<50x128xf32> -> vector<50x128xf32>
    %5 = vector.broadcast %1 : vector<1x128xf32> to vector<50x128xf32>
    %6 = arith.addf %4, %5 : vector<50x128xf32>
    %cst_6 = arith.constant 0.000000e+00 : f32
    %7 = vector.broadcast %cst_6 : f32 to vector<50x128xf32>
    %8 = arith.maximumf %6, %7 : vector<50x128xf32>
    %c1 = arith.constant 1 : index
    %c0_7 = arith.constant 0 : index
    %c0_8 = arith.constant 0 : index
    %9 = vector.load %arg1[%c1, %c0_7, %c0_8] : memref<4x50x288xbf16, #tpu.memory_space<vmem>>, vector<1x50x288xbf16>
    %10 = vector.shape_cast %9 : vector<1x50x288xbf16> to vector<50x288xbf16>
    %cst_9 = arith.constant dense<0.000000e+00> : vector<50x128xf32>
    %11 = tpu.matmul %10, %0, %cst_9 {dimension_numbers = #tpu.dot_dimension_numbers<[1], [0], [0], [1], [0, 0, 1, 1], [], []>} : vector<50x288xbf16>, vector<288x128xbf16>, vector<50x128xf32> -> vector<50x128xf32>
    %12 = vector.broadcast %1 : vector<1x128xf32> to vector<50x128xf32>
    %13 = arith.addf %11, %12 : vector<50x128xf32>
    %cst_10 = arith.constant 0.000000e+00 : f32
    %14 = vector.broadcast %cst_10 : f32 to vector<50x128xf32>
    %15 = arith.maximumf %13, %14 : vector<50x128xf32>
    %16 = arith.maximumf %8, %15 : vector<50x128xf32>
    %c2 = arith.constant 2 : index
    %c0_11 = arith.constant 0 : index
    %c0_12 = arith.constant 0 : index
    %17 = vector.load %arg1[%c2, %c0_11, %c0_12] : memref<4x50x288xbf16, #tpu.memory_space<vmem>>, vector<1x50x288xbf16>
    %18 = vector.shape_cast %17 : vector<1x50x288xbf16> to vector<50x288xbf16>
    %cst_13 = arith.constant dense<0.000000e+00> : vector<50x128xf32>
    %19 = tpu.matmul %18, %0, %cst_13 {dimension_numbers = #tpu.dot_dimension_numbers<[1], [0], [0], [1], [0, 0, 1, 1], [], []>} : vector<50x288xbf16>, vector<288x128xbf16>, vector<50x128xf32> -> vector<50x128xf32>
    %20 = vector.broadcast %1 : vector<1x128xf32> to vector<50x128xf32>
    %21 = arith.addf %19, %20 : vector<50x128xf32>
    %cst_14 = arith.constant 0.000000e+00 : f32
    %22 = vector.broadcast %cst_14 : f32 to vector<50x128xf32>
    %23 = arith.maximumf %21, %22 : vector<50x128xf32>
    %24 = arith.maximumf %16, %23 : vector<50x128xf32>
    %c3 = arith.constant 3 : index
    %c0_15 = arith.constant 0 : index
    %c0_16 = arith.constant 0 : index
    %25 = vector.load %arg1[%c3, %c0_15, %c0_16] : memref<4x50x288xbf16, #tpu.memory_space<vmem>>, vector<1x50x288xbf16>
    %26 = vector.shape_cast %25 : vector<1x50x288xbf16> to vector<50x288xbf16>
    %cst_17 = arith.constant dense<0.000000e+00> : vector<50x128xf32>
    %27 = tpu.matmul %26, %0, %cst_17 {dimension_numbers = #tpu.dot_dimension_numbers<[1], [0], [0], [1], [0, 0, 1, 1], [], []>} : vector<50x288xbf16>, vector<288x128xbf16>, vector<50x128xf32> -> vector<50x128xf32>
    %28 = vector.broadcast %1 : vector<1x128xf32> to vector<50x128xf32>
    %29 = arith.addf %27, %28 : vector<50x128xf32>
    %cst_18 = arith.constant 0.000000e+00 : f32
    %30 = vector.broadcast %cst_18 : f32 to vector<50x128xf32>
    %31 = arith.maximumf %29, %30 : vector<50x128xf32>
    %32 = arith.maximumf %24, %31 : vector<50x128xf32>
    %c0_19 = arith.constant 0 : index
    %c0_20 = arith.constant 0 : index
    %33 = vector.load %arg4[%c0_19, %c0_20] : memref<1x128xf32, #tpu.memory_space<vmem>>, vector<1x128xf32>
    %34 = vector.broadcast %33 : vector<1x128xf32> to vector<50x128xf32>
    %35 = arith.mulf %32, %34 : vector<50x128xf32>
    %c0_21 = arith.constant 0 : index
    %c0_22 = arith.constant 0 : index
    %36 = vector.load %arg5[%c0_21, %c0_22] : memref<1x128xf32, #tpu.memory_space<vmem>>, vector<1x128xf32>
    %37 = vector.broadcast %36 : vector<1x128xf32> to vector<50x128xf32>
    %38 = arith.addf %35, %37 : vector<50x128xf32>
    %39 = arith.truncf %38 : vector<50x128xf32> to vector<50x128xbf16>
    %c0_23 = arith.constant 0 : index
    %c0_24 = arith.constant 0 : index
    %40 = vector.load %arg6[%c0_23, %c0_24] : memref<50x128xbf16, #tpu.memory_space<vmem>>, vector<50x128xbf16>
    tpu.vector_store %arg6[%c0_23, %c0_24], %39 {strides = array<i32>} : memref<50x128xbf16, #tpu.memory_space<vmem>>, vector<50x128xbf16>,
    return
  }
  func.func @transform_0(%arg0: i32) -> (i32, i32, i32) {
    %c0_i32 = arith.constant 0 : i32
    %c0_i32_0 = arith.constant 0 : i32
    %c0_i32_1 = arith.constant 0 : i32
    return %c0_i32, %arg0, %c0_i32_0 : i32, i32, i32
  }
  func.func @transform_1(%arg0: i32) -> (i32, i32) {
    %c0_i32 = arith.constant 0 : i32
    %c0_i32_0 = arith.constant 0 : i32
    %c0_i32_1 = arith.constant 0 : i32
    return %c0_i32, %c0_i32_0 : i32, i32
  }
  func.func @transform_2(%arg0: i32) -> (i32, i32) {
    %c0_i32 = arith.constant 0 : i32
    %c0_i32_0 = arith.constant 0 : i32
    %c0_i32_1 = arith.constant 0 : i32
    return %c0_i32, %c0_i32_0 : i32, i32
  }
  func.func @transform_3(%arg0: i32) -> (i32, i32) {
    %c0_i32 = arith.constant 0 : i32
    %c0_i32_0 = arith.constant 0 : i32
    %c0_i32_1 = arith.constant 0 : i32
    return %c0_i32, %c0_i32_0 : i32, i32
  }
  func.func @transform_4(%arg0: i32) -> (i32, i32) {
    %c0_i32 = arith.constant 0 : i32
    %c0_i32_0 = arith.constant 0 : i32
    %c0_i32_1 = arith.constant 0 : i32
    return %c0_i32, %c0_i32_0 : i32, i32
  }
  func.func @transform_5(%arg0: i32) -> (i32, i32) {
    %c0_i32 = arith.constant 0 : i32
    %c0_i32_0 = arith.constant 0 : i32
    return %arg0, %c0_i32 : i32, i32
  }
}

module attributes {stable_mosaic.version = 11 : i64} {
  func.func @conv_pool_bn_kernel(%arg0: i32, %arg1: memref<4x2x576xbf16, #tpu.memory_space<vmem>>, %arg2: memref<576x128xbf16, #tpu.memory_space<vmem>>, %arg3: memref<1x128xf32, #tpu.memory_space<vmem>>, %arg4: memref<1x128xf32, #tpu.memory_space<vmem>>, %arg5: memref<1x128xf32, #tpu.memory_space<vmem>>, %arg6: memref<2x128xbf16, #tpu.memory_space<vmem>>) attributes {dimension_semantics = [#tpu.dimension_semantics<parallel>], iteration_bounds = array<i64: 1>, scalar_prefetch = 0 : i64, scratch_operands = 0 : i64, tpu.core_type = #tpu.core_type<tc>, window_params = [{transform_indices = @transform_0, window_bounds = array<i64: 4, 2, 576>}, {pipeline_mode = #tpu.pipeline_mode<synchronous>, transform_indices = @transform_1, window_bounds = array<i64: 576, 128>}, {pipeline_mode = #tpu.pipeline_mode<synchronous>, transform_indices = @transform_2, window_bounds = array<i64: 1, 128>}, {pipeline_mode = #tpu.pipeline_mode<synchronous>, transform_indices = @transform_3, window_bounds = array<i64: 1, 128>}, {pipeline_mode = #tpu.pipeline_mode<synchronous>, transform_indices = @transform_4, window_bounds = array<i64: 1, 128>}, {transform_indices = @transform_5, window_bounds = array<i64: 2, 128>}]} {
    %c0 = arith.constant 0 : index
    %c0_0 = arith.constant 0 : index
    %0 = vector.load %arg2[%c0, %c0_0] : memref<576x128xbf16, #tpu.memory_space<vmem>>, vector<576x128xbf16>
    %c0_1 = arith.constant 0 : index
    %c0_2 = arith.constant 0 : index
    %1 = vector.load %arg3[%c0_1, %c0_2] : memref<1x128xf32, #tpu.memory_space<vmem>>, vector<1x128xf32>
    %c0_3 = arith.constant 0 : index
    %c0_4 = arith.constant 0 : index
    %c0_5 = arith.constant 0 : index
    %2 = vector.load %arg1[%c0_3, %c0_4, %c0_5] : memref<4x2x576xbf16, #tpu.memory_space<vmem>>, vector<1x2x576xbf16>
    %3 = vector.shape_cast %2 : vector<1x2x576xbf16> to vector<2x576xbf16>
    %cst = arith.constant dense<0.000000e+00> : vector<2x128xf32>
    %4 = tpu.matmul %3, %0, %cst {dimension_numbers = #tpu.dot_dimension_numbers<[1], [0], [0], [1], [0, 0, 1, 1], [], []>} : vector<2x576xbf16>, vector<576x128xbf16>, vector<2x128xf32> -> vector<2x128xf32>
    %5 = vector.broadcast %1 : vector<1x128xf32> to vector<2x128xf32>
    %6 = arith.addf %4, %5 : vector<2x128xf32>
    %cst_6 = arith.constant 0.000000e+00 : f32
    %7 = vector.broadcast %cst_6 : f32 to vector<2x128xf32>
    %8 = arith.maximumf %6, %7 : vector<2x128xf32>
    %c1 = arith.constant 1 : index
    %c0_7 = arith.constant 0 : index
    %c0_8 = arith.constant 0 : index
    %9 = vector.load %arg1[%c1, %c0_7, %c0_8] : memref<4x2x576xbf16, #tpu.memory_space<vmem>>, vector<1x2x576xbf16>
    %10 = vector.shape_cast %9 : vector<1x2x576xbf16> to vector<2x576xbf16>
    %cst_9 = arith.constant dense<0.000000e+00> : vector<2x128xf32>
    %11 = tpu.matmul %10, %0, %cst_9 {dimension_numbers = #tpu.dot_dimension_numbers<[1], [0], [0], [1], [0, 0, 1, 1], [], []>} : vector<2x576xbf16>, vector<576x128xbf16>, vector<2x128xf32> -> vector<2x128xf32>
    %12 = vector.broadcast %1 : vector<1x128xf32> to vector<2x128xf32>
    %13 = arith.addf %11, %12 : vector<2x128xf32>
    %cst_10 = arith.constant 0.000000e+00 : f32
    %14 = vector.broadcast %cst_10 : f32 to vector<2x128xf32>
    %15 = arith.maximumf %13, %14 : vector<2x128xf32>
    %16 = arith.maximumf %8, %15 : vector<2x128xf32>
    %c2 = arith.constant 2 : index
    %c0_11 = arith.constant 0 : index
    %c0_12 = arith.constant 0 : index
    %17 = vector.load %arg1[%c2, %c0_11, %c0_12] : memref<4x2x576xbf16, #tpu.memory_space<vmem>>, vector<1x2x576xbf16>
    %18 = vector.shape_cast %17 : vector<1x2x576xbf16> to vector<2x576xbf16>
    %cst_13 = arith.constant dense<0.000000e+00> : vector<2x128xf32>
    %19 = tpu.matmul %18, %0, %cst_13 {dimension_numbers = #tpu.dot_dimension_numbers<[1], [0], [0], [1], [0, 0, 1, 1], [], []>} : vector<2x576xbf16>, vector<576x128xbf16>, vector<2x128xf32> -> vector<2x128xf32>
    %20 = vector.broadcast %1 : vector<1x128xf32> to vector<2x128xf32>
    %21 = arith.addf %19, %20 : vector<2x128xf32>
    %cst_14 = arith.constant 0.000000e+00 : f32
    %22 = vector.broadcast %cst_14 : f32 to vector<2x128xf32>
    %23 = arith.maximumf %21, %22 : vector<2x128xf32>
    %24 = arith.maximumf %16, %23 : vector<2x128xf32>
    %c3 = arith.constant 3 : index
    %c0_15 = arith.constant 0 : index
    %c0_16 = arith.constant 0 : index
    %25 = vector.load %arg1[%c3, %c0_15, %c0_16] : memref<4x2x576xbf16, #tpu.memory_space<vmem>>, vector<1x2x576xbf16>
    %26 = vector.shape_cast %25 : vector<1x2x576xbf16> to vector<2x576xbf16>
    %cst_17 = arith.constant dense<0.000000e+00> : vector<2x128xf32>
    %27 = tpu.matmul %26, %0, %cst_17 {dimension_numbers = #tpu.dot_dimension_numbers<[1], [0], [0], [1], [0, 0, 1, 1], [], []>} : vector<2x576xbf16>, vector<576x128xbf16>, vector<2x128xf32> -> vector<2x128xf32>
    %28 = vector.broadcast %1 : vector<1x128xf32> to vector<2x128xf32>
    %29 = arith.addf %27, %28 : vector<2x128xf32>
    %cst_18 = arith.constant 0.000000e+00 : f32
    %30 = vector.broadcast %cst_18 : f32 to vector<2x128xf32>
    %31 = arith.maximumf %29, %30 : vector<2x128xf32>
    %32 = arith.maximumf %24, %31 : vector<2x128xf32>
    %c0_19 = arith.constant 0 : index
    %c0_20 = arith.constant 0 : index
    %33 = vector.load %arg4[%c0_19, %c0_20] : memref<1x128xf32, #tpu.memory_space<vmem>>, vector<1x128xf32>
    %34 = vector.broadcast %33 : vector<1x128xf32> to vector<2x128xf32>
    %35 = arith.mulf %32, %34 : vector<2x128xf32>
    %c0_21 = arith.constant 0 : index
    %c0_22 = arith.constant 0 : index
    %36 = vector.load %arg5[%c0_21, %c0_22] : memref<1x128xf32, #tpu.memory_space<vmem>>, vector<1x128xf32>
    %37 = vector.broadcast %36 : vector<1x128xf32> to vector<2x128xf32>
    %38 = arith.addf %35, %37 : vector<2x128xf32>
    %39 = arith.truncf %38 : vector<2x128xf32> to vector<2x128xbf16>
    %c0_23 = arith.constant 0 : index
    %c0_24 = arith.constant 0 : index
    %40 = vector.load %arg6[%c0_23, %c0_24] : memref<2x128xbf16, #tpu.memory_space<vmem>>, vector<2x128xbf16>
    tpu.vector_store %arg6[%c0_23, %c0_24], %39 {strides = array<i32>} : memref<2x128xbf16, #tpu.memory_space<vmem>>, vector<2x128xbf16>,
    return
  }
  func.func @transform_0(%arg0: i32) -> (i32, i32, i32) {
    %c0_i32 = arith.constant 0 : i32
    %c0_i32_0 = arith.constant 0 : i32
    %c0_i32_1 = arith.constant 0 : i32
    return %c0_i32, %arg0, %c0_i32_0 : i32, i32, i32
  }
  func.func @transform_1(%arg0: i32) -> (i32, i32) {
    %c0_i32 = arith.constant 0 : i32
    %c0_i32_0 = arith.constant 0 : i32
    %c0_i32_1 = arith.constant 0 : i32
    return %c0_i32, %c0_i32_0 : i32, i32
  }
  func.func @transform_2(%arg0: i32) -> (i32, i32) {
    %c0_i32 = arith.constant 0 : i32
    %c0_i32_0 = arith.constant 0 : i32
    %c0_i32_1 = arith.constant 0 : i32
    return %c0_i32, %c0_i32_0 : i32, i32
  }
  func.func @transform_3(%arg0: i32) -> (i32, i32) {
    %c0_i32 = arith.constant 0 : i32
    %c0_i32_0 = arith.constant 0 : i32
    %c0_i32_1 = arith.constant 0 : i32
    return %c0_i32, %c0_i32_0 : i32, i32
  }
  func.func @transform_4(%arg0: i32) -> (i32, i32) {
    %c0_i32 = arith.constant 0 : i32
    %c0_i32_0 = arith.constant 0 : i32
    %c0_i32_1 = arith.constant 0 : i32
    return %c0_i32, %c0_i32_0 : i32, i32
  }
  func.func @transform_5(%arg0: i32) -> (i32, i32) {
    %c0_i32 = arith.constant 0 : i32
    %c0_i32_0 = arith.constant 0 : i32
    return %arg0, %c0_i32 : i32, i32
  }
}

module attributes {stable_mosaic.version = 11 : i64} {
  func.func @kernel(%arg0: i32, %arg1: memref<2x128xbf16, #tpu.memory_space<vmem>>, %arg2: memref<128x32xbf16, #tpu.memory_space<vmem>>, %arg3: memref<1x32xf32, #tpu.memory_space<vmem>>, %arg4: memref<32x10xbf16, #tpu.memory_space<vmem>>, %arg5: memref<1x10xf32, #tpu.memory_space<vmem>>, %arg6: memref<2x10xf32, #tpu.memory_space<vmem>>) attributes {dimension_semantics = [#tpu.dimension_semantics<parallel>], iteration_bounds = array<i64: 1>, scalar_prefetch = 0 : i64, scratch_operands = 0 : i64, tpu.core_type = #tpu.core_type<tc>, window_params = [{transform_indices = @transform_0, window_bounds = array<i64: 2, 128>}, {pipeline_mode = #tpu.pipeline_mode<synchronous>, transform_indices = @transform_1, window_bounds = array<i64: 128, 32>}, {pipeline_mode = #tpu.pipeline_mode<synchronous>, transform_indices = @transform_2, window_bounds = array<i64: 1, 32>}, {pipeline_mode = #tpu.pipeline_mode<synchronous>, transform_indices = @transform_3, window_bounds = array<i64: 32, 10>}, {pipeline_mode = #tpu.pipeline_mode<synchronous>, transform_indices = @transform_4, window_bounds = array<i64: 1, 10>}, {transform_indices = @transform_5, window_bounds = array<i64: 2, 10>}]} {
    %c0 = arith.constant 0 : index
    %c0_0 = arith.constant 0 : index
    %0 = vector.load %arg1[%c0, %c0_0] : memref<2x128xbf16, #tpu.memory_space<vmem>>, vector<2x128xbf16>
    %c0_1 = arith.constant 0 : index
    %c0_2 = arith.constant 0 : index
    %1 = vector.load %arg2[%c0_1, %c0_2] : memref<128x32xbf16, #tpu.memory_space<vmem>>, vector<128x32xbf16>
    %c0_3 = arith.constant 0 : index
    %c0_4 = arith.constant 0 : index
    %2 = vector.load %arg3[%c0_3, %c0_4] : memref<1x32xf32, #tpu.memory_space<vmem>>, vector<1x32xf32>
    %cst = arith.constant dense<0.000000e+00> : vector<2x32xf32>
    %3 = tpu.matmul %0, %1, %cst {dimension_numbers = #tpu.dot_dimension_numbers<[1], [0], [0], [1], [0, 0, 1, 1], [], []>} : vector<2x128xbf16>, vector<128x32xbf16>, vector<2x32xf32> -> vector<2x32xf32>
    %4 = vector.broadcast %2 : vector<1x32xf32> to vector<2x32xf32>
    %5 = arith.addf %3, %4 : vector<2x32xf32>
    %cst_5 = arith.constant 0.000000e+00 : f32
    %6 = vector.broadcast %cst_5 : f32 to vector<2x32xf32>
    %7 = arith.maximumf %5, %6 : vector<2x32xf32>
    %c0_6 = arith.constant 0 : index
    %c0_7 = arith.constant 0 : index
    %8 = vector.load %arg4[%c0_6, %c0_7] : memref<32x10xbf16, #tpu.memory_space<vmem>>, vector<32x10xbf16>
    %c0_8 = arith.constant 0 : index
    %c0_9 = arith.constant 0 : index
    %9 = vector.load %arg5[%c0_8, %c0_9] : memref<1x10xf32, #tpu.memory_space<vmem>>, vector<1x10xf32>
    %10 = arith.truncf %7 : vector<2x32xf32> to vector<2x32xbf16>
    %cst_10 = arith.constant dense<0.000000e+00> : vector<2x10xf32>
    %11 = tpu.matmul %10, %8, %cst_10 {dimension_numbers = #tpu.dot_dimension_numbers<[1], [0], [0], [1], [0, 0, 1, 1], [], []>} : vector<2x32xbf16>, vector<32x10xbf16>, vector<2x10xf32> -> vector<2x10xf32>
    %12 = vector.broadcast %9 : vector<1x10xf32> to vector<2x10xf32>
    %13 = arith.addf %11, %12 : vector<2x10xf32>
    %cst_11 = arith.constant dense<0xFF800000> : vector<2xf32>
    %14 = vector.multi_reduction <maximumf>, %13, %cst_11 [1] : vector<2x10xf32> to vector<2xf32>
    %15 = vector.shape_cast %14 : vector<2xf32> to vector<2x1xf32>
    %16 = vector.broadcast %15 : vector<2x1xf32> to vector<2x10xf32>
    %17 = arith.subf %13, %16 : vector<2x10xf32>
    %18 = math.exp %17 : vector<2x10xf32>
    %19 = vector.broadcast %15 : vector<2x1xf32> to vector<2x10xf32>
    %20 = arith.subf %13, %19 : vector<2x10xf32>
    %cst_12 = arith.constant dense<0.000000e+00> : vector<2xf32>
    %21 = vector.multi_reduction <add>, %18, %cst_12 [1] : vector<2x10xf32> to vector<2xf32>
    %22 = vector.shape_cast %21 : vector<2xf32> to vector<2x1xf32>
    %23 = math.log %22 : vector<2x1xf32>
    %24 = vector.broadcast %23 : vector<2x1xf32> to vector<2x10xf32>
    %25 = arith.subf %20, %24 : vector<2x10xf32>
    %c0_13 = arith.constant 0 : index
    %c0_14 = arith.constant 0 : index
    %26 = vector.load %arg6[%c0_13, %c0_14] : memref<2x10xf32, #tpu.memory_space<vmem>>, vector<2x10xf32>
    tpu.vector_store %arg6[%c0_13, %c0_14], %25 {strides = array<i32>} : memref<2x10xf32, #tpu.memory_space<vmem>>, vector<2x10xf32>,
    return
  }
  func.func @transform_0(%arg0: i32) -> (i32, i32) {
    %c0_i32 = arith.constant 0 : i32
    %c0_i32_0 = arith.constant 0 : i32
    return %arg0, %c0_i32 : i32, i32
  }
  func.func @transform_1(%arg0: i32) -> (i32, i32) {
    %c0_i32 = arith.constant 0 : i32
    %c0_i32_0 = arith.constant 0 : i32
    %c0_i32_1 = arith.constant 0 : i32
    return %c0_i32, %c0_i32_0 : i32, i32
  }
  func.func @transform_2(%arg0: i32) -> (i32, i32) {
    %c0_i32 = arith.constant 0 : i32
    %c0_i32_0 = arith.constant 0 : i32
    %c0_i32_1 = arith.constant 0 : i32
    return %c0_i32, %c0_i32_0 : i32, i32
  }
  func.func @transform_3(%arg0: i32) -> (i32, i32) {
    %c0_i32 = arith.constant 0 : i32
    %c0_i32_0 = arith.constant 0 : i32
    %c0_i32_1 = arith.constant 0 : i32
    return %c0_i32, %c0_i32_0 : i32, i32
  }
  func.func @transform_4(%arg0: i32) -> (i32, i32) {
    %c0_i32 = arith.constant 0 : i32
    %c0_i32_0 = arith.constant 0 : i32
    %c0_i32_1 = arith.constant 0 : i32
    return %c0_i32, %c0_i32_0 : i32, i32
  }
  func.func @transform_5(%arg0: i32) -> (i32, i32) {
    %c0_i32 = arith.constant 0 : i32
    %c0_i32_0 = arith.constant 0 : i32
    return %arg0, %c0_i32 : i32, i32
  }
}

</mosaic_0001>

<bundles_post_ra>
// kernel: net_forward.4
= control target key start
LH: loop header
LB: loop body
LE: loop exit
PB: predicated region body
PF: predicated region fallthrough
CT: control target
= control target key end

     0   :  { %s3876_s18 = smov 0   ;;  %s3878_s19 = smov 0   ;;  %s4713_s0 = inlined_call_operand.vmem [shape: bf16[4,288,25], index: 0, kind: input, shape index: {}]   ;;  %s4714_s1 = inlined_call_operand.vmem [shape: bf16[25,128], index: 1, kind: input, shape index: {}]   ;;  %s4715_s2 = inlined_call_operand.vmem [shape: f32[1,128], index: 2, kind: input, shape index: {}]   ;;  %s4716_s3 = inlined_call_operand.vmem [shape: f32[1,128], index: 3, kind: input, shape index: {}]   ;;  %s4717_s4 = inlined_call_operand.vmem [shape: f32[1,128], index: 4, kind: input, shape index: {}]   ;;  %s4718_s5 = inlined_call_operand.vmem [shape: bf16[288,128], index: 5, kind: output, shape index: {}]  }
   0x1   :  { %s3880_s20 = smov 0  }
   0x2 LB: > { %s3892_s21 = sadd.s32 4294967295, %s3779_s20   ;;  %s3895_s22 = sadd.s32 1, %s3779_s20   ;;  %s3779_s20 = sphi %s3880_s20, %s4730_s20   ;;  %s3775_s19 = sphi %s3878_s19, %s4729_s19   ;;  %s3771_s18 = sphi %s3876_s18, %s4728_s18  }
   0x3   : > { %s19_s23 = ssub.s32 %s3779_s20, %s3895_s22  ;;  %s22_s24 = sadd.s32 1, %s3775_s19 }
   0x4   : > { %p20_p0 = scmp.eq.s32.totalorder %s19_s23, 0  ;;  %p29_p1 = scmp.ne.s32.totalorder %s3775_s19, %s3771_s18 }
   0x5   : > { %p30_p2 = scmp.eq.s32.totalorder %s3779_s20, 0  ;;  %p143_p3 = scmp.eq.s32.totalorder %s3892_s21, 1 }
   0x6   : > { %s3905_s25 = scalar_select %p20_p0, %s3775_s19, %s22_s24  }
   0x7   : > { %p31_p4 = por %p30_p2, %p29_p1  ;;  %p3907_p5 = por %p143_p3, %p29_p1 }
   0x8   : > { %p2827_p6 = scmp.ge.s32.totalorder %s3779_s20, 2 }
   0xa   : > { %177 = sbr.rel (%p2827_p6) target bundleno = 115 (0x73), region = 32 }
  0x11   : > { %180 = sbr.rel (!%p31_p4) target bundleno = 115 (0x73), region = 36  ;;  %s182_s27 = sand.u32 (%p31_p4), 1, %s3775_s19  }
  0x12   : > { %s2829_s28 = sshll.u32 (%p31_p4), %s3779_s20, 5  ;;  %s2828_s29 = sshll.u32 (%p31_p4), %s182_s27, 9 }
  0x13   : > { %s186_s30 = ssub.s32 (%p31_p4), 36, %s2829_s28  ;;  %s3124_s6 = sshll.u32 (%p31_p4), %s3779_s20, 7 }
  0x14   : > { %p187_p7 = scmp.lt.s32.totalorder (%p31_p4), %s186_s30, 32  ;;  %s3920_s9 = scalar_lea.vmem (%p31_p4), %s4713_s0, %s3124_s6  }
  0x15   : > { %s3923_s11 = scalar_lea.vmem (%p31_p4), [#allocation2], %s2828_s29  }
  0x18   : > { %s4732_s30 = smov (!%p187_p7, %s186_s30), 32 }
  0x19   : > { %s2830_s10 = sshll.u32 %s4732_s30, 8 }
  0x1a   : > { %p2833_p8 = scmp.eq.s32.totalorder %s2830_s10, 0 }
  0x1b   : > { %s3926_s12 = sshrl.u32 (!%p2833_p8), %s4732_s30, 4 }
  0x1c   : > { %195 = sbr.rel (%p2833_p8) target bundleno = 115 (0x73), region = 40  ;;  %p2834_p9 = scmp.le.s32.totalorder (!%p2833_p8), %s3926_s12, 0 }
  0x23   : > { %2753 = sbr.rel (%p2834_p9) target bundleno = 94 (0x5e), region = 204  ;;  %s4720_s13 = smov (!%p2834_p9), %s3923_s11 }
  0x24   : > { %s4721_s14 = smov (!%p2834_p9), %s3920_s9  ;;  %s3935_s15 = smov (!%p2834_p9), 0  }
  0x25   : > { %s3937_s16 = smov (!%p2834_p9), 0  }
  0x2a LB: >> { %v211_v0 = vld [vmem:[%s3787_s14] sm:$0xf]  ;;  %v213_v1 = vld [vmem:[%s3787_s14 + $0x4] sm:$0xf]  ;;  %v215_v2 = vld [vmem:[%s3787_s14 + $0x8] sm:$0xf]  ;;  %s3795_s16 = sphi %s3937_s16, %s205_s16   ;;  %s3791_s15 = sphi %s3935_s15, %s4722_s15   ;;  %s3787_s14 = sphi %s4721_s14, %s344_s14   ;;  %s3783_s13 = sphi %s4720_s13, %s345_s13  }
  0x2b   : >> { %212 = vst [vmem:[%s3783_s13] sm:$0xf] %v211_v0  ;;  %214 = vst [vmem:[%s3783_s13 + $0x4] sm:$0xf] %v213_v1  ;;  %v217_v3 = vld [vmem:[%s3787_s14 + $0xc] sm:$0xf]  ;;  %s339_s17 = sadd.s32 1, %s3791_s15 }
  0x2c   : >> { %216 = vst [vmem:[%s3783_s13 + $0x8] sm:$0xf] %v215_v2  ;;  %v219_v4 = vld [vmem:[%s3787_s14 + $0x10] sm:$0xf]  ;;  %v221_v5 = vld [vmem:[%s3787_s14 + $0x14] sm:$0xf]  ;;  %p340_p10 = scmp.ge.s32.totalorder %s339_s17, %s3926_s12 }
  0x2d   : >> { %218 = vst [vmem:[%s3783_s13 + $0xc] sm:$0xf] %v217_v3  ;;  %220 = vst [vmem:[%s3783_s13 + $0x10] sm:$0xf] %v219_v4  ;;  %v223_v6 = vld [vmem:[%s3787_s14 + $0x18] sm:$0xf] }
  0x2e   : >> { %222 = vst [vmem:[%s3783_s13 + $0x14] sm:$0xf] %v221_v5  ;;  %v225_v7 = vld [vmem:[%s3787_s14 + $0x1c] sm:$0xf]  ;;  %v227_v8 = vld [vmem:[%s3787_s14 + $0x20] sm:$0xf] }
  0x2f   : >> { %224 = vst [vmem:[%s3783_s13 + $0x18] sm:$0xf] %v223_v6  ;;  %226 = vst [vmem:[%s3783_s13 + $0x1c] sm:$0xf] %v225_v7  ;;  %v229_v9 = vld [vmem:[%s3787_s14 + $0x24] sm:$0xf] }
  0x30   : >> { %228 = vst [vmem:[%s3783_s13 + $0x20] sm:$0xf] %v227_v8  ;;  %v231_v10 = vld [vmem:[%s3787_s14 + $0x28] sm:$0xf]  ;;  %v233_v11 = vld [vmem:[%s3787_s14 + $0x2c] sm:$0xf] }
  0x31   : >> { %230 = vst [vmem:[%s3783_s13 + $0x24] sm:$0xf] %v229_v9  ;;  %232 = vst [vmem:[%s3783_s13 + $0x28] sm:$0xf] %v231_v10  ;;  %v235_v12 = vld [vmem:[%s3787_s14 + $0x30] sm:$0xf] }
  0x32   : >> { %234 = vst [vmem:[%s3783_s13 + $0x2c] sm:$0xf] %v233_v11  ;;  %v237_v13 = vld [vmem:[%s3787_s14 + $0x34] sm:$0xf]  ;;  %v239_v14 = vld [vmem:[%s3787_s14 + $0x38] sm:$0xf] }
  0x33   : >> { %236 = vst [vmem:[%s3783_s13 + $0x30] sm:$0xf] %v235_v12  ;;  %238 = vst [vmem:[%s3783_s13 + $0x34] sm:$0xf] %v237_v13  ;;  %v241_v15 = vld [vmem:[%s3787_s14 + $0x3c] sm:$0xf] }
  0x34   : >> { %240 = vst [vmem:[%s3783_s13 + $0x38] sm:$0xf] %v239_v14  ;;  %v243_v16 = vld [vmem:[%s3787_s14 + $0x90] sm:$0xf]  ;;  %v245_v17 = vld [vmem:[%s3787_s14 + $0x94] sm:$0xf] }
  0x35   : >> { %242 = vst [vmem:[%s3783_s13 + $0x3c] sm:$0xf] %v241_v15  ;;  %244 = vst [vmem:[%s3783_s13 + $0x80] sm:$0xf] %v243_v16  ;;  %v247_v18 = vld [vmem:[%s3787_s14 + $0x98] sm:$0xf] }
  0x36   : >> { %246 = vst [vmem:[%s3783_s13 + $0x84] sm:$0xf] %v245_v17  ;;  %v249_v19 = vld [vmem:[%s3787_s14 + $0x9c] sm:$0xf]  ;;  %v251_v20 = vld [vmem:[%s3787_s14 + $0xa0] sm:$0xf] }
  0x37   : >> { %248 = vst [vmem:[%s3783_s13 + $0x88] sm:$0xf] %v247_v18  ;;  %250 = vst [vmem:[%s3783_s13 + $0x8c] sm:$0xf] %v249_v19  ;;  %v253_v21 = vld [vmem:[%s3787_s14 + $0xa4] sm:$0xf] }
  0x38   : >> { %252 = vst [vmem:[%s3783_s13 + $0x90] sm:$0xf] %v251_v20  ;;  %v255_v22 = vld [vmem:[%s3787_s14 + $0xa8] sm:$0xf]  ;;  %v257_v23 = vld [vmem:[%s3787_s14 + $0xac] sm:$0xf] }
  0x39   : >> { %254 = vst [vmem:[%s3783_s13 + $0x94] sm:$0xf] %v253_v21  ;;  %256 = vst [vmem:[%s3783_s13 + $0x98] sm:$0xf] %v255_v22  ;;  %v259_v24 = vld [vmem:[%s3787_s14 + $0xb0] sm:$0xf] }
  0x3a   : >> { %258 = vst [vmem:[%s3783_s13 + $0x9c] sm:$0xf] %v257_v23  ;;  %v261_v25 = vld [vmem:[%s3787_s14 + $0xb4] sm:$0xf]  ;;  %v263_v26 = vld [vmem:[%s3787_s14 + $0xb8] sm:$0xf] }
  0x3b   : >> { %260 = vst [vmem:[%s3783_s13 + $0xa0] sm:$0xf] %v259_v24  ;;  %262 = vst [vmem:[%s3783_s13 + $0xa4] sm:$0xf] %v261_v25  ;;  %v265_v27 = vld [vmem:[%s3787_s14 + $0xbc] sm:$0xf] }
  0x3c   : >> { %264 = vst [vmem:[%s3783_s13 + $0xa8] sm:$0xf] %v263_v26  ;;  %v267_v28 = vld [vmem:[%s3787_s14 + $0xc0] sm:$0xf]  ;;  %v269_v29 = vld [vmem:[%s3787_s14 + $0xc4] sm:$0xf] }
  0x3d   : >> { %266 = vst [vmem:[%s3783_s13 + $0xac] sm:$0xf] %v265_v27  ;;  %268 = vst [vmem:[%s3783_s13 + $0xb0] sm:$0xf] %v267_v28  ;;  %v271_v30 = vld [vmem:[%s3787_s14 + $0xc8] sm:$0xf] }
  0x3e   : >> { %270 = vst [vmem:[%s3783_s13 + $0xb4] sm:$0xf] %v269_v29  ;;  %v273_v31 = vld [vmem:[%s3787_s14 + $0xcc] sm:$0xf]  ;;  %v275_v32 = vld [vmem:[%s3787_s14 + $0x120] sm:$0xf] }
  0x3f   : >> { %272 = vst [vmem:[%s3783_s13 + $0xb8] sm:$0xf] %v271_v30  ;;  %274 = vst [vmem:[%s3783_s13 + $0xbc] sm:$0xf] %v273_v31  ;;  %v277_v33 = vld [vmem:[%s3787_s14 + $0x124] sm:$0xf] }
  0x40   : >> { %276 = vst [vmem:[%s3783_s13 + $0x100] sm:$0xf] %v275_v32  ;;  %v279_v34 = vld [vmem:[%s3787_s14 + $0x128] sm:$0xf]  ;;  %v281_v35 = vld [vmem:[%s3787_s14 + $0x12c] sm:$0xf] }
  0x41   : >> { %278 = vst [vmem:[%s3783_s13 + $0x104] sm:$0xf] %v277_v33  ;;  %280 = vst [vmem:[%s3783_s13 + $0x108] sm:$0xf] %v279_v34  ;;  %v283_v36 = vld [vmem:[%s3787_s14 + $0x130] sm:$0xf] }
  0x42   : >> { %282 = vst [vmem:[%s3783_s13 + $0x10c] sm:$0xf] %v281_v35  ;;  %v285_v37 = vld [vmem:[%s3787_s14 + $0x134] sm:$0xf]  ;;  %v287_v38 = vld [vmem:[%s3787_s14 + $0x138] sm:$0xf] }
  0x43   : >> { %284 = vst [vmem:[%s3783_s13 + $0x110] sm:$0xf] %v283_v36  ;;  %286 = vst [vmem:[%s3783_s13 + $0x114] sm:$0xf] %v285_v37  ;;  %v289_v39 = vld [vmem:[%s3787_s14 + $0x13c] sm:$0xf] }
  0x44   : >> { %288 = vst [vmem:[%s3783_s13 + $0x118] sm:$0xf] %v287_v38  ;;  %v291_v40 = vld [vmem:[%s3787_s14 + $0x140] sm:$0xf]  ;;  %v293_v41 = vld [vmem:[%s3787_s14 + $0x144] sm:$0xf] }
  0x45   : >> { %290 = vst [vmem:[%s3783_s13 + $0x11c] sm:$0xf] %v289_v39  ;;  %292 = vst [vmem:[%s3783_s13 + $0x120] sm:$0xf] %v291_v40  ;;  %v295_v42 = vld [vmem:[%s3787_s14 + $0x148] sm:$0xf] }
  0x46   : >> { %294 = vst [vmem:[%s3783_s13 + $0x124] sm:$0xf] %v293_v41  ;;  %v297_v43 = vld [vmem:[%s3787_s14 + $0x14c] sm:$0xf]  ;;  %v299_v44 = vld [vmem:[%s3787_s14 + $0x150] sm:$0xf] }
  0x47   : >> { %296 = vst [vmem:[%s3783_s13 + $0x128] sm:$0xf] %v295_v42  ;;  %298 = vst [vmem:[%s3783_s13 + $0x12c] sm:$0xf] %v297_v43  ;;  %v301_v45 = vld [vmem:[%s3787_s14 + $0x154] sm:$0xf] }
  0x48   : >> { %300 = vst [vmem:[%s3783_s13 + $0x130] sm:$0xf] %v299_v44  ;;  %v303_v46 = vld [vmem:[%s3787_s14 + $0x158] sm:$0xf]  ;;  %v305_v47 = vld [vmem:[%s3787_s14 + $0x15c] sm:$0xf] }
  0x49   : >> { %302 = vst [vmem:[%s3783_s13 + $0x134] sm:$0xf] %v301_v45  ;;  %304 = vst [vmem:[%s3783_s13 + $0x138] sm:$0xf] %v303_v46  ;;  %v307_v48 = vld [vmem:[%s3787_s14 + $0x1b0] sm:$0xf] }
  0x4a   : >> { %306 = vst [vmem:[%s3783_s13 + $0x13c] sm:$0xf] %v305_v47  ;;  %v309_v49 = vld [vmem:[%s3787_s14 + $0x1b4] sm:$0xf]  ;;  %v311_v50 = vld [vmem:[%s3787_s14 + $0x1b8] sm:$0xf] }
  0x4b   : >> { %308 = vst [vmem:[%s3783_s13 + $0x180] sm:$0xf] %v307_v48  ;;  %310 = vst [vmem:[%s3783_s13 + $0x184] sm:$0xf] %v309_v49  ;;  %v313_v51 = vld [vmem:[%s3787_s14 + $0x1bc] sm:$0xf] }
  0x4c   : >> { %312 = vst [vmem:[%s3783_s13 + $0x188] sm:$0xf] %v311_v50  ;;  %v315_v52 = vld [vmem:[%s3787_s14 + $0x1c0] sm:$0xf]  ;;  %v317_v53 = vld [vmem:[%s3787_s14 + $0x1c4] sm:$0xf] }
  0x4d   : >> { %314 = vst [vmem:[%s3783_s13 + $0x18c] sm:$0xf] %v313_v51  ;;  %316 = vst [vmem:[%s3783_s13 + $0x190] sm:$0xf] %v315_v52  ;;  %v319_v54 = vld [vmem:[%s3787_s14 + $0x1c8] sm:$0xf] }
  0x4e   : >> { %318 = vst [vmem:[%s3783_s13 + $0x194] sm:$0xf] %v317_v53  ;;  %v321_v55 = vld [vmem:[%s3787_s14 + $0x1cc] sm:$0xf]  ;;  %v323_v56 = vld [vmem:[%s3787_s14 + $0x1d0] sm:$0xf] }
  0x4f   : >> { %320 = vst [vmem:[%s3783_s13 + $0x198] sm:$0xf] %v319_v54  ;;  %322 = vst [vmem:[%s3783_s13 + $0x19c] sm:$0xf] %v321_v55  ;;  %v325_v57 = vld [vmem:[%s3787_s14 + $0x1d4] sm:$0xf] }
  0x50   : >> { %324 = vst [vmem:[%s3783_s13 + $0x1a0] sm:$0xf] %v323_v56  ;;  %v327_v58 = vld [vmem:[%s3787_s14 + $0x1d8] sm:$0xf]  ;;  %v329_v59 = vld [vmem:[%s3787_s14 + $0x1dc] sm:$0xf] }
  0x51   : >> { %326 = vst [vmem:[%s3783_s13 + $0x1a4] sm:$0xf] %v325_v57  ;;  %328 = vst [vmem:[%s3783_s13 + $0x1a8] sm:$0xf] %v327_v58  ;;  %v331_v60 = vld [vmem:[%s3787_s14 + $0x1e0] sm:$0xf] }
  0x52   : >> { %330 = vst [vmem:[%s3783_s13 + $0x1ac] sm:$0xf] %v329_v59  ;;  %v333_v61 = vld [vmem:[%s3787_s14 + $0x1e4] sm:$0xf]  ;;  %v335_v62 = vld [vmem:[%s3787_s14 + $0x1e8] sm:$0xf] }
  0x53   : >> { %332 = vst [vmem:[%s3783_s13 + $0x1b0] sm:$0xf] %v331_v60  ;;  %334 = vst [vmem:[%s3783_s13 + $0x1b4] sm:$0xf] %v333_v61  ;;  %v337_v63 = vld [vmem:[%s3787_s14 + $0x1ec] sm:$0xf] }
  0x54   : >> { %336 = vst [vmem:[%s3783_s13 + $0x1b8] sm:$0xf] %v335_v62  ;;  %338 = vst [vmem:[%s3783_s13 + $0x1bc] sm:$0xf] %v337_v63  ;;  %s4734_s17 = smov (%p340_p10, %s339_s17), 0  ;;  %s205_s16 = sadd.s32 1, %s3795_s16  }
  0x55   : >> { %s2835_s23 = sshll.u32 %s4734_s17, 6  ;;  %p204_p11 = scmp.ge.s32.totalorder %s205_s16, %s3926_s12 }
  0x56   : >> { %s344_s14 = scalar_lea.vmem %s3920_s9, %s2835_s23   ;;  %s345_s13 = scalar_lea.vmem %s3923_s11, %s2835_s23 [#allocation2]  }
  0x57   : >> { %s4722_s15 = smov %s4734_s17  ;;  %207 = sbr.rel (!%p204_p11) target bundleno = 42 (0x2a), region = 210 }
  0x5e PF: > { %s4094_s24 = sand.u32 15, %s4732_s30   ;;  %s3125_s27 = sshll.u32 %s3926_s12, 6 }
  0x5f   : > { %s4098_s28 = scalar_lea.vmem %s3920_s9, %s3125_s27   ;;  %s4101_s29 = scalar_lea.vmem %s3923_s11, %s3125_s27 [#allocation2]  }
  0x60   : > { %p2840_p12 = scmp.le.s32.totalorder %s4094_s24, 0 }
  0x61   : > { %s4723_s6 = smov (!%p2840_p12), %s4101_s29  ;;  %s4724_s7 = smov (!%p2840_p12), %s4098_s28 }
  0x62   : > { %2767 = sbr.rel (%p2840_p12) target bundleno = 115 (0x73), region = 215  ;;  %s3805_s8 = smov (!%p2840_p12), 0  }
  0x63   : > { %s3809_s10 = smov (!%p2840_p12), 0  }
  0x69 LB: >> { %v362_v0 = vld [vmem:[%s3803_s7] sm:$0xf]  ;;  %v364_v1 = vld [vmem:[%s3803_s7 + $0x90] sm:$0xf]  ;;  %s370_s30 = sadd.s32 1, %s3807_s8  ;;  %s356_s10 = sadd.s32 1, %s3811_s10   ;;  %s3811_s10 = sphi %s3809_s10, %s356_s10   ;;  %s3807_s8 = sphi %s3805_s8, %s3806_s8   ;;  %s3803_s7 = sphi %s4724_s7, %s375_s7   ;;  %s3799_s6 = sphi %s4723_s6, %s376_s6  }
  0x6a   : >> { %v366_v2 = vld [vmem:[%s3803_s7 + $0x120] sm:$0xf]  ;;  %363 = vst [vmem:[%s3799_s6] sm:$0xf] %v362_v0  ;;  %365 = vst [vmem:[%s3799_s6 + $0x80] sm:$0xf] %v364_v1  ;;  %p371_p13 = scmp.ge.s32.totalorder %s370_s30, %s4094_s24  ;;  %p355_p0 = scmp.ge.s32.totalorder %s356_s10, %s4094_s24 }
  0x6b   : >> { %367 = vst [vmem:[%s3799_s6 + $0x100] sm:$0xf] %v366_v2  ;;  %v368_v3 = vld [vmem:[%s3803_s7 + $0x1b0] sm:$0xf] }
  0x6c   : >> { %369 = vst [vmem:[%s3799_s6 + $0x180] sm:$0xf] %v368_v3  ;;  %s4736_s30 = smov (%p371_p13, %s370_s30), 0  ;;  %358 = sbr.rel (!%p355_p0) target bundleno = 105 (0x69), region = 221 }
  0x6d   : >> { %s2841_s9 = sshll.u32 %s4736_s30, 2  ;;  %s3806_s8 = smov %s4736_s30  }
  0x6e   : >> { %s375_s7 = scalar_lea.vmem %s4098_s28, %s2841_s9   ;;  %s376_s6 = scalar_lea.vmem %s4101_s29, %s2841_s9 [#allocation2]  }
  0x73 PF: > { %p2843_p1 = scmp.ge.s32.totalorder %s3779_s20, 1  ;;  %p598_p2 = scmp.lt.s32.totalorder %s3779_s20, 3 }
  0x75   : > { %p599_p3 = pnand %p2843_p1, %p598_p2 }
  0x76   : > { %v3626_v4 = vld [vmem:[%s4714_s1] sm:$0xff] (!%p599_p3)   ;;  %vm825_vm0 = vcmask (!%p599_p3), 1043456   ;;  %v3627_v5 = vld [vmem:[%s4714_s1 + $0x8] sm:$0x1f] (!%p599_p3)   ;;  %vm826_vm1 = vcmask (!%p599_p3), 1044480   ;;  %s605_s15 = sand.u32 (!%p599_p3), 1, %s3771_s18  }
  0x77   : > { %602 = sbr.rel (%p599_p3) target bundleno = 552 (0x228), region = 98  ;;  %3329 = vmatprep.subr.bf16.mxu0 (!%p599_p3), %v3626_v4  ;;  %3365 = vmatprep.subr.bf16.mxu1 (!%p599_p3), %v3626_v4  ;;  %v3845_v6 = vmov (!%p599_p3), 65535   ;;  %s2844_s20 = sshll.u32 (!%p599_p3), %s605_s15, 9  ;;  %vm776_vm2 = vcmask (!%p599_p3), 203776  }
  0x78   : > { %3330 = vmatpush3.bf16.msra.mxu0 (!%p599_p3), %v3626_v4  ;;  %3366 = vmatpush3.bf16.msra.mxu1 (!%p599_p3), %v3626_v4  ;;  %v827_v7 = vsel (!%p599_p3), %vm825_vm0, 4294967295, %v3845_v6  ;;  %s4131_s16 = scalar_lea.vmem (!%p599_p3), [#allocation2], %s2844_s20  ;;  %s2845_s6 = sshll.u32 (!%p599_p3), %s605_s15, 7 }
  0x79   : > { %v828_v8 = vsel (!%p599_p3), %vm826_vm1, %v827_v7, 0  ;;  %v3628_v10 = vld [vmem:[%s4131_s16] sm:$0xff] (!%p599_p3)   ;;  %v3630_v12 = vld [vmem:[%s4131_s16 + $0x8] sm:$0xff] (!%p599_p3)   ;;  %v3632_v14 = vld [vmem:[%s4131_s16 + $0x10] sm:$0xff] (!%p599_p3)   ;;  %s4436_s18 = scalar_lea.vmem (!%p599_p3), [#allocation3], %s2845_s6  }
  0x7a   : > { %v830_v9 = vand.u32 (!%p599_p3), %v3627_v5, %v828_v8  ;;  %v3629_v11 = vld [vmem:[%s4131_s16 + $0x80] sm:$0xff] (!%p599_p3)   ;;  %v3631_v13 = vld [vmem:[%s4131_s16 + $0x88] sm:$0xff] (!%p599_p3)   ;;  %3333 = vmatprep.mubr.msk.bf16.mxu0 (!%p599_p3), %vm776_vm2, %v3628_v10  ;;  %v3633_v15 = vld [vmem:[%s4131_s16 + $0x90] sm:$0xff] (!%p599_p3)  }
  0x7b   : > { %3369 = vmatprep.mubr.msk.bf16.mxu1 (!%p599_p3), %vm776_vm2, %v3629_v11  ;;  %v3634_v16 = vld [vmem:[%s4131_s16 + $0x18] sm:$0xff] (!%p599_p3)   ;;  %v3636_v18 = vld [vmem:[%s4131_s16 + $0x20] sm:$0xff] (!%p599_p3)   ;;  %v3638_v20 = vld [vmem:[%s4131_s16 + $0x28] sm:$0xff] (!%p599_p3)  }
  0x7c   : > { %3331 = vmatprep.subr.bf16.mxu0 (!%p599_p3), %v830_v9  ;;  %3367 = vmatprep.subr.bf16.mxu1 (!%p599_p3), %v830_v9  ;;  %v3635_v17 = vld [vmem:[%s4131_s16 + $0x98] sm:$0xff] (!%p599_p3)   ;;  %v3637_v19 = vld [vmem:[%s4131_s16 + $0xa0] sm:$0xff] (!%p599_p3)   ;;  %v3639_v21 = vld [vmem:[%s4131_s16 + $0xa8] sm:$0xff] (!%p599_p3)  }
  0x7d   : > { %3332 = vmatpush3.bf16.msra.mxu0 (!%p599_p3), %v830_v9  ;;  %3368 = vmatpush3.bf16.msra.mxu1 (!%p599_p3), %v830_v9  ;;  %v3640_v22 = vld [vmem:[%s4131_s16 + $0x30] sm:$0xff] (!%p599_p3)   ;;  %v3642_v24 = vld [vmem:[%s4131_s16 + $0x38] sm:$0xff] (!%p599_p3)   ;;  %v3644_v26 = vld [vmem:[%s4131_s16 + $0x40] sm:$0xff] (!%p599_p3)  }
  0x7e   : > { %3401 = vmatprep.subr.bf16.mxu0 %v3626_v4  ;;  %3437 = vmatprep.subr.bf16.mxu1 %v3626_v4  ;;  %v3641_v23 = vld [vmem:[%s4131_s16 + $0xb0] sm:$0xff]   ;;  %v3643_v25 = vld [vmem:[%s4131_s16 + $0xb8] sm:$0xff]   ;;  %v3645_v27 = vld [vmem:[%s4131_s16 + $0xc0] sm:$0xff]   ;;  %s3108_s10 = sshll.u32 (%p3907_p5), %s3892_s21, 5  ;;  %s3159_s30 = sshll.u32 (%p3907_p5), %s3892_s21, 7 }
  0x7f   : > { %v3646_v28 = vld [vmem:[%s4131_s16 + $0x48] sm:$0xff]   ;;  %v3648_v30 = vld [vmem:[%s4131_s16 + $0x50] sm:$0xff]   ;;  %v3650_v32 = vld [vmem:[%s4131_s16 + $0x58] sm:$0xff]   ;;  %s2429_s9 = ssub.s32 (%p3907_p5), 36, %s3108_s10  ;;  %s4585_s13 = scalar_lea.vmem (%p3907_p5), %s4718_s5, %s3159_s30  }
  0x80   : > { %3334 = vmatmul.mubr.msk.bf16.vlgmr.msra.gmra.mrb[0].mxu0 %vm776_vm2, %v3630_v12  ;;  %3370 = vmatmul.mubr.msk.bf16.vlgmr.msra.gmra.mrb[0].mxu1 %vm776_vm2, %v3631_v13  ;;  %v3647_v29 = vld [vmem:[%s4131_s16 + $0xc8] sm:$0xff]   ;;  %v3649_v31 = vld [vmem:[%s4131_s16 + $0xd0] sm:$0xff]   ;;  %v3651_v33 = vld [vmem:[%s4131_s16 + $0xd8] sm:$0xff]   ;;  %p2430_p4 = scmp.lt.s32.totalorder (%p3907_p5), %s2429_s9, 32 }
  0x81   : > { %3402 = vmatpush3.bf16.msra.mxu0 %v3626_v4  ;;  %3438 = vmatpush3.bf16.msra.mxu1 %v3626_v4  ;;  %v3652_v34 = vld [vmem:[%s4131_s16 + $0x60] sm:$0xff]   ;;  %v3654_v36 = vld [vmem:[%s4131_s16 + $0x68] sm:$0xff]   ;;  %v3656_v38 = vld [vmem:[%s4131_s16 + $0x70] sm:$0xff]  }
  0x82   : > { %3337 = vmatprep.mubr.msk.bf16.mxu0 %vm776_vm2, %v3632_v14  ;;  %3373 = vmatprep.mubr.msk.bf16.mxu1 %vm776_vm2, %v3633_v15  ;;  %v3653_v35 = vld [vmem:[%s4131_s16 + $0xe0] sm:$0xff]   ;;  %v3655_v37 = vld [vmem:[%s4131_s16 + $0xe8] sm:$0xff]   ;;  %v3657_v39 = vld [vmem:[%s4131_s16 + $0xf0] sm:$0xff]  }
  0x83   : > { %3403 = vmatprep.subr.bf16.mxu0 %v830_v9  ;;  %3439 = vmatprep.subr.bf16.mxu1 %v830_v9  ;;  %v3658_v40 = vld [vmem:[%s4131_s16 + $0x78] sm:$0xff]   ;;  %v3660_v42 = vld [vmem:[%s4131_s16 + $0x100] sm:$0xff]   ;;  %v3662_v44 = vld [vmem:[%s4131_s16 + $0x108] sm:$0xff]  }
  0x84   : > { %v3659_v41 = vld [vmem:[%s4131_s16 + $0xf8] sm:$0xff]   ;;  %v3661_v43 = vld [vmem:[%s4131_s16 + $0x180] sm:$0xff]   ;;  %v3663_v45 = vld [vmem:[%s4131_s16 + $0x188] sm:$0xff]  }
  0x85   : > { %3404 = vmatpush3.bf16.msra.mxu0 %v830_v9  ;;  %3440 = vmatpush3.bf16.msra.mxu1 %v830_v9  ;;  %v3664_v46 = vld [vmem:[%s4131_s16 + $0x110] sm:$0xff]   ;;  %v3666_v48 = vld [vmem:[%s4131_s16 + $0x118] sm:$0xff]   ;;  %v3668_v50 = vld [vmem:[%s4131_s16 + $0x120] sm:$0xff]  }
  0x86   : > { %v3665_v47 = vld [vmem:[%s4131_s16 + $0x190] sm:$0xff]   ;;  %v3667_v49 = vld [vmem:[%s4131_s16 + $0x198] sm:$0xff]   ;;  %v3669_v51 = vld [vmem:[%s4131_s16 + $0x1a0] sm:$0xff]  }
  0x87   : > { %v3670_v52 = vld [vmem:[%s4131_s16 + $0x128] sm:$0xff]   ;;  %v3672_v54 = vld [vmem:[%s4131_s16 + $0x130] sm:$0xff]   ;;  %v3674_v56 = vld [vmem:[%s4131_s16 + $0x138] sm:$0xff]  }
  0x88   : > { %3338 = vmatmul.mubr.msk.bf16.gmra.mrb[4].mxu0 %vm776_vm2, %v3634_v16  ;;  %3374 = vmatmul.mubr.msk.bf16.gmra.mrb[4].mxu1 %vm776_vm2, %v3635_v17  ;;  %v3671_v53 = vld [vmem:[%s4131_s16 + $0x1a8] sm:$0xff]   ;;  %v3673_v55 = vld [vmem:[%s4131_s16 + $0x1b0] sm:$0xff]   ;;  %v3675_v57 = vld [vmem:[%s4131_s16 + $0x1b8] sm:$0xff]  }
  0x89   : > { %3341 = vmatprep.mubr.msk.bf16.mxu0 %vm776_vm2, %v3636_v18  ;;  %3377 = vmatprep.mubr.msk.bf16.mxu1 %vm776_vm2, %v3637_v19  ;;  %v3676_v58 = vld [vmem:[%s4131_s16 + $0x140] sm:$0xff]   ;;  %v3678_v60 = vld [vmem:[%s4131_s16 + $0x148] sm:$0xff]   ;;  %v3680_v62 = vld [vmem:[%s4131_s16 + $0x150] sm:$0xff]  }
  0x8a   : > { %v3677_v59 = vld [vmem:[%s4131_s16 + $0x1c0] sm:$0xff]   ;;  %v3679_v61 = vld [vmem:[%s4131_s16 + $0x1c8] sm:$0xff]   ;;  %v3681_v63 = vld [vmem:[%s4131_s16 + $0x1d0] sm:$0xff]  }
  0x8b   : > { %v3682_v0 = vld [vmem:[%s4131_s16 + $0x158] sm:$0xff]   ;;  %v3684_v2 = vld [vmem:[%s4131_s16 + $0x160] sm:$0xff]   ;;  %v3686_v4 = vld [vmem:[%s4131_s16 + $0x168] sm:$0xff]  }
  0x8c   : > { %v3683_v1 = vld [vmem:[%s4131_s16 + $0x1d8] sm:$0xff]   ;;  %v3685_v3 = vld [vmem:[%s4131_s16 + $0x1e0] sm:$0xff]   ;;  %v3687_v5 = vld [vmem:[%s4131_s16 + $0x1e8] sm:$0xff]  }
  0x8d   : > { %v3688_v6 = vld [vmem:[%s4131_s16 + $0x170] sm:$0xff]   ;;  %v3690_v8 = vld [vmem:[%s4131_s16 + $0x178] sm:$0xff]   ;;  %v4264_v10 = vld [vmem:[%s4715_s2] ss:$0 sm:$0xff] }
  0x8e   : > { %v3689_v7 = vld [vmem:[%s4131_s16 + $0x1f0] sm:$0xff]   ;;  %v3691_v9 = vld [vmem:[%s4131_s16 + $0x1f8] sm:$0xff]  }
  0x90   : > { %3342 = vmatmul.mubr.msk.bf16.gmra.mrb[8].mxu0 %vm776_vm2, %v3638_v20  ;;  %3378 = vmatmul.mubr.msk.bf16.gmra.mrb[8].mxu1 %vm776_vm2, %v3639_v21 }
  0x91   : > { %3345 = vmatprep.mubr.msk.bf16.mxu0 %vm776_vm2, %v3640_v22  ;;  %3381 = vmatprep.mubr.msk.bf16.mxu1 %vm776_vm2, %v3641_v23 }
  0x98   : > { %3346 = vmatmul.mubr.msk.bf16.gmra.mrb[12].mxu0 %vm776_vm2, %v3642_v24  ;;  %3382 = vmatmul.mubr.msk.bf16.gmra.mrb[12].mxu1 %vm776_vm2, %v3643_v25 }
  0x99   : > { %3349 = vmatprep.mubr.msk.bf16.mxu0 %vm776_vm2, %v3644_v26  ;;  %3385 = vmatprep.mubr.msk.bf16.mxu1 %vm776_vm2, %v3645_v27 }
  0xa0   : > { %3350 = vmatmul.mubr.msk.bf16.gmra.mrb[16].mxu0 %vm776_vm2, %v3646_v28  ;;  %3386 = vmatmul.mubr.msk.bf16.gmra.mrb[16].mxu1 %vm776_vm2, %v3647_v29 }
  0xa1   : > { %3353 = vmatprep.mubr.msk.bf16.mxu0 %vm776_vm2, %v3648_v30  ;;  %3389 = vmatprep.mubr.msk.bf16.mxu1 %vm776_vm2, %v3649_v31 }
  0xa8   : > { %3354 = vmatmul.mubr.msk.bf16.gmra.mrb[20].mxu0 %vm776_vm2, %v3650_v32  ;;  %3390 = vmatmul.mubr.msk.bf16.gmra.mrb[20].mxu1 %vm776_vm2, %v3651_v33 }
  0xa9   : > { %3357 = vmatprep.mubr.msk.bf16.mxu0 %vm776_vm2, %v3652_v34  ;;  %3393 = vmatprep.mubr.msk.bf16.mxu1 %vm776_vm2, %v3653_v35 }
  0xb0   : > { %3358 = vmatmul.mubr.msk.bf16.gmra.mrb[24].mxu0 %vm776_vm2, %v3654_v36  ;;  %3394 = vmatmul.mubr.msk.bf16.gmra.mrb[24].mxu1 %vm776_vm2, %v3655_v37 }
  0xb1   : > { %3361 = vmatprep.mubr.msk.bf16.mxu0 %vm776_vm2, %v3656_v38  ;;  %3397 = vmatprep.mubr.msk.bf16.mxu1 %vm776_vm2, %v3657_v39 }
  0xb8   : > { %3362 = vmatmul.mubr.msk.bf16.gmra.mrb[28].mxu0 %vm776_vm2, %v3658_v40  ;;  %3398 = vmatmul.mubr.msk.bf16.gmra.mrb[28].mxu1 %vm776_vm2, %v3659_v41 }
  0xb9   : > { %3405 = vmatprep.mubr.msk.bf16.mxu0 %vm776_vm2, %v3660_v42  ;;  %3441 = vmatprep.mubr.msk.bf16.mxu1 %vm776_vm2, %v3661_v43 }
  0xc0   : > { %3406 = vmatmul.mubr.msk.bf16.vlgmr.msra.gmra.mrb[32].mxu0 %vm776_vm2, %v3662_v44  ;;  %3442 = vmatmul.mubr.msk.bf16.vlgmr.msra.gmra.mrb[32].mxu1 %vm776_vm2, %v3663_v45 }
  0xc1   : > { %3409 = vmatprep.mubr.msk.bf16.mxu0 %vm776_vm2, %v3664_v46  ;;  %3445 = vmatprep.mubr.msk.bf16.mxu1 %vm776_vm2, %v3665_v47 }
  0xc8   : > { %3410 = vmatmul.mubr.msk.bf16.gmra.mrb[36].mxu0 %vm776_vm2, %v3666_v48  ;;  %3446 = vmatmul.mubr.msk.bf16.gmra.mrb[36].mxu1 %vm776_vm2, %v3667_v49 }
  0xc9   : > { %3413 = vmatprep.mubr.msk.bf16.mxu0 %vm776_vm2, %v3668_v50  ;;  %3449 = vmatprep.mubr.msk.bf16.mxu1 %vm776_vm2, %v3669_v51 }
  0xd0   : > { %3414 = vmatmul.mubr.msk.bf16.gmra.mrb[40].mxu0 %vm776_vm2, %v3670_v52  ;;  %3450 = vmatmul.mubr.msk.bf16.gmra.mrb[40].mxu1 %vm776_vm2, %v3671_v53 }
  0xd1   : > { %3417 = vmatprep.mubr.msk.bf16.mxu0 %vm776_vm2, %v3672_v54  ;;  %3453 = vmatprep.mubr.msk.bf16.mxu1 %vm776_vm2, %v3673_v55 }
  0xd8   : > { %3418 = vmatmul.mubr.msk.bf16.gmra.mrb[44].mxu0 %vm776_vm2, %v3674_v56  ;;  %3454 = vmatmul.mubr.msk.bf16.gmra.mrb[44].mxu1 %vm776_vm2, %v3675_v57 }
  0xd9   : > { %3421 = vmatprep.mubr.msk.bf16.mxu0 %vm776_vm2, %v3676_v58  ;;  %3457 = vmatprep.mubr.msk.bf16.mxu1 %vm776_vm2, %v3677_v59 }
  0xe0   : > { %3422 = vmatmul.mubr.msk.bf16.gmra.mrb[48].mxu0 %vm776_vm2, %v3678_v60  ;;  %3458 = vmatmul.mubr.msk.bf16.gmra.mrb[48].mxu1 %vm776_vm2, %v3679_v61 }
  0xe1   : > { %3425 = vmatprep.mubr.msk.bf16.mxu0 %vm776_vm2, %v3680_v62  ;;  %3461 = vmatprep.mubr.msk.bf16.mxu1 %vm776_vm2, %v3681_v63 }
  0xe8   : > { %3426 = vmatmul.mubr.msk.bf16.gmra.mrb[52].mxu0 %vm776_vm2, %v3682_v0  ;;  %3462 = vmatmul.mubr.msk.bf16.gmra.mrb[52].mxu1 %vm776_vm2, %v3683_v1 }
  0xe9   : > { %3429 = vmatprep.mubr.msk.bf16.mxu0 %vm776_vm2, %v3684_v2  ;;  %3465 = vmatprep.mubr.msk.bf16.mxu1 %vm776_vm2, %v3685_v3 }
  0xf0   : > { %3430 = vmatmul.mubr.msk.bf16.gmra.mrb[56].mxu0 %vm776_vm2, %v3686_v4  ;;  %3466 = vmatmul.mubr.msk.bf16.gmra.mrb[56].mxu1 %vm776_vm2, %v3687_v5 }
  0xf1   : > { %3433 = vmatprep.mubr.msk.bf16.mxu0 %vm776_vm2, %v3688_v6  ;;  %3469 = vmatprep.mubr.msk.bf16.mxu1 %vm776_vm2, %v3689_v7 }
  0xf8   : > { %3434 = vmatmul.mubr.msk.bf16.gmra.mrb[60].mxu0 %vm776_vm2, %v3690_v8  ;;  %3470 = vmatmul.mubr.msk.bf16.gmra.mrb[60].mxu1 %vm776_vm2, %v3691_v9 }
 0x153   : > { %v3335_v11 = vpop.f32.mrb[0].mxu0  ;;  %v3371_v12 = vpop.f32.mrb[0].mxu1 }
 0x154   : > { %v875_v13 = vadd.f32 %v3335_v11, %v4264_v10  ;;  %v1229_v14 = vadd.f32 %v3371_v12, %v4264_v10  ;;  %v866_v15 = vpop.f32.mrb[1].mxu0  ;;  %v1220_v16 = vpop.f32.mrb[1].mxu1 }
 0x155   : > { %v867_v17 = vadd.f32 %v4264_v10, %v866_v15  ;;  %v1221_v18 = vadd.f32 %v4264_v10, %v1220_v16  ;;  %v3336_v19 = vpop.f32.mrb[2].mxu0  ;;  %v3372_v20 = vpop.f32.mrb[2].mxu1 }
 0x156   : > { %v995_v21 = vmax.f32 %v875_v13, 0.0  ;;  %v1349_v22 = vmax.f32 %v1229_v14, 0.0  ;;  %v878_v23 = vadd.f32 %v3336_v19, %v4264_v10  ;;  %v1232_v24 = vadd.f32 %v3372_v20, %v4264_v10  ;;  %v869_v25 = vpop.f32.mrb[3].mxu0  ;;  %v1223_v26 = vpop.f32.mrb[3].mxu1 }
 0x157   : > { %v993_v27 = vmax.f32 %v867_v17, 0.0  ;;  %v1347_v28 = vmax.f32 %v1221_v18, 0.0  ;;  %v870_v29 = vadd.f32 %v4264_v10, %v869_v25  ;;  %v1224_v30 = vadd.f32 %v4264_v10, %v1223_v26 }
 0x158   : > { %v4274_v31 = vmax.f32 %v995_v21, %v1349_v22  ;;  %v996_v32 = vmax.f32 %v878_v23, 0.0  ;;  %v1350_v33 = vmax.f32 %v1232_v24, 0.0 }
 0x159   : > { %v4276_v34 = vmax.f32 %v993_v27, %v1347_v28  ;;  %v994_v35 = vmax.f32 %v870_v29, 0.0  ;;  %v1348_v36 = vmax.f32 %v1224_v30, 0.0 }
 0x15a   : > { %v4278_v37 = vmax.f32 %v996_v32, %v1350_v33 }
 0x15b   : > { %v4280_v38 = vmax.f32 %v994_v35, %v1348_v36  ;;  %v3339_v39 = vpop.f32.mrb[4].mxu0  ;;  %v3375_v40 = vpop.f32.mrb[4].mxu1 }
 0x15c   : > { %v891_v41 = vadd.f32 %v3339_v39, %v4264_v10  ;;  %v1245_v42 = vadd.f32 %v3375_v40, %v4264_v10  ;;  %v882_v43 = vpop.f32.mrb[5].mxu0  ;;  %v1236_v44 = vpop.f32.mrb[5].mxu1 }
 0x15d   : > { %v883_v45 = vadd.f32 %v4264_v10, %v882_v43  ;;  %v1237_v46 = vadd.f32 %v4264_v10, %v1236_v44  ;;  %v3340_v47 = vpop.f32.mrb[6].mxu0  ;;  %v3376_v48 = vpop.f32.mrb[6].mxu1 }
 0x15e   : > { %v999_v49 = vmax.f32 %v891_v41, 0.0  ;;  %v1353_v50 = vmax.f32 %v1245_v42, 0.0  ;;  %v894_v51 = vadd.f32 %v3340_v47, %v4264_v10  ;;  %v1248_v52 = vadd.f32 %v3376_v48, %v4264_v10  ;;  %v885_v53 = vpop.f32.mrb[7].mxu0  ;;  %v1239_v54 = vpop.f32.mrb[7].mxu1 }
 0x15f   : > { %v997_v55 = vmax.f32 %v883_v45, 0.0  ;;  %v1351_v56 = vmax.f32 %v1237_v46, 0.0  ;;  %v886_v57 = vadd.f32 %v4264_v10, %v885_v53  ;;  %v1240_v58 = vadd.f32 %v4264_v10, %v1239_v54 }
 0x160   : > { %v4290_v59 = vmax.f32 %v999_v49, %v1353_v50  ;;  %v1000_v60 = vmax.f32 %v894_v51, 0.0  ;;  %v1354_v61 = vmax.f32 %v1248_v52, 0.0 }
 0x161   : > { %v4292_v62 = vmax.f32 %v997_v55, %v1351_v56  ;;  %v998_v63 = vmax.f32 %v886_v57, 0.0  ;;  %v1352_v0 = vmax.f32 %v1240_v58, 0.0 }
 0x162   : > { %v4294_v1 = vmax.f32 %v1000_v60, %v1354_v61 }
 0x163   : > { %v4296_v2 = vmax.f32 %v998_v63, %v1352_v0  ;;  %v3343_v3 = vpop.f32.mrb[8].mxu0  ;;  %v3379_v4 = vpop.f32.mrb[8].mxu1 }
 0x164   : > { %v907_v5 = vadd.f32 %v3343_v3, %v4264_v10  ;;  %v1261_v6 = vadd.f32 %v3379_v4, %v4264_v10  ;;  %v898_v7 = vpop.f32.mrb[9].mxu0  ;;  %v1252_v8 = vpop.f32.mrb[9].mxu1 }
 0x165   : > { %v899_v9 = vadd.f32 %v4264_v10, %v898_v7  ;;  %v1253_v11 = vadd.f32 %v4264_v10, %v1252_v8  ;;  %v3344_v12 = vpop.f32.mrb[10].mxu0  ;;  %v3380_v13 = vpop.f32.mrb[10].mxu1 }
 0x166   : > { %v1003_v14 = vmax.f32 %v907_v5, 0.0  ;;  %v1357_v15 = vmax.f32 %v1261_v6, 0.0  ;;  %v910_v16 = vadd.f32 %v3344_v12, %v4264_v10  ;;  %v1264_v17 = vadd.f32 %v3380_v13, %v4264_v10  ;;  %v901_v18 = vpop.f32.mrb[11].mxu0  ;;  %v1255_v19 = vpop.f32.mrb[11].mxu1 }
 0x167   : > { %v1001_v20 = vmax.f32 %v899_v9, 0.0  ;;  %v1355_v21 = vmax.f32 %v1253_v11, 0.0  ;;  %v902_v22 = vadd.f32 %v4264_v10, %v901_v18  ;;  %v1256_v23 = vadd.f32 %v4264_v10, %v1255_v19 }
 0x168   : > { %v4306_v24 = vmax.f32 %v1003_v14, %v1357_v15  ;;  %v1004_v25 = vmax.f32 %v910_v16, 0.0  ;;  %v1358_v26 = vmax.f32 %v1264_v17, 0.0 }
 0x169   : > { %v4308_v27 = vmax.f32 %v1001_v20, %v1355_v21  ;;  %v1002_v28 = vmax.f32 %v902_v22, 0.0  ;;  %v1356_v29 = vmax.f32 %v1256_v23, 0.0 }
 0x16a   : > { %v4310_v30 = vmax.f32 %v1004_v25, %v1358_v26 }
 0x16b   : > { %v4312_v32 = vmax.f32 %v1002_v28, %v1356_v29  ;;  %v3347_v33 = vpop.f32.mrb[12].mxu0  ;;  %v3383_v35 = vpop.f32.mrb[12].mxu1 }
 0x16c   : > { %v923_v36 = vadd.f32 %v3347_v33, %v4264_v10  ;;  %v1277_v39 = vadd.f32 %v3383_v35, %v4264_v10  ;;  %v914_v40 = vpop.f32.mrb[13].mxu0  ;;  %v1268_v41 = vpop.f32.mrb[13].mxu1 }
 0x16d   : > { %v915_v42 = vadd.f32 %v4264_v10, %v914_v40  ;;  %v1269_v43 = vadd.f32 %v4264_v10, %v1268_v41  ;;  %v3348_v44 = vpop.f32.mrb[14].mxu0  ;;  %v3384_v45 = vpop.f32.mrb[14].mxu1 }
 0x16e   : > { %v1007_v46 = vmax.f32 %v923_v36, 0.0  ;;  %v1361_v47 = vmax.f32 %v1277_v39, 0.0  ;;  %v926_v48 = vadd.f32 %v3348_v44, %v4264_v10  ;;  %v1280_v49 = vadd.f32 %v3384_v45, %v4264_v10  ;;  %v917_v50 = vpop.f32.mrb[15].mxu0  ;;  %v1271_v51 = vpop.f32.mrb[15].mxu1 }
 0x16f   : > { %v1005_v52 = vmax.f32 %v915_v42, 0.0  ;;  %v1359_v53 = vmax.f32 %v1269_v43, 0.0  ;;  %v918_v54 = vadd.f32 %v4264_v10, %v917_v50  ;;  %v1272_v55 = vadd.f32 %v4264_v10, %v1271_v51 }
 0x170   : > { %v4322_v56 = vmax.f32 %v1007_v46, %v1361_v47  ;;  %v1008_v57 = vmax.f32 %v926_v48, 0.0  ;;  %v1362_v58 = vmax.f32 %v1280_v49, 0.0 }
 0x171   : > { %v4324_v60 = vmax.f32 %v1005_v52, %v1359_v53  ;;  %v1006_v61 = vmax.f32 %v918_v54, 0.0  ;;  %v1360_v63 = vmax.f32 %v1272_v55, 0.0 }
 0x172   : > { %v4326_v0 = vmax.f32 %v1008_v57, %v1362_v58 }
 0x173   : > { %v4328_v3 = vmax.f32 %v1006_v61, %v1360_v63  ;;  %v3351_v4 = vpop.f32.mrb[16].mxu0  ;;  %v3387_v5 = vpop.f32.mrb[16].mxu1 }
 0x174   : > { %v939_v6 = vadd.f32 %v3351_v4, %v4264_v10  ;;  %v1293_v7 = vadd.f32 %v3387_v5, %v4264_v10  ;;  %v930_v8 = vpop.f32.mrb[17].mxu0  ;;  %v1284_v9 = vpop.f32.mrb[17].mxu1 }
 0x175   : > { %v931_v11 = vadd.f32 %v4264_v10, %v930_v8  ;;  %v1285_v12 = vadd.f32 %v4264_v10, %v1284_v9  ;;  %v3352_v13 = vpop.f32.mrb[18].mxu0  ;;  %v3388_v14 = vpop.f32.mrb[18].mxu1 }
 0x176   : > { %v1011_v15 = vmax.f32 %v939_v6, 0.0  ;;  %v1365_v16 = vmax.f32 %v1293_v7, 0.0  ;;  %v942_v17 = vadd.f32 %v3352_v13, %v4264_v10  ;;  %v1296_v18 = vadd.f32 %v3388_v14, %v4264_v10  ;;  %v933_v19 = vpop.f32.mrb[19].mxu0  ;;  %v1287_v20 = vpop.f32.mrb[19].mxu1 }
 0x177   : > { %v1009_v21 = vmax.f32 %v931_v11, 0.0  ;;  %v1363_v22 = vmax.f32 %v1285_v12, 0.0  ;;  %v934_v23 = vadd.f32 %v4264_v10, %v933_v19  ;;  %v1288_v25 = vadd.f32 %v4264_v10, %v1287_v20 }
 0x178   : > { %v4338_v26 = vmax.f32 %v1011_v15, %v1365_v16  ;;  %v1012_v28 = vmax.f32 %v942_v17, 0.0  ;;  %v1366_v29 = vmax.f32 %v1296_v18, 0.0 }
 0x179   : > { %v4340_v33 = vmax.f32 %v1009_v21, %v1363_v22  ;;  %v1010_v35 = vmax.f32 %v934_v23, 0.0  ;;  %v1364_v36 = vmax.f32 %v1288_v25, 0.0 }
 0x17a   : > { %v4342_v39 = vmax.f32 %v1012_v28, %v1366_v29 }
 0x17b   : > { %v4344_v40 = vmax.f32 %v1010_v35, %v1364_v36  ;;  %v3355_v41 = vpop.f32.mrb[20].mxu0  ;;  %v3391_v42 = vpop.f32.mrb[20].mxu1 }
 0x17c   : > { %v955_v43 = vadd.f32 %v3355_v41, %v4264_v10  ;;  %v1309_v44 = vadd.f32 %v3391_v42, %v4264_v10  ;;  %v946_v45 = vpop.f32.mrb[21].mxu0  ;;  %v1300_v46 = vpop.f32.mrb[21].mxu1 }
 0x17d   : > { %v947_v47 = vadd.f32 %v4264_v10, %v946_v45  ;;  %v1301_v48 = vadd.f32 %v4264_v10, %v1300_v46  ;;  %v3356_v49 = vpop.f32.mrb[22].mxu0  ;;  %v3392_v50 = vpop.f32.mrb[22].mxu1 }
 0x17e   : > { %v1015_v51 = vmax.f32 %v955_v43, 0.0  ;;  %v1369_v52 = vmax.f32 %v1309_v44, 0.0  ;;  %v958_v53 = vadd.f32 %v3356_v49, %v4264_v10  ;;  %v1312_v54 = vadd.f32 %v3392_v50, %v4264_v10  ;;  %v949_v55 = vpop.f32.mrb[23].mxu0  ;;  %v1303_v57 = vpop.f32.mrb[23].mxu1 }
 0x17f   : > { %v1013_v58 = vmax.f32 %v947_v47, 0.0  ;;  %v1367_v61 = vmax.f32 %v1301_v48, 0.0  ;;  %v950_v63 = vadd.f32 %v4264_v10, %v949_v55  ;;  %v1304_v4 = vadd.f32 %v4264_v10, %v1303_v57 }
 0x180   : > { %v4354_v5 = vmax.f32 %v1015_v51, %v1369_v52  ;;  %v1016_v6 = vmax.f32 %v958_v53, 0.0  ;;  %v1370_v7 = vmax.f32 %v1312_v54, 0.0 }
 0x181   : > { %v4356_v8 = vmax.f32 %v1013_v58, %v1367_v61  ;;  %v1014_v9 = vmax.f32 %v950_v63, 0.0  ;;  %v1368_v11 = vmax.f32 %v1304_v4, 0.0 }
 0x182   : > { %v4358_v12 = vmax.f32 %v1016_v6, %v1370_v7 }
 0x183   : > { %v4360_v13 = vmax.f32 %v1014_v9, %v1368_v11  ;;  %v3359_v14 = vpop.f32.mrb[24].mxu0  ;;  %v3395_v15 = vpop.f32.mrb[24].mxu1 }
 0x184   : > { %v971_v16 = vadd.f32 %v3359_v14, %v4264_v10  ;;  %v1325_v17 = vadd.f32 %v3395_v15, %v4264_v10  ;;  %v962_v18 = vpop.f32.mrb[25].mxu0  ;;  %v1316_v19 = vpop.f32.mrb[25].mxu1 }
 0x185   : > { %v963_v20 = vadd.f32 %v4264_v10, %v962_v18  ;;  %v1317_v21 = vadd.f32 %v4264_v10, %v1316_v19  ;;  %v3360_v22 = vpop.f32.mrb[26].mxu0  ;;  %v3396_v23 = vpop.f32.mrb[26].mxu1 }
 0x186   : > { %v1019_v25 = vmax.f32 %v971_v16, 0.0  ;;  %v1373_v28 = vmax.f32 %v1325_v17, 0.0  ;;  %v974_v29 = vadd.f32 %v3360_v22, %v4264_v10  ;;  %v1328_v35 = vadd.f32 %v3396_v23, %v4264_v10  ;;  %v965_v36 = vpop.f32.mrb[27].mxu0  ;;  %v1319_v41 = vpop.f32.mrb[27].mxu1 }
 0x187   : > { %v1017_v42 = vmax.f32 %v963_v20, 0.0  ;;  %v1371_v43 = vmax.f32 %v1317_v21, 0.0  ;;  %v966_v44 = vadd.f32 %v4264_v10, %v965_v36  ;;  %v1320_v45 = vadd.f32 %v4264_v10, %v1319_v41 }
 0x188   : > { %v4370_v46 = vmax.f32 %v1019_v25, %v1373_v28  ;;  %v1020_v47 = vmax.f32 %v974_v29, 0.0  ;;  %v1374_v48 = vmax.f32 %v1328_v35, 0.0 }
 0x189   : > { %v4372_v49 = vmax.f32 %v1017_v42, %v1371_v43  ;;  %v1018_v50 = vmax.f32 %v966_v44, 0.0  ;;  %v1372_v51 = vmax.f32 %v1320_v45, 0.0 }
 0x18a   : > { %v4374_v52 = vmax.f32 %v1020_v47, %v1374_v48 }
 0x18b   : > { %v4376_v53 = vmax.f32 %v1018_v50, %v1372_v51  ;;  %v3363_v54 = vpop.f32.mrb[28].mxu0  ;;  %v3399_v55 = vpop.f32.mrb[28].mxu1 }
 0x18c   : > { %v987_v57 = vadd.f32 %v3363_v54, %v4264_v10  ;;  %v1341_v58 = vadd.f32 %v3399_v55, %v4264_v10  ;;  %v978_v61 = vpop.f32.mrb[29].mxu0  ;;  %v1332_v63 = vpop.f32.mrb[29].mxu1 }
 0x18d   : > { %v979_v4 = vadd.f32 %v4264_v10, %v978_v61  ;;  %v1333_v6 = vadd.f32 %v4264_v10, %v1332_v63  ;;  %v3364_v7 = vpop.f32.mrb[30].mxu0  ;;  %v3400_v9 = vpop.f32.mrb[30].mxu1 }
 0x18e   : > { %v1023_v11 = vmax.f32 %v987_v57, 0.0  ;;  %v1377_v14 = vmax.f32 %v1341_v58, 0.0  ;;  %v990_v15 = vadd.f32 %v3364_v7, %v4264_v10  ;;  %v1344_v16 = vadd.f32 %v3400_v9, %v4264_v10  ;;  %v981_v17 = vpop.f32.mrb[31].mxu0  ;;  %v1335_v18 = vpop.f32.mrb[31].mxu1 }
 0x18f   : > { %v1021_v19 = vmax.f32 %v979_v4, 0.0  ;;  %v1375_v20 = vmax.f32 %v1333_v6, 0.0  ;;  %v982_v21 = vadd.f32 %v4264_v10, %v981_v17  ;;  %v1336_v22 = vadd.f32 %v4264_v10, %v1335_v18  ;;  %v4406_v18 = vld [vmem:[%s4716_s3] ss:$0 sm:$0xff] }
 0x190   : > { %v4386_v23 = vmax.f32 %v1023_v11, %v1377_v14  ;;  %v1024_v25 = vmax.f32 %v990_v15, 0.0  ;;  %v1378_v28 = vmax.f32 %v1344_v16, 0.0 }
 0x191   : > { %v4388_v29 = vmax.f32 %v1021_v19, %v1375_v20  ;;  %v1022_v35 = vmax.f32 %v982_v21, 0.0  ;;  %v1376_v36 = vmax.f32 %v1336_v22, 0.0 }
 0x192   : > { %v4390_v41 = vmax.f32 %v1024_v25, %v1378_v28  ;;  %v4413_v28 = vld [vmem:[%s4717_s4] ss:$0 sm:$0xff] }
 0x193   : > { %v4392_v42 = vmax.f32 %v1022_v35, %v1376_v36  ;;  %v3407_v43 = vpop.f32.mrb[32].mxu0  ;;  %v3443_v44 = vpop.f32.mrb[32].mxu1 }
 0x194   : > { %v1615_v45 = vadd.f32 %v3407_v43, %v4264_v10  ;;  %v2001_v47 = vadd.f32 %v3443_v44, %v4264_v10  ;;  %v1606_v48 = vpop.f32.mrb[33].mxu0  ;;  %v1992_v50 = vpop.f32.mrb[33].mxu1 }
 0x195   : > { %v1607_v51 = vadd.f32 %v4264_v10, %v1606_v48  ;;  %v1993_v54 = vadd.f32 %v4264_v10, %v1992_v50  ;;  %v3408_v55 = vpop.f32.mrb[34].mxu0  ;;  %v3444_v57 = vpop.f32.mrb[34].mxu1 }
 0x196   : > { %v1735_v58 = vmax.f32 %v1615_v45, 0.0  ;;  %v2121_v61 = vmax.f32 %v2001_v47, 0.0  ;;  %v1618_v63 = vadd.f32 %v3408_v55, %v4264_v10  ;;  %v2004_v4 = vadd.f32 %v3444_v57, %v4264_v10  ;;  %v1609_v6 = vpop.f32.mrb[35].mxu0  ;;  %v1995_v7 = vpop.f32.mrb[35].mxu1 }
 0x197   : > { %v1733_v9 = vmax.f32 %v1607_v51, 0.0  ;;  %v2119_v11 = vmax.f32 %v1993_v54, 0.0  ;;  %v1610_v14 = vadd.f32 %v4264_v10, %v1609_v6  ;;  %v1996_v15 = vadd.f32 %v4264_v10, %v1995_v7 }
 0x198   : > { %v1767_v16 = vmax.f32 %v4274_v31, %v1735_v58  ;;  %v1736_v17 = vmax.f32 %v1618_v63, 0.0  ;;  %v2122_v25 = vmax.f32 %v2004_v4, 0.0 }
 0x199   : > { %v1765_v19 = vmax.f32 %v4276_v34, %v1733_v9  ;;  %v1734_v20 = vmax.f32 %v1610_v14, 0.0  ;;  %v2120_v36 = vmax.f32 %v1996_v15, 0.0 }
 0x19a   : > { %v2153_v21 = vmax.f32 %v1767_v16, %v2121_v61  ;;  %v1768_v22 = vmax.f32 %v4278_v37, %v1736_v17 }
 0x19b   : > { %v2151_v35 = vmax.f32 %v1765_v19, %v2119_v11  ;;  %v1766_v31 = vmax.f32 %v4280_v38, %v1734_v20  ;;  %v3411_v43 = vpop.f32.mrb[36].mxu0  ;;  %v3447_v44 = vpop.f32.mrb[36].mxu1 }
 0x19c   : > { %v2192_v45 = vmul.f32 %v4406_v18, %v2153_v21  ;;  %v2154_v34 = vmax.f32 %v1768_v22, %v2122_v25  ;;  %v1631_v47 = vadd.f32 %v3411_v43, %v4264_v10  ;;  %v2017_v37 = vadd.f32 %v3447_v44, %v4264_v10  ;;  %v1622_v48 = vpop.f32.mrb[37].mxu0  ;;  %v2008_v50 = vpop.f32.mrb[37].mxu1 }
 0x19d   : > { %v2190_v51 = vmul.f32 %v4406_v18, %v2151_v35  ;;  %v2152_v54 = vmax.f32 %v1766_v31, %v2120_v36  ;;  %v1623_v55 = vadd.f32 %v4264_v10, %v1622_v48  ;;  %v2009_v38 = vadd.f32 %v4264_v10, %v2008_v50  ;;  %v3412_v57 = vpop.f32.mrb[38].mxu0  ;;  %v3448_v58 = vpop.f32.mrb[38].mxu1 }
 0x19e   : > { %v2231_v61 = vadd.f32 %v4413_v28, %v2192_v45  ;;  %v2193_v63 = vmul.f32 %v4406_v18, %v2154_v34  ;;  %v1739_v4 = vmax.f32 %v1631_v47, 0.0  ;;  %v2125_v6 = vmax.f32 %v2017_v37, 0.0  ;;  %v1625_v7 = vpop.f32.mrb[39].mxu0  ;;  %v2011_v9 = vpop.f32.mrb[39].mxu1 }
 0x19f   : > { %v2229_v11 = vadd.f32 %v4413_v28, %v2190_v51  ;;  %v2191_v14 = vmul.f32 %v4406_v18, %v2152_v54  ;;  %v1737_v15 = vmax.f32 %v1623_v55, 0.0  ;;  %v2123_v16 = vmax.f32 %v2009_v38, 0.0 }
 0x1a0   : > { %v2232_v17 = vadd.f32 %v4413_v28, %v2193_v63  ;;  %v1771_v19 = vmax.f32 %v4290_v59, %v1739_v4  ;;  %v1634_v20 = vadd.f32 %v3412_v57, %v4264_v10  ;;  %v2020_v21 = vadd.f32 %v3448_v58, %v4264_v10 }
 0x1a1   : > { %v2230_v22 = vadd.f32 %v4413_v28, %v2191_v14  ;;  %v1769_v25 = vmax.f32 %v4292_v62, %v1737_v15  ;;  %v1626_v35 = vadd.f32 %v4264_v10, %v1625_v7  ;;  %v2012_v31 = vadd.f32 %v4264_v10, %v2011_v9 }
 0x1a2   : > { %v3170_v36 = vpack.c.bf16 %v2232_v17, %v2231_v61  ;;  %v2157_v43 = vmax.f32 %v1771_v19, %v2125_v6  ;;  %v1740_v44 = vmax.f32 %v1634_v20, 0.0  ;;  %v2126_v45 = vmax.f32 %v2020_v21, 0.0 }
 0x1a3   : > { %v3165_v34 = vpack.c.bf16 %v2230_v22, %v2229_v11  ;;  %v2155_v47 = vmax.f32 %v1769_v25, %v2123_v16  ;;  %v1738_v37 = vmax.f32 %v1626_v35, 0.0  ;;  %v2124_v59 = vmax.f32 %v2012_v31, 0.0  ;;  %v3415_v48 = vpop.f32.mrb[40].mxu0  ;;  %v3451_v50 = vpop.f32.mrb[40].mxu1 }
 0x1a4   : > { %3242 = vst [vmem:[%s4436_s18 + $0x8] sm:$0xff] %v3170_v36   ;;  %v2196_v62 = vmul.f32 %v4406_v18, %v2157_v43  ;;  %v1772_v51 = vmax.f32 %v4294_v1, %v1740_v44  ;;  %v1647_v54 = vadd.f32 %v3415_v48, %v4264_v10  ;;  %v2033_v55 = vadd.f32 %v3451_v50, %v4264_v10  ;;  %v1638_v38 = vpop.f32.mrb[41].mxu0  ;;  %v2024_v57 = vpop.f32.mrb[41].mxu1 }
 0x1a5   : > { %3166 = vst [vmem:[%s4436_s18] sm:$0xff] %v3165_v34   ;;  %v2194_v58 = vmul.f32 %v4406_v18, %v2155_v47  ;;  %v1770_v61 = vmax.f32 %v4296_v2, %v1738_v37  ;;  %v1639_v63 = vadd.f32 %v4264_v10, %v1638_v38  ;;  %v2025_v4 = vadd.f32 %v4264_v10, %v2024_v57  ;;  %v3416_v6 = vpop.f32.mrb[42].mxu0  ;;  %v3452_v7 = vpop.f32.mrb[42].mxu1 }
 0x1a6   : > { %v2235_v9 = vadd.f32 %v4413_v28, %v2196_v62  ;;  %v2158_v1 = vmax.f32 %v1772_v51, %v2126_v45  ;;  %v1743_v11 = vmax.f32 %v1647_v54, 0.0  ;;  %v2129_v14 = vmax.f32 %v2033_v55, 0.0  ;;  %v1641_v15 = vpop.f32.mrb[43].mxu0  ;;  %v2027_v16 = vpop.f32.mrb[43].mxu1 }
 0x1a7   : > { %v2233_v17 = vadd.f32 %v4413_v28, %v2194_v58  ;;  %v2156_v19 = vmax.f32 %v1770_v61, %v2124_v59  ;;  %v1741_v20 = vmax.f32 %v1639_v63, 0.0  ;;  %v2127_v21 = vmax.f32 %v2025_v4, 0.0 }
 0x1a8   : > { %v2197_v2 = vmul.f32 %v4406_v18, %v2158_v1  ;;  %v1775_v22 = vmax.f32 %v4306_v24, %v1743_v11  ;;  %v1650_v25 = vadd.f32 %v3416_v6, %v4264_v10  ;;  %v2036_v35 = vadd.f32 %v3452_v7, %v4264_v10 }
 0x1a9   : > { %v2195_v31 = vmul.f32 %v4406_v18, %v2156_v19  ;;  %v1773_v36 = vmax.f32 %v4308_v27, %v1741_v20  ;;  %v1642_v43 = vadd.f32 %v4264_v10, %v1641_v15  ;;  %v2028_v44 = vadd.f32 %v4264_v10, %v2027_v16 }
 0x1aa   : > { %v2236_v45 = vadd.f32 %v4413_v28, %v2197_v2  ;;  %v2161_v34 = vmax.f32 %v1775_v22, %v2129_v14  ;;  %v1744_v47 = vmax.f32 %v1650_v25, 0.0  ;;  %v2130_v37 = vmax.f32 %v2036_v35, 0.0 }
 0x1ab   : > { %v2234_v59 = vadd.f32 %v4413_v28, %v2195_v31  ;;  %v2159_v24 = vmax.f32 %v1773_v36, %v2127_v21  ;;  %v1742_v48 = vmax.f32 %v1642_v43, 0.0  ;;  %v2128_v50 = vmax.f32 %v2028_v44, 0.0  ;;  %v3419_v62 = vpop.f32.mrb[44].mxu0  ;;  %v3455_v51 = vpop.f32.mrb[44].mxu1 }
 0x1ac   : > { %v3180_v54 = vpack.c.bf16 %v2236_v45, %v2235_v9  ;;  %v2200_v27 = vmul.f32 %v4406_v18, %v2161_v34  ;;  %v1776_v55 = vmax.f32 %v4310_v30, %v1744_v47  ;;  %v1663_v38 = vadd.f32 %v3419_v62, %v4264_v10  ;;  %v1654_v57 = vpop.f32.mrb[45].mxu0  ;;  %v2040_v58 = vpop.f32.mrb[45].mxu1 }
 0x1ad   : > { %v3175_v61 = vpack.c.bf16 %v2234_v59, %v2233_v17  ;;  %v2198_v63 = vmul.f32 %v4406_v18, %v2159_v24  ;;  %v1774_v4 = vmax.f32 %v4312_v32, %v1742_v48  ;;  %v2049_v6 = vadd.f32 %v3455_v51, %v4264_v10  ;;  %v3420_v7 = vpop.f32.mrb[46].mxu0  ;;  %v3456_v1 = vpop.f32.mrb[46].mxu1 }
 0x1ae   : > { %3244 = vst [vmem:[%s4436_s18 + $0x18] sm:$0xff] %v3180_v54   ;;  %v2239_v9 = vadd.f32 %v4413_v28, %v2200_v27  ;;  %v2162_v11 = vmax.f32 %v1776_v55, %v2130_v37  ;;  %v1747_v14 = vmax.f32 %v1663_v38, 0.0  ;;  %v1655_v30 = vadd.f32 %v4264_v10, %v1654_v57  ;;  %v1657_v15 = vpop.f32.mrb[47].mxu0  ;;  %v2043_v16 = vpop.f32.mrb[47].mxu1 }
 0x1af   : > { %3243 = vst [vmem:[%s4436_s18 + $0x10] sm:$0xff] %v3175_v61   ;;  %v2237_v17 = vadd.f32 %v4413_v28, %v2198_v63  ;;  %v2160_v19 = vmax.f32 %v1774_v4, %v2128_v50  ;;  %v2133_v20 = vmax.f32 %v2049_v6, 0.0  ;;  %v2041_v32 = vadd.f32 %v4264_v10, %v2040_v58 }
 0x1b0   : > { %v2201_v21 = vmul.f32 %v4406_v18, %v2162_v11  ;;  %v1779_v2 = vmax.f32 %v4322_v56, %v1747_v14  ;;  %v1745_v22 = vmax.f32 %v1655_v30, 0.0  ;;  %v1666_v25 = vadd.f32 %v3420_v7, %v4264_v10 }
 0x1b1   : > { %v2199_v35 = vmul.f32 %v4406_v18, %v2160_v19  ;;  %v2131_v31 = vmax.f32 %v2041_v32, 0.0  ;;  %v2052_v36 = vadd.f32 %v3456_v1, %v4264_v10  ;;  %v1658_v43 = vadd.f32 %v4264_v10, %v1657_v15 }
 0x1b2   : > { %v2240_v44 = vadd.f32 %v4413_v28, %v2201_v21  ;;  %v2165_v45 = vmax.f32 %v1779_v2, %v2133_v20  ;;  %v1777_v34 = vmax.f32 %v4324_v60, %v1745_v22  ;;  %v1748_v47 = vmax.f32 %v1666_v25, 0.0 }
 0x1b3   : > { %v2238_v37 = vadd.f32 %v4413_v28, %v2199_v35  ;;  %v2134_v59 = vmax.f32 %v2052_v36, 0.0  ;;  %v1746_v56 = vmax.f32 %v1658_v43, 0.0  ;;  %v2044_v24 = vadd.f32 %v4264_v10, %v2043_v16  ;;  %v3423_v48 = vpop.f32.mrb[48].mxu0  ;;  %v3459_v50 = vpop.f32.mrb[48].mxu1 }
 0x1b4   : > { %v3190_v62 = vpack.c.bf16 %v2240_v44, %v2239_v9  ;;  %v2204_v51 = vmul.f32 %v4406_v18, %v2165_v45  ;;  %v2163_v54 = vmax.f32 %v1777_v34, %v2131_v31  ;;  %v1780_v27 = vmax.f32 %v4326_v0, %v1748_v47  ;;  %v1670_v55 = vpop.f32.mrb[49].mxu0  ;;  %v2056_v38 = vpop.f32.mrb[49].mxu1 }
 0x1b5   : > { %v3185_v60 = vpack.c.bf16 %v2238_v37, %v2237_v17  ;;  %v1778_v57 = vmax.f32 %v4328_v3, %v1746_v56  ;;  %v2132_v58 = vmax.f32 %v2044_v24, 0.0  ;;  %v1679_v61 = vadd.f32 %v3423_v48, %v4264_v10  ;;  %v3424_v63 = vpop.f32.mrb[50].mxu0  ;;  %v3460_v4 = vpop.f32.mrb[50].mxu1 }
 0x1b6   : > { %3246 = vst [vmem:[%s4436_s18 + $0x28] sm:$0xff] %v3190_v62   ;;  %v2243_v6 = vadd.f32 %v4413_v28, %v2204_v51  ;;  %v2202_v7 = vmul.f32 %v4406_v18, %v2163_v54  ;;  %v2166_v1 = vmax.f32 %v1780_v27, %v2134_v59  ;;  %v2065_v9 = vadd.f32 %v3459_v50, %v4264_v10  ;;  %v1673_v0 = vpop.f32.mrb[51].mxu0  ;;  %v2059_v11 = vpop.f32.mrb[51].mxu1 }
 0x1b7   : > { %3245 = vst [vmem:[%s4436_s18 + $0x20] sm:$0xff] %v3185_v60   ;;  %v2164_v14 = vmax.f32 %v1778_v57, %v2132_v58  ;;  %v1751_v30 = vmax.f32 %v1679_v61, 0.0  ;;  %v1671_v3 = vadd.f32 %v4264_v10, %v1670_v55  ;;  %v2057_v15 = vadd.f32 %v4264_v10, %v2056_v38 }
 0x1b8   : > { %v2241_v16 = vadd.f32 %v4413_v28, %v2202_v7  ;;  %v2205_v17 = vmul.f32 %v4406_v18, %v2166_v1  ;;  %v2137_v19 = vmax.f32 %v2065_v9, 0.0  ;;  %v1682_v20 = vadd.f32 %v3424_v63, %v4264_v10 }
 0x1b9   : > { %v2203_v32 = vmul.f32 %v4406_v18, %v2164_v14  ;;  %v1783_v21 = vmax.f32 %v4338_v26, %v1751_v30  ;;  %v1749_v2 = vmax.f32 %v1671_v3, 0.0  ;;  %v2135_v22 = vmax.f32 %v2057_v15, 0.0 }
 0x1ba   : > { %v2244_v25 = vadd.f32 %v4413_v28, %v2205_v17  ;;  %v1752_v35 = vmax.f32 %v1682_v20, 0.0  ;;  %v2068_v31 = vadd.f32 %v3460_v4, %v4264_v10  ;;  %v1674_v36 = vadd.f32 %v4264_v10, %v1673_v0 }
 0x1bb   : > { %v2242_v43 = vadd.f32 %v4413_v28, %v2203_v32  ;;  %v2169_v44 = vmax.f32 %v1783_v21, %v2137_v19  ;;  %v1781_v45 = vmax.f32 %v4340_v33, %v1749_v2  ;;  %v2060_v34 = vadd.f32 %v4264_v10, %v2059_v11  ;;  %v3427_v47 = vpop.f32.mrb[52].mxu0  ;;  %v3463_v37 = vpop.f32.mrb[52].mxu1 }
 0x1bc   : > { %v3200_v26 = vpack.c.bf16 %v2244_v25, %v2243_v6  ;;  %v1784_v59 = vmax.f32 %v4342_v39, %v1752_v35  ;;  %v2138_v56 = vmax.f32 %v2068_v31, 0.0  ;;  %v1750_v24 = vmax.f32 %v1674_v36, 0.0  ;;  %v1686_v48 = vpop.f32.mrb[53].mxu0  ;;  %v2072_v50 = vpop.f32.mrb[53].mxu1 }
 0x1bd   : > { %v3195_v62 = vpack.c.bf16 %v2242_v43, %v2241_v16  ;;  %v2208_v51 = vmul.f32 %v4406_v18, %v2169_v44  ;;  %v2167_v54 = vmax.f32 %v1781_v45, %v2135_v22  ;;  %v2136_v27 = vmax.f32 %v2060_v34, 0.0  ;;  %v3428_v55 = vpop.f32.mrb[54].mxu0  ;;  %v3464_v33 = vpop.f32.mrb[54].mxu1 }
 0x1be   : > { %3248 = vst [vmem:[%s4436_s18 + $0x38] sm:$0xff] %v3200_v26   ;;  %v2170_v38 = vmax.f32 %v1784_v59, %v2138_v56  ;;  %v1782_v60 = vmax.f32 %v4344_v40, %v1750_v24  ;;  %v1695_v57 = vadd.f32 %v3427_v47, %v4264_v10  ;;  %v2081_v39 = vadd.f32 %v3463_v37, %v4264_v10  ;;  %v1689_v58 = vpop.f32.mrb[55].mxu0  ;;  %v2075_v61 = vpop.f32.mrb[55].mxu1 }
 0x1bf   : > { %3247 = vst [vmem:[%s4436_s18 + $0x30] sm:$0xff] %v3195_v62   ;;  %v2206_v63 = vmul.f32 %v4406_v18, %v2167_v54  ;;  %v1687_v4 = vadd.f32 %v4264_v10, %v1686_v48  ;;  %v2073_v6 = vadd.f32 %v4264_v10, %v2072_v50  ;;  %v2247_v40 = vadd.f32 %v4413_v28, %v2208_v51 }
 0x1c0   : > { %v2209_v7 = vmul.f32 %v4406_v18, %v2170_v38  ;;  %v2168_v1 = vmax.f32 %v1782_v60, %v2136_v27  ;;  %v1755_v9 = vmax.f32 %v1695_v57, 0.0  ;;  %v2141_v0 = vmax.f32 %v2081_v39, 0.0 }
 0x1c1   : > { %v1753_v11 = vmax.f32 %v1687_v4, 0.0  ;;  %v2139_v14 = vmax.f32 %v2073_v6, 0.0  ;;  %v1698_v30 = vadd.f32 %v3428_v55, %v4264_v10  ;;  %v2084_v17 = vadd.f32 %v3464_v33, %v4264_v10 }
 0x1c2   : > { %v2248_v3 = vadd.f32 %v4413_v28, %v2209_v7  ;;  %v2207_v15 = vmul.f32 %v4406_v18, %v2168_v1  ;;  %v1787_v16 = vmax.f32 %v4354_v5, %v1755_v9  ;;  %v1690_v32 = vadd.f32 %v4264_v10, %v1689_v58 }
 0x1c3   : > { %v1785_v19 = vmax.f32 %v4356_v8, %v1753_v11  ;;  %v1756_v20 = vmax.f32 %v1698_v30, 0.0  ;;  %v2076_v21 = vadd.f32 %v4264_v10, %v2075_v61  ;;  %v3431_v2 = vpop.f32.mrb[56].mxu0  ;;  %v3467_v22 = vpop.f32.mrb[56].mxu1  ;;  %v2245_v25 = vadd.f32 %v4413_v28, %v2206_v63 }
 0x1c4   : > { %v3210_v35 = vpack.c.bf16 %v2248_v3, %v2247_v40  ;;  %v2246_v31 = vadd.f32 %v4413_v28, %v2207_v15  ;;  %v2173_v36 = vmax.f32 %v1787_v16, %v2141_v0  ;;  %v1702_v43 = vpop.f32.mrb[57].mxu0  ;;  %v2088_v5 = vpop.f32.mrb[57].mxu1  ;;  %v2142_v8 = vmax.f32 %v2084_v17, 0.0 }
 0x1c5   : > { %v2171_v44 = vmax.f32 %v1785_v19, %v2139_v14  ;;  %v1788_v45 = vmax.f32 %v4358_v12, %v1756_v20  ;;  %v1754_v34 = vmax.f32 %v1690_v32, 0.0  ;;  %v3432_v47 = vpop.f32.mrb[58].mxu0  ;;  %v3468_v37 = vpop.f32.mrb[58].mxu1  ;;  %v1711_v56 = vadd.f32 %v3431_v2, %v4264_v10 }
 0x1c6   : > { %3250 = vst [vmem:[%s4436_s18 + $0x48] sm:$0xff] %v3210_v35   ;;  %v3205_v26 = vpack.c.bf16 %v2246_v31, %v2245_v25  ;;  %v2212_v59 = vmul.f32 %v4406_v18, %v2173_v36  ;;  %v2097_v24 = vadd.f32 %v3467_v22, %v4264_v10  ;;  %v1705_v48 = vpop.f32.mrb[59].mxu0  ;;  %v2091_v50 = vpop.f32.mrb[59].mxu1  ;;  %v2140_v54 = vmax.f32 %v2076_v21, 0.0 }
 0x1c7   : > { %v2174_v62 = vmax.f32 %v1788_v45, %v2142_v8  ;;  %v1786_v51 = vmax.f32 %v4360_v13, %v1754_v34  ;;  %v1703_v12 = vadd.f32 %v4264_v10, %v1702_v43  ;;  %v2210_v27 = vmul.f32 %v4406_v18, %v2171_v44 }
 0x1c8   : > { %3249 = vst [vmem:[%s4436_s18 + $0x40] sm:$0xff] %v3205_v26   ;;  %v1759_v55 = vmax.f32 %v1711_v56, 0.0  ;;  %v2145_v33 = vmax.f32 %v2097_v24, 0.0  ;;  %v2089_v38 = vadd.f32 %v4264_v10, %v2088_v5  ;;  %v2251_v60 = vadd.f32 %v4413_v28, %v2212_v59 }
 0x1c9   : > { %v2213_v57 = vmul.f32 %v4406_v18, %v2174_v62  ;;  %v2172_v39 = vmax.f32 %v1786_v51, %v2140_v54  ;;  %v1757_v58 = vmax.f32 %v1703_v12, 0.0  ;;  %v1714_v13 = vadd.f32 %v3432_v47, %v4264_v10 }
 0x1ca   : > { %v1791_v61 = vmax.f32 %v4370_v46, %v1759_v55  ;;  %v2143_v63 = vmax.f32 %v2089_v38, 0.0  ;;  %v2100_v4 = vadd.f32 %v3468_v37, %v4264_v10  ;;  %v1706_v9 = vadd.f32 %v4264_v10, %v1705_v48  ;;  %v3692_v46 = vld [vmem:[%s4715_s2] ss:$0 sm:$0xff] }
 0x1cb   : > { %v2252_v6 = vadd.f32 %v4413_v28, %v2213_v57  ;;  %v2211_v7 = vmul.f32 %v4406_v18, %v2172_v39  ;;  %v1789_v1 = vmax.f32 %v4372_v49, %v1757_v58  ;;  %v3435_v0 = vpop.f32.mrb[60].mxu0  ;;  %v3471_v40 = vpop.f32.mrb[60].mxu1  ;;  %v2249_v11 = vadd.f32 %v4413_v28, %v2210_v27 }
 0x1cc   : > { %v2177_v14 = vmax.f32 %v1791_v61, %v2145_v33  ;;  %v1760_v30 = vmax.f32 %v1714_v13, 0.0  ;;  %v2092_v3 = vadd.f32 %v3692_v46, %v2091_v50  ;;  %v1718_v15 = vpop.f32.mrb[61].mxu0  ;;  %v2104_v16 = vpop.f32.mrb[61].mxu1  ;;  %v1758_v20 = vmax.f32 %v1706_v9, 0.0 }
 0x1cd   : > { %v3220_v17 = vpack.c.bf16 %v2252_v6, %v2251_v60  ;;  %v2250_v19 = vadd.f32 %v4413_v28, %v2211_v7  ;;  %v2175_v49 = vmax.f32 %v1789_v1, %v2143_v63  ;;  %v3436_v10 = vpop.f32.mrb[62].mxu0  ;;  %v3472_v32 = vpop.f32.mrb[62].mxu1  ;;  %v2146_v22 = vmax.f32 %v2100_v4, 0.0 }
 0x1ce   : > { %v2216_v21 = vmul.f32 %v4406_v18, %v2177_v14  ;;  %v1792_v2 = vmax.f32 %v4374_v52, %v1760_v30  ;;  %v1727_v25 = vadd.f32 %v3692_v46, %v3435_v0  ;;  %v1721_v35 = vpop.f32.mrb[63].mxu0  ;;  %v2107_v31 = vpop.f32.mrb[63].mxu1  ;;  %v1790_v43 = vmax.f32 %v4376_v53, %v1758_v20 }
 0x1cf   : > { %3252 = vst [vmem:[%s4436_s18 + $0x58] sm:$0xff] %v3220_v17   ;;  %v3215_v36 = vpack.c.bf16 %v2250_v19, %v2249_v11  ;;  %v2144_v5 = vmax.f32 %v2092_v3, 0.0  ;;  %v2113_v44 = vadd.f32 %v3692_v46, %v3471_v40  ;;  %v2214_v45 = vmul.f32 %v4406_v18, %v2175_v49 }
 0x1d0   : > { %v2178_v8 = vmax.f32 %v1792_v2, %v2146_v22  ;;  %v1763_v34 = vmax.f32 %v1727_v25, 0.0  ;;  %v1719_v47 = vadd.f32 %v3692_v46, %v1718_v15  ;;  %v2255_v37 = vadd.f32 %v4413_v28, %v2216_v21 }
 0x1d1   : > { %3251 = vst [vmem:[%s4436_s18 + $0x50] sm:$0xff] %v3215_v36   ;;  %v2176_v26 = vmax.f32 %v1790_v43, %v2144_v5  ;;  %v2149_v52 = vmax.f32 %v2113_v44, 0.0  ;;  %v2105_v59 = vadd.f32 %v3692_v46, %v2104_v16  ;;  %v1730_v50 = vadd.f32 %v3692_v46, %v3436_v10 }
 0x1d2   : > { %v2217_v56 = vmul.f32 %v4406_v18, %v2178_v8  ;;  %v1795_v24 = vmax.f32 %v4386_v23, %v1763_v34  ;;  %v1761_v48 = vmax.f32 %v1719_v47, 0.0  ;;  %v2116_v51 = vadd.f32 %v3692_v46, %v3472_v32 }
 0x1d3   : > { %v2215_v53 = vmul.f32 %v4406_v18, %v2176_v26  ;;  %v2147_v62 = vmax.f32 %v2105_v59, 0.0  ;;  %v1722_v54 = vadd.f32 %v3692_v46, %v1721_v35  ;;  %v1764_v33 = vmax.f32 %v1730_v50, 0.0 }
 0x1d4   : > { %v2256_v12 = vadd.f32 %v4413_v28, %v2217_v56  ;;  %v2181_v27 = vmax.f32 %v1795_v24, %v2149_v52  ;;  %v1793_v55 = vmax.f32 %v4388_v29, %v1761_v48  ;;  %v2253_v38 = vadd.f32 %v4413_v28, %v2214_v45 }
 0x1d5   : > { %v2254_v60 = vadd.f32 %v4413_v28, %v2215_v53  ;;  %v1762_v23 = vmax.f32 %v1722_v54, 0.0  ;;  %v2108_v57 = vadd.f32 %v3692_v46, %v2107_v31  ;;  %v1796_v61 = vmax.f32 %v4390_v41, %v1764_v33 }
 0x1d6   : > { %v3230_v39 = vpack.c.bf16 %v2256_v12, %v2255_v37  ;;  %v2179_v58 = vmax.f32 %v1793_v55, %v2147_v62  ;;  %v2150_v63 = vmax.f32 %v2116_v51, 0.0  ;;  %v2220_v29 = vmul.f32 %v4406_v18, %v2181_v27 }
 0x1d7   : > { %v3225_v13 = vpack.c.bf16 %v2254_v60, %v2253_v38  ;;  %v1794_v4 = vmax.f32 %v4392_v42, %v1762_v23  ;;  %v2148_v6 = vmax.f32 %v2108_v57, 0.0 }
 0x1d8   : > { %3254 = vst [vmem:[%s4436_s18 + $0x68] sm:$0xff] %v3230_v39   ;;  %v2182_v7 = vmax.f32 %v1796_v61, %v2150_v63  ;;  %v2218_v1 = vmul.f32 %v4406_v18, %v2179_v58  ;;  %v2259_v41 = vadd.f32 %v4413_v28, %v2220_v29 }
 0x1d9   : > { %3253 = vst [vmem:[%s4436_s18 + $0x60] sm:$0xff] %v3225_v13   ;;  %v2180_v9 = vmax.f32 %v1794_v4, %v2148_v6 }
 0x1da   : > { %v2221_v0 = vmul.f32 %v4406_v18, %v2182_v7  ;;  %v2257_v42 = vadd.f32 %v4413_v28, %v2218_v1 }
 0x1db   : > { %v2219_v40 = vmul.f32 %v4406_v18, %v2180_v9  ;;  %2427 = sbr.rel (!%p3907_p5) target bundleno = 552 (0x228), region = 106 }
 0x1dc   : > { %v2260_v11 = vadd.f32 %v4413_v28, %v2221_v0 }
 0x1dd   : > { %v2258_v14 = vadd.f32 %v4413_v28, %v2219_v40 }
 0x1de   : > { %v3240_v30 = vpack.c.bf16 %v2260_v11, %v2259_v41 }
 0x1df   : > { %v3235_v46 = vpack.c.bf16 %v2258_v14, %v2257_v42 }
 0x1e0   : > { %3256 = vst [vmem:[%s4436_s18 + $0x78] sm:$0xff] %v3240_v30  }
 0x1e1   : > { %3255 = vst [vmem:[%s4436_s18 + $0x70] sm:$0xff] %v3235_v46  }
 0x1e2   : > { %s4738_s9 = smov (!%p2430_p4, %s2429_s9), 32 }
 0x1e3   : > { %s3109_s14 = sshll.u32 %s4738_s9, 6 }
 0x1e4   : > { %p3112_p6 = scmp.eq.s32.totalorder %s3109_s14, 0 }
 0x1e5   : > { %s4591_s26 = sshrl.u32 (!%p3112_p6), %s4738_s9, 5 }
 0x1e6   : > { %2438 = sbr.rel (%p3112_p6) target bundleno = 552 (0x228), region = 110  ;;  %p3113_p5 = scmp.le.s32.totalorder (!%p3112_p6), %s4591_s26, 0 }
 0x1ed   : > { %2781 = sbr.rel (%p3113_p5) target bundleno = 531 (0x213), region = 226  ;;  %s4725_s21 = smov (!%p3113_p5), %s4585_s13 }
 0x1ee   : > { %s4726_s15 = smov (!%p3113_p5), %s4436_s18  ;;  %s4600_s20 = smov (!%p3113_p5), 0  }
 0x1ef   : > { %s4602_s16 = smov (!%p3113_p5), 0  }
 0x1f4 LB: >> { %v2454_v18 = vld [vmem:[%s3819_s15] sm:$0xf]  ;;  %v2456_v28 = vld [vmem:[%s3819_s15 + $0x4] sm:$0xf]  ;;  %v2458_v3 = vld [vmem:[%s3819_s15 + $0x8] sm:$0xf]  ;;  %s3827_s16 = sphi %s4602_s16, %s2448_s16   ;;  %s3823_s20 = sphi %s4600_s20, %s4727_s20   ;;  %s3819_s15 = sphi %s4726_s15, %s2523_s15   ;;  %s3815_s21 = sphi %s4725_s21, %s2524_s21  }
 0x1f5   : >> { %2455 = vst [vmem:[%s3815_s21] sm:$0xf] %v2454_v18  ;;  %2457 = vst [vmem:[%s3815_s21 + $0x4] sm:$0xf] %v2456_v28  ;;  %v2460_v15 = vld [vmem:[%s3819_s15 + $0xc] sm:$0xf]  ;;  %s2518_s17 = sadd.s32 1, %s3823_s20 }
 0x1f6   : >> { %2459 = vst [vmem:[%s3815_s21 + $0x8] sm:$0xf] %v2458_v3  ;;  %v2462_v16 = vld [vmem:[%s3819_s15 + $0x10] sm:$0xf]  ;;  %v2464_v17 = vld [vmem:[%s3819_s15 + $0x14] sm:$0xf]  ;;  %p2519_p7 = scmp.ge.s32.totalorder %s2518_s17, %s4591_s26 }
 0x1f7   : >> { %2461 = vst [vmem:[%s3815_s21 + $0xc] sm:$0xf] %v2460_v15  ;;  %2463 = vst [vmem:[%s3815_s21 + $0x10] sm:$0xf] %v2462_v16  ;;  %v2466_v19 = vld [vmem:[%s3819_s15 + $0x18] sm:$0xf] }
 0x1f8   : >> { %2465 = vst [vmem:[%s3815_s21 + $0x14] sm:$0xf] %v2464_v17  ;;  %v2468_v49 = vld [vmem:[%s3819_s15 + $0x1c] sm:$0xf]  ;;  %v2470_v20 = vld [vmem:[%s3819_s15 + $0x20] sm:$0xf] }
 0x1f9   : >> { %2467 = vst [vmem:[%s3815_s21 + $0x18] sm:$0xf] %v2466_v19  ;;  %2469 = vst [vmem:[%s3815_s21 + $0x1c] sm:$0xf] %v2468_v49  ;;  %v2472_v10 = vld [vmem:[%s3819_s15 + $0x24] sm:$0xf] }
 0x1fa   : >> { %2471 = vst [vmem:[%s3815_s21 + $0x20] sm:$0xf] %v2470_v20  ;;  %v2474_v32 = vld [vmem:[%s3819_s15 + $0x28] sm:$0xf]  ;;  %v2476_v21 = vld [vmem:[%s3819_s15 + $0x2c] sm:$0xf] }
 0x1fb   : >> { %2473 = vst [vmem:[%s3815_s21 + $0x24] sm:$0xf] %v2472_v10  ;;  %2475 = vst [vmem:[%s3815_s21 + $0x28] sm:$0xf] %v2474_v32  ;;  %v2478_v2 = vld [vmem:[%s3819_s15 + $0x30] sm:$0xf] }
 0x1fc   : >> { %2477 = vst [vmem:[%s3815_s21 + $0x2c] sm:$0xf] %v2476_v21  ;;  %v2480_v22 = vld [vmem:[%s3819_s15 + $0x34] sm:$0xf]  ;;  %v2482_v25 = vld [vmem:[%s3819_s15 + $0x38] sm:$0xf] }
 0x1fd   : >> { %2479 = vst [vmem:[%s3815_s21 + $0x30] sm:$0xf] %v2478_v2  ;;  %2481 = vst [vmem:[%s3815_s21 + $0x34] sm:$0xf] %v2480_v22  ;;  %v2484_v35 = vld [vmem:[%s3819_s15 + $0x3c] sm:$0xf] }
 0x1fe   : >> { %2483 = vst [vmem:[%s3815_s21 + $0x38] sm:$0xf] %v2482_v25  ;;  %v2486_v31 = vld [vmem:[%s3819_s15 + $0x40] sm:$0xf]  ;;  %v2488_v36 = vld [vmem:[%s3819_s15 + $0x44] sm:$0xf] }
 0x1ff   : >> { %2485 = vst [vmem:[%s3815_s21 + $0x3c] sm:$0xf] %v2484_v35  ;;  %2487 = vst [vmem:[%s3815_s21 + $0x40] sm:$0xf] %v2486_v31  ;;  %v2490_v43 = vld [vmem:[%s3819_s15 + $0x48] sm:$0xf] }
 0x200   : >> { %2489 = vst [vmem:[%s3815_s21 + $0x44] sm:$0xf] %v2488_v36  ;;  %v2492_v5 = vld [vmem:[%s3819_s15 + $0x4c] sm:$0xf]  ;;  %v2494_v44 = vld [vmem:[%s3819_s15 + $0x50] sm:$0xf] }
 0x201   : >> { %2491 = vst [vmem:[%s3815_s21 + $0x48] sm:$0xf] %v2490_v43  ;;  %2493 = vst [vmem:[%s3815_s21 + $0x4c] sm:$0xf] %v2492_v5  ;;  %v2496_v45 = vld [vmem:[%s3819_s15 + $0x54] sm:$0xf] }
 0x202   : >> { %2495 = vst [vmem:[%s3815_s21 + $0x50] sm:$0xf] %v2494_v44  ;;  %v2498_v8 = vld [vmem:[%s3819_s15 + $0x58] sm:$0xf]  ;;  %v2500_v34 = vld [vmem:[%s3819_s15 + $0x5c] sm:$0xf] }
 0x203   : >> { %2497 = vst [vmem:[%s3815_s21 + $0x54] sm:$0xf] %v2496_v45  ;;  %2499 = vst [vmem:[%s3815_s21 + $0x58] sm:$0xf] %v2498_v8  ;;  %v2502_v47 = vld [vmem:[%s3819_s15 + $0x60] sm:$0xf] }
 0x204   : >> { %2501 = vst [vmem:[%s3815_s21 + $0x5c] sm:$0xf] %v2500_v34  ;;  %v2504_v37 = vld [vmem:[%s3819_s15 + $0x64] sm:$0xf]  ;;  %v2506_v26 = vld [vmem:[%s3819_s15 + $0x68] sm:$0xf] }
 0x205   : >> { %2503 = vst [vmem:[%s3815_s21 + $0x60] sm:$0xf] %v2502_v47  ;;  %2505 = vst [vmem:[%s3815_s21 + $0x64] sm:$0xf] %v2504_v37  ;;  %v2508_v52 = vld [vmem:[%s3819_s15 + $0x6c] sm:$0xf] }
 0x206   : >> { %2507 = vst [vmem:[%s3815_s21 + $0x68] sm:$0xf] %v2506_v26  ;;  %v2510_v59 = vld [vmem:[%s3819_s15 + $0x70] sm:$0xf]  ;;  %v2512_v56 = vld [vmem:[%s3819_s15 + $0x74] sm:$0xf] }
 0x207   : >> { %2509 = vst [vmem:[%s3815_s21 + $0x6c] sm:$0xf] %v2508_v52  ;;  %2511 = vst [vmem:[%s3815_s21 + $0x70] sm:$0xf] %v2510_v59  ;;  %v2514_v24 = vld [vmem:[%s3819_s15 + $0x78] sm:$0xf] }
 0x208   : >> { %2513 = vst [vmem:[%s3815_s21 + $0x74] sm:$0xf] %v2512_v56  ;;  %v2516_v48 = vld [vmem:[%s3819_s15 + $0x7c] sm:$0xf]  ;;  %2515 = vst [vmem:[%s3815_s21 + $0x78] sm:$0xf] %v2514_v24 }
 0x209   : >> { %2517 = vst [vmem:[%s3815_s21 + $0x7c] sm:$0xf] %v2516_v48  ;;  %s4740_s17 = smov (%p2519_p7, %s2518_s17), 0  ;;  %s2448_s16 = sadd.s32 1, %s3827_s16  }
 0x20a   : >> { %s3114_s23 = sshll.u32 %s4740_s17, 7  ;;  %p2447_p8 = scmp.ge.s32.totalorder %s2448_s16, %s4591_s26 }
 0x20b   : >> { %s2523_s15 = scalar_lea.vmem %s4436_s18, %s3114_s23 [#allocation3]   ;;  %s2524_s21 = scalar_lea.vmem %s4585_s13, %s3114_s23  }
 0x20c   : >> { %s4727_s20 = smov %s4740_s17  ;;  %2450 = sbr.rel (!%p2447_p8) target bundleno = 500 (0x1f4), region = 232 }
 0x213 PF: > { %s4695_s24 = sand.u32 31, %s4738_s9   ;;  %s3160_s27 = sshll.u32 %s4591_s26, 7 }
 0x214   : > { %s2529_s28 = scalar_lea.vmem %s4436_s18, %s3160_s27 [#allocation3]   ;;  %s2531_s29 = scalar_lea.vmem %s4585_s13, %s3160_s27  }
 0x215   : > { %p3119_p9 = scmp.le.s32.totalorder %s4695_s24, 0 }
 0x216   : > { %s3829_s6 = smov (!%p3119_p9), %s2531_s29   ;;  %s3833_s7 = smov (!%p3119_p9), %s2529_s28  }
 0x217   : > { %2795 = sbr.rel (%p3119_p9) target bundleno = 552 (0x228), region = 237  ;;  %s3837_s8 = smov (!%p3119_p9), 0  }
 0x218   : > { %s3841_s10 = smov (!%p3119_p9), 0  }
 0x21e LB: >> { %v2541_v50 = vld [vmem:[%s3835_s7] sm:$0xf]  ;;  %s2543_s30 = sadd.s32 1, %s3839_s8  ;;  %s2535_s10 = sadd.s32 1, %s3843_s10   ;;  %s3843_s10 = sphi %s3841_s10, %s2535_s10   ;;  %s3839_s8 = sphi %s3837_s8, %s3838_s8   ;;  %s3835_s7 = sphi %s3833_s7, %s2548_s7   ;;  %s3831_s6 = sphi %s3829_s6, %s2549_s6  }
 0x21f   : >> { %2542 = vst [vmem:[%s3831_s6] sm:$0xf] %v2541_v50  ;;  %p2544_p10 = scmp.ge.s32.totalorder %s2543_s30, %s4695_s24  ;;  %p2534_p11 = scmp.ge.s32.totalorder %s2535_s10, %s4695_s24 }
 0x221   : >> { %s4742_s30 = smov (%p2544_p10, %s2543_s30), 0  ;;  %2537 = sbr.rel (!%p2534_p11) target bundleno = 542 (0x21e), region = 243 }
 0x222   : >> { %s3120_s18 = sshll.u32 %s4742_s30, 2  ;;  %s3838_s8 = smov %s4742_s30  }
 0x223   : >> { %s2548_s7 = scalar_lea.vmem %s2529_s28, %s3120_s18 [#allocation3]   ;;  %s2549_s6 = scalar_lea.vmem %s2531_s29, %s3120_s18  }
 0x228 PF: > { %p12_p12 = scmp.ge.s32.totalorder %s3895_s22, 4   ;;  %s4728_s18 = smov %s3775_s19 }
 0x229   : > { %s4729_s19 = smov %s3905_s25  ;;  %s4730_s20 = smov %s3895_s22 }
 0x22a   :  { %14 = sbr.rel (!%p12_p12) target bundleno = 2 (0x2), region = 254 }

// kernel: net_forward.5
= control target key start
LH: loop header
LB: loop body
LE: loop exit
PB: predicated region body
PF: predicated region fallthrough
CT: control target
= control target key end

     0   :  { %vm241_vm0 = vcmask 261120   ;;  %s2035_s1 = inlined_call_operand.vmem [shape: bf16[288,128], index: 1, kind: input, shape index: {}]   ;;  %s2036_s0 = inlined_call_operand.vmem [shape: bf16[4,50,288], index: 0, kind: input, shape index: {}]   ;;  %s2037_s2 = inlined_call_operand.vmem [shape: f32[1,128], index: 2, kind: input, shape index: {}]   ;;  %s2038_s3 = inlined_call_operand.vmem [shape: f32[1,128], index: 3, kind: input, shape index: {}]   ;;  %s2039_s4 = inlined_call_operand.vmem [shape: f32[1,128], index: 4, kind: input, shape index: {}]   ;;  %s2040_s5 = inlined_call_operand.vmem [shape: bf16[50,128], index: 5, kind: output, shape index: {}]  }
   0x1   :  { %v1630_v0 = vld [vmem:[%s2035_s1 + $0x40] sm:$0xff]   ;;  %v1642_v2 = vld [vmem:[%s2035_s1 + $0x48] sm:$0xff]   ;;  %v1656_v4 = vld [vmem:[%s2035_s1 + $0x50] sm:$0xff]  }
   0x2   :  { %v1635_v1 = vld [vmem:[%s2035_s1] sm:$0xff]   ;;  %1287 = vmatprep.subr.bf16.mxu0 %v1630_v0  ;;  %1333 = vmatprep.subr.bf16.mxu1 %v1630_v0  ;;  %v1649_v3 = vld [vmem:[%s2035_s1 + $0x8] sm:$0xff]   ;;  %v1663_v5 = vld [vmem:[%s2035_s1 + $0x10] sm:$0xff]  }
   0x3   :  { %1288 = vmatpush3.bf16.msra.mxu0 %v1635_v1  ;;  %1334 = vmatpush3.bf16.msra.mxu1 %v1635_v1  ;;  %v1670_v6 = vld [vmem:[%s2035_s1 + $0x58] sm:$0xff]   ;;  %v1684_v8 = vld [vmem:[%s2035_s1 + $0x60] sm:$0xff]   ;;  %v1698_v10 = vld [vmem:[%s2035_s1 + $0x68] sm:$0xff]  }
   0x4   :  { %1289 = vmatprep.subr.bf16.mxu0 %v1642_v2  ;;  %1335 = vmatprep.subr.bf16.mxu1 %v1642_v2  ;;  %v1677_v7 = vld [vmem:[%s2035_s1 + $0x18] sm:$0xff]   ;;  %v1691_v9 = vld [vmem:[%s2035_s1 + $0x20] sm:$0xff]   ;;  %v1711_v13 = vld [vmem:[%s2035_s1 + $0x28] sm:$0xff]  }
   0x5   :  { %v1537_v11 = vld [vmem:[%s2036_s0 + $0x4] ss:$12 sps:$4 sm:$0xff]   ;;  %v1732_v16 = vld [vmem:[%s2035_s1 + $0x78] sm:$0xff]   ;;  %v1535_v19 = vld [vmem:[%s2036_s0] ss:$12 sps:$4 sm:$0xff]  }
   0x6   :  { %v1540_v12 = vld [vmem:[%s2036_s0 + $0x58] ss:$12 sps:$4 sm:$0xff]   ;;  %v1718_v14 = vld [vmem:[%s2035_s1 + $0x70] sm:$0xff]   ;;  %286 = vmatprep.mubr.bf16.mxu0 %v1537_v11  ;;  %v1542_v21 = vld [vmem:[%s2036_s0 + $0x1c] ss:$12 sps:$4 sm:$0xff]  }
   0x7   :  { %1290 = vmatpush3.bf16.msra.mxu0 %v1649_v3  ;;  %1336 = vmatpush3.bf16.msra.mxu1 %v1649_v3  ;;  %v1725_v15 = vld [vmem:[%s2035_s1 + $0x30] sm:$0xff]   ;;  %v1739_v17 = vld [vmem:[%s2035_s1 + $0x38] sm:$0xff]   ;;  %v1746_v18 = vld [vmem:[%s2035_s1 + $0x80] sm:$0xff]  }
   0x8   :  { %1291 = vmatprep.subr.bf16.mxu0 %v1656_v4  ;;  %1337 = vmatprep.subr.bf16.mxu1 %v1656_v4  ;;  %v1538_v20 = vld [vmem:[%s2036_s0 + $0x54] ss:$12 sps:$4 sm:$0xff]   ;;  %v1544_v22 = vld [vmem:[%s2036_s0 + $0x70] ss:$12 sps:$4 sm:$0xff]   ;;  %v1767_v23 = vld [vmem:[%s2035_s1 + $0x88] sm:$0xff]  }
   0x9   :  { %503 = vmatprep.mubr.bf16.mxu1 %v1540_v12  ;;  %v1546_v24 = vld [vmem:[%s2036_s0 + $0x18] ss:$12 sps:$4 sm:$0xff]   ;;  %v1548_v26 = vld [vmem:[%s2036_s0 + $0x34] ss:$12 sps:$4 sm:$0xff]   ;;  %v70_v28 = vld [vmem:[%s2036_s0 + $0x48] sm:$0x11] }
   0xa   :  { %v1547_v25 = vld [vmem:[%s2036_s0 + $0x6c] ss:$12 sps:$4 sm:$0xff]   ;;  %v1550_v27 = vld [vmem:[%s2036_s0 + $0x88] ss:$12 sps:$4 sm:$0xff]   ;;  %v1176_v29 = vld [vmem:[%s2036_s0 + $0x9c] sm:$0x11]  ;;  %v1140_v32 = vcombine.high %v70_v28, %v70_v28  ;;  %v1139_v34 = vcombine.low %v70_v28, %v70_v28 }
   0xb   :  { %1292 = vmatpush3.bf16.msra.mxu0 %v1663_v5  ;;  %1338 = vmatpush3.bf16.msra.mxu1 %v1663_v5  ;;  %v1552_v30 = vld [vmem:[%s2036_s0 + $0x30] ss:$12 sps:$4 sm:$0xff]   ;;  %v1188_v33 = vcombine.high %v1176_v29, %v1176_v29  ;;  %v1187_v35 = vcombine.low %v1176_v29, %v1176_v29  ;;  %v1559_v36 = vld [vmem:[%s2036_s0 + $0x8] ss:$12 sps:$4 sm:$0xff]   ;;  %v1562_v37 = vld [vmem:[%s2036_s0 + $0xac] ss:$12 sps:$4 sm:$0xff]  }
   0xc   :  { %1293 = vmatprep.subr.bf16.mxu0 %v1670_v6  ;;  %1339 = vmatprep.subr.bf16.mxu1 %v1670_v6  ;;  %v1553_v31 = vld [vmem:[%s2036_s0 + $0x84] ss:$12 sps:$4 sm:$0xff]   ;;  %v1560_v38 = vld [vmem:[%s2036_s0 + $0xa8] ss:$12 sps:$4 sm:$0xff]   ;;  %v1563_v39 = vld [vmem:[%s2036_s0 + $0x20] ss:$12 sps:$4 sm:$0xff]  }
   0xd   :  { %v1564_v40 = vld [vmem:[%s2036_s0 + $0x38] ss:$12 sps:$4 sm:$0xff]   ;;  %v1567_v42 = vld [vmem:[%s2036_s0 + $0x50] ss:$0 sps:$4 sm:$0x11]  }
   0xe   :  { %v1565_v41 = vld [vmem:[%s2036_s0 + $0xc4] ss:$12 sps:$4 sm:$0xff]   ;;  %v1568_v43 = vld [vmem:[%s2036_s0 + $0xc0] ss:$12 sps:$4 sm:$0xff]   ;;  %v1569_v44 = vld [vmem:[%s2036_s0 + $0x5c] ss:$12 sps:$4 sm:$0xff]  }
   0xf   :  { %1294 = vmatpush3.bf16.msra.mxu0 %v1677_v7  ;;  %1340 = vmatpush3.bf16.msra.mxu1 %v1677_v7  ;;  %v1570_v45 = vld [vmem:[%s2036_s0 + $0xdc] ss:$12 sps:$4 sm:$0xff]   ;;  %v1572_v46 = vld [vmem:[%s2036_s0 + $0x74] ss:$12 sps:$4 sm:$0xff]   ;;  %v1573_v47 = vld [vmem:[%s2036_s0 + $0xd8] ss:$12 sps:$4 sm:$0xff]  }
  0x10   :  { %1295 = vmatprep.subr.bf16.mxu0 %v1684_v8  ;;  %1341 = vmatprep.subr.bf16.mxu1 %v1684_v8  ;;  %v1206_v48 = vld [vmem:[%s2036_s0 + $0xf0] sm:$0x11]  ;;  %v1574_v49 = vld [vmem:[%s2036_s0 + $0x8c] ss:$12 sps:$4 sm:$0xff]   ;;  %v1579_v55 = vld [vmem:[%s2036_s0 + $0xfc] ss:$12 sps:$4 sm:$0xff]  }
  0x11   :  { %v1218_v50 = vcombine.high %v1206_v48, %v1206_v48  ;;  %v1576_v51 = vld [vmem:[%s2036_s0 + $0xa4] ss:$0 sps:$4 sm:$0x11]   ;;  %v1217_v52 = vcombine.low %v1206_v48, %v1206_v48  ;;  %v1578_v53 = vld [vmem:[%s2036_s0 + $0xb0] ss:$12 sps:$4 sm:$0xff]  }
  0x12   :  { %v1581_v54 = vld [vmem:[%s2036_s0 + $0x100] ss:$12 sps:$4 sm:$0xff]   ;;  %v1582_v56 = vld [vmem:[%s2036_s0 + $0xc8] ss:$12 sps:$4 sm:$0xff]   ;;  %v1584_v58 = vld [vmem:[%s2036_s0 + $0x118] ss:$12 sps:$4 sm:$0xff]  }
  0x13   :  { %1296 = vmatpush3.bf16.msra.mxu0 %v1691_v9  ;;  %1342 = vmatpush3.bf16.msra.mxu1 %v1691_v9  ;;  %v1583_v57 = vld [vmem:[%s2036_s0 + $0xe0] ss:$12 sps:$4 sm:$0xff]   ;;  %v1586_v59 = vld [vmem:[%s2036_s0 + $0xf8] ss:$0 sps:$4 sm:$0x11]  }
  0x14   :  { %1297 = vmatprep.subr.bf16.mxu0 %v1698_v10  ;;  %1343 = vmatprep.subr.bf16.mxu1 %v1698_v10  ;;  %v1587_v60 = vld [vmem:[%s2036_s0 + $0x114] ss:$12 sps:$4 sm:$0xff]   ;;  %v1588_v61 = vld [vmem:[%s2036_s0 + $0x130] ss:$12 sps:$4 sm:$0xff]   ;;  %v1236_v63 = vld [vmem:[%s2036_s0 + $0x144] sm:$0x11] }
  0x15   :  { %v1590_v62 = vld [vmem:[%s2036_s0 + $0x104] ss:$12 sps:$4 sm:$0xff]  }
  0x17   :  { %1298 = vmatpush3.bf16.msra.mxu0 %v1711_v13  ;;  %1344 = vmatpush3.bf16.msra.mxu1 %v1711_v13 }
  0x18   :  { %1299 = vmatprep.subr.bf16.mxu0 %v1718_v14  ;;  %1345 = vmatprep.subr.bf16.mxu1 %v1718_v14 }
  0x1b   :  { %1300 = vmatpush3.bf16.msra.mxu0 %v1725_v15  ;;  %1346 = vmatpush3.bf16.msra.mxu1 %v1725_v15 }
  0x1c   :  { %1301 = vmatprep.subr.bf16.mxu0 %v1732_v16  ;;  %1347 = vmatprep.subr.bf16.mxu1 %v1732_v16 }
  0x1f   :  { %1302 = vmatpush3.bf16.msra.mxu0 %v1739_v17  ;;  %1348 = vmatpush3.bf16.msra.mxu1 %v1739_v17 }
  0x20   :  { %1379 = vmatprep.subr.bf16.mxu1 %v1630_v0  ;;  %1471 = vmatprep.subr.bf16.mxu0 %v1746_v18 }
  0x22   :  { %287 = vmatmul.mubr.bf16.vlgmr.msra.gmra.mrb[0].mxu0 %v1535_v19  ;;  %504 = vmatmul.mubr.bf16.vlgmr.msra.gmra.mrb[0].mxu1 %v1538_v20 }
  0x23   :  { %1380 = vmatpush3.bf16.msra.mxu1 %v1635_v1  ;;  %1472 = vmatpush3.bf16.msra.mxu0 %v1746_v18 }
  0x24   :  { %1381 = vmatprep.subr.bf16.mxu1 %v1642_v2  ;;  %294 = vmatprep.mubr.bf16.mxu0 %v1542_v21 }
  0x25   :  { %511 = vmatprep.mubr.bf16.mxu1 %v1544_v22  ;;  %1473 = vmatprep.subr.bf16.mxu0 %v1767_v23 }
  0x27   :  { %1382 = vmatpush3.bf16.msra.mxu1 %v1649_v3  ;;  %1474 = vmatpush3.bf16.msra.mxu0 %v1767_v23 }
  0x28   :  { %1383 = vmatprep.subr.bf16.mxu1 %v1656_v4  ;;  %1483 = vmatprep.subr.bf16.mxu0 %v1746_v18 }
  0x2a   :  { %295 = vmatmul.mubr.bf16.gmra.mrb[4].mxu0 %v1546_v24  ;;  %512 = vmatmul.mubr.bf16.gmra.mrb[4].mxu1 %v1547_v25 }
  0x2b   :  { %1384 = vmatpush3.bf16.msra.mxu1 %v1663_v5  ;;  %302 = vmatprep.mubr.bf16.mxu0 %v1548_v26 }
  0x2c   :  { %1385 = vmatprep.subr.bf16.mxu1 %v1670_v6  ;;  %519 = vmatprep.mubr.bf16.mxu1 %v1550_v27 }
  0x2f   :  { %1386 = vmatpush3.bf16.msra.mxu1 %v1677_v7 }
  0x30   :  { %1387 = vmatprep.subr.bf16.mxu1 %v1684_v8 }
  0x32   :  { %303 = vmatmul.mubr.bf16.gmra.mrb[8].mxu0 %v1552_v30  ;;  %520 = vmatmul.mubr.bf16.gmra.mrb[8].mxu1 %v1553_v31 }
  0x33   :  { %1388 = vmatpush3.bf16.msra.mxu1 %v1691_v9  ;;  %310 = vmatprep.mubr.bf16.mxu0 %v1140_v32 }
  0x34   :  { %1389 = vmatprep.subr.bf16.mxu1 %v1698_v10  ;;  %527 = vmatprep.mubr.bf16.mxu1 %v1188_v33 }
  0x37   :  { %1390 = vmatpush3.bf16.msra.mxu1 %v1711_v13 }
  0x38   :  { %1391 = vmatprep.subr.bf16.mxu1 %v1718_v14 }
  0x3a   :  { %311 = vmatmul.mubr.bf16.gmra.mrb[12].mxu0 %v1139_v34  ;;  %528 = vmatmul.mubr.bf16.gmra.mrb[12].mxu1 %v1187_v35 }
  0x3b   :  { %1392 = vmatpush3.bf16.msra.mxu1 %v1725_v15  ;;  %1475 = vmatprep.mubr.msk.bf16.mxu0 %vm241_vm0, %v1559_v36 }
  0x3c   :  { %1393 = vmatprep.subr.bf16.mxu1 %v1732_v16  ;;  %727 = vmatprep.mubr.bf16.mxu1 %v1562_v37 }
  0x3f   :  { %1394 = vmatpush3.bf16.msra.mxu1 %v1739_v17 }
  0x40   :  { %1425 = vmatprep.subr.bf16.mxu1 %v1630_v0  ;;  %v1591_v0 = vld [vmem:[%s2036_s0 + $0x12c] ss:$12 sps:$4 sm:$0xff]  }
  0x42   :  { %1476 = vmatmul.mubr.msk.bf16.vlgmr.msra.gmra.mrb[16].mxu0 %vm241_vm0, %v1563_v39  ;;  %728 = vmatmul.mubr.bf16.vlgmr.msra.gmra.mrb[16].mxu1 %v1560_v38 }
  0x43   :  { %1426 = vmatpush3.bf16.msra.mxu1 %v1635_v1  ;;  %1484 = vmatpush3.bf16.msra.mxu0 %v1746_v18  ;;  %v1592_v1 = vld [vmem:[%s2036_s0 + $0x11c] ss:$12 sps:$4 sm:$0xff]  }
  0x44   :  { %1427 = vmatprep.subr.bf16.mxu1 %v1642_v2  ;;  %1479 = vmatprep.mubr.msk.bf16.mxu0 %vm241_vm0, %v1564_v40  ;;  %v1248_v2 = vcombine.high %v1236_v63, %v1236_v63 }
  0x45   :  { %735 = vmatprep.mubr.bf16.mxu1 %v1565_v41  ;;  %1485 = vmatprep.subr.bf16.mxu0 %v1767_v23 }
  0x47   :  { %1428 = vmatpush3.bf16.msra.mxu1 %v1649_v3  ;;  %1486 = vmatpush3.bf16.msra.mxu0 %v1767_v23  ;;  %v1594_v3 = vld [vmem:[%s2036_s0 + $0x134] ss:$12 sps:$4 sm:$0xff]  }
  0x48   :  { %1429 = vmatprep.subr.bf16.mxu1 %v1656_v4  ;;  %1495 = vmatprep.subr.bf16.mxu0 %v1746_v18  ;;  %v1247_v4 = vcombine.low %v1236_v63, %v1236_v63 }
  0x4a   :  { %1480 = vmatmul.mubr.msk.bf16.gmra.mrb[20].mxu0 %vm241_vm0, %v1567_v42  ;;  %736 = vmatmul.mubr.bf16.gmra.mrb[20].mxu1 %v1568_v43 }
  0x4b   :  { %1430 = vmatpush3.bf16.msra.mxu1 %v1663_v5  ;;  %1487 = vmatprep.mubr.msk.bf16.mxu0 %vm241_vm0, %v1569_v44  ;;  %v1596_v5 = vld [vmem:[%s2036_s0 + $0x14c] ss:$0 sps:$4 sm:$0x11]  }
  0x4c   :  { %1431 = vmatprep.subr.bf16.mxu1 %v1670_v6  ;;  %743 = vmatprep.mubr.bf16.mxu1 %v1570_v45 }
  0x4f   :  { %1432 = vmatpush3.bf16.msra.mxu1 %v1677_v7 }
  0x50   :  { %1433 = vmatprep.subr.bf16.mxu1 %v1684_v8 }
  0x52   :  { %1488 = vmatmul.mubr.msk.bf16.vlgmr.msra.gmra.mrb[24].mxu0 %vm241_vm0, %v1572_v46  ;;  %744 = vmatmul.mubr.bf16.gmra.mrb[24].mxu1 %v1573_v47 }
  0x53   :  { %1434 = vmatpush3.bf16.msra.mxu1 %v1691_v9  ;;  %1496 = vmatpush3.bf16.msra.mxu0 %v1746_v18 }
  0x54   :  { %1435 = vmatprep.subr.bf16.mxu1 %v1698_v10  ;;  %1491 = vmatprep.mubr.msk.bf16.mxu0 %vm241_vm0, %v1574_v49 }
  0x55   :  { %751 = vmatprep.mubr.bf16.mxu1 %v1218_v50  ;;  %1497 = vmatprep.subr.bf16.mxu0 %v1767_v23 }
  0x57   :  { %1436 = vmatpush3.bf16.msra.mxu1 %v1711_v13  ;;  %1498 = vmatpush3.bf16.msra.mxu0 %v1767_v23 }
  0x58   :  { %1437 = vmatprep.subr.bf16.mxu1 %v1718_v14  ;;  %1507 = vmatprep.subr.bf16.mxu0 %v1746_v18 }
  0x5a   :  { %1492 = vmatmul.mubr.msk.bf16.gmra.mrb[28].mxu0 %vm241_vm0, %v1576_v51  ;;  %752 = vmatmul.mubr.bf16.gmra.mrb[28].mxu1 %v1217_v52  ;;  %v1962_v52 = vld [vmem:[%s2037_s2] ss:$0 sm:$0xff] }
  0x5b   :  { %1438 = vmatpush3.bf16.msra.mxu1 %v1725_v15  ;;  %1499 = vmatprep.mubr.msk.bf16.mxu0 %vm241_vm0, %v1578_v53 }
  0x5c   :  { %1439 = vmatprep.subr.bf16.mxu1 %v1732_v16  ;;  %951 = vmatprep.mubr.bf16.mxu1 %v1581_v54 }
  0x5f   :  { %1440 = vmatpush3.bf16.msra.mxu1 %v1739_v17 }
  0x62   :  { %1500 = vmatmul.mubr.msk.bf16.vlgmr.msra.gmra.mrb[32].mxu0 %vm241_vm0, %v1582_v56  ;;  %952 = vmatmul.mubr.bf16.vlgmr.msra.gmra.mrb[32].mxu1 %v1579_v55 }
  0x63   :  { %1508 = vmatpush3.bf16.msra.mxu0 %v1746_v18  ;;  %1503 = vmatprep.mubr.msk.bf16.mxu0 %vm241_vm0, %v1583_v57 }
  0x64   :  { %959 = vmatprep.mubr.bf16.mxu1 %v1584_v58  ;;  %1509 = vmatprep.subr.bf16.mxu0 %v1767_v23 }
  0x67   :  { %1510 = vmatpush3.bf16.msra.mxu0 %v1767_v23 }
  0x6a   :  { %1504 = vmatmul.mubr.msk.bf16.gmra.mrb[36].mxu0 %vm241_vm0, %v1586_v59  ;;  %960 = vmatmul.mubr.bf16.gmra.mrb[36].mxu1 %v1587_v60 }
  0x6b   :  { %967 = vmatprep.mubr.bf16.mxu1 %v1588_v61  ;;  %1511 = vmatprep.mubr.msk.bf16.mxu0 %vm241_vm0, %v1590_v62 }
  0x72   :  { %968 = vmatmul.mubr.bf16.gmra.mrb[40].mxu1 %v1591_v0  ;;  %1512 = vmatmul.mubr.msk.bf16.vlgmr.msra.gmra.mrb[40].mxu0 %vm241_vm0, %v1592_v1 }
  0x73   :  { %975 = vmatprep.mubr.bf16.mxu1 %v1248_v2  ;;  %1515 = vmatprep.mubr.msk.bf16.mxu0 %vm241_vm0, %v1594_v3 }
  0x7a   :  { %976 = vmatmul.mubr.bf16.gmra.mrb[44].mxu1 %v1247_v4  ;;  %1516 = vmatmul.mubr.msk.bf16.gmra.mrb[44].mxu0 %vm241_vm0, %v1596_v5 }
  0xf5   :  { %v1303_v6 = vpop.f32.mrb[0].mxu0  ;;  %v1349_v7 = vpop.f32.mrb[0].mxu1 }
  0xf6   :  { %v1304_v8 = vpop.f32.mrb[1].mxu0  ;;  %v1350_v9 = vpop.f32.mrb[1].mxu1 }
  0xf7   :  { %v1305_v10 = vadd.f32 %v1304_v8, %v1303_v6  ;;  %v1945_v11 = vadd.f32 %v1350_v9, %v1349_v7  ;;  %v1306_v12 = vpop.f32.mrb[2].mxu0  ;;  %v1352_v13 = vpop.f32.mrb[2].mxu1 }
  0xf8   :  { %v1307_v14 = vpop.f32.mrb[3].mxu0  ;;  %v1353_v15 = vpop.f32.mrb[3].mxu1 }
  0xf9   :  { %v1308_v16 = vadd.f32 %v1307_v14, %v1306_v12  ;;  %v1947_v17 = vadd.f32 %v1353_v15, %v1352_v13  ;;  %v289_v56 = vadd.f32 %v1305_v10, %v1962_v52 }
  0xfb   :  { %v292_v1 = vadd.f32 %v1308_v16, %v1962_v52 }
  0xfd   :  { %v1309_v18 = vpop.f32.mrb[4].mxu0  ;;  %v1355_v19 = vpop.f32.mrb[4].mxu1 }
  0xfe   :  { %v1310_v20 = vpop.f32.mrb[5].mxu0  ;;  %v1356_v21 = vpop.f32.mrb[5].mxu1 }
  0xff   :  { %v1311_v22 = vadd.f32 %v1310_v20, %v1309_v18  ;;  %v1949_v23 = vadd.f32 %v1356_v21, %v1355_v19  ;;  %v1312_v24 = vpop.f32.mrb[6].mxu0  ;;  %v1358_v25 = vpop.f32.mrb[6].mxu1 }
 0x100   :  { %v1313_v26 = vpop.f32.mrb[7].mxu0  ;;  %v1359_v27 = vpop.f32.mrb[7].mxu1 }
 0x101   :  { %v1314_v28 = vadd.f32 %v1313_v26, %v1312_v24  ;;  %v1951_v29 = vadd.f32 %v1359_v27, %v1358_v25  ;;  %v297_v53 = vadd.f32 %v1311_v22, %v1962_v52  ;;  %v514_v26 = vadd.f32 %v1949_v23, %v1962_v52 }
 0x103   :  { %v300_v60 = vadd.f32 %v1314_v28, %v1962_v52 }
 0x105   :  { %v1315_v30 = vpop.f32.mrb[8].mxu0  ;;  %v1361_v31 = vpop.f32.mrb[8].mxu1 }
 0x106   :  { %v1316_v32 = vpop.f32.mrb[9].mxu0  ;;  %v1362_v33 = vpop.f32.mrb[9].mxu1 }
 0x107   :  { %v1317_v34 = vadd.f32 %v1316_v32, %v1315_v30  ;;  %v1953_v35 = vadd.f32 %v1362_v33, %v1361_v31  ;;  %v1318_v36 = vpop.f32.mrb[10].mxu0  ;;  %v1364_v37 = vpop.f32.mrb[10].mxu1  ;;  %v506_v30 = vadd.f32 %v1945_v11, %v1962_v52 }
 0x108   :  { %v1319_v38 = vpop.f32.mrb[11].mxu0  ;;  %v1365_v39 = vpop.f32.mrb[11].mxu1 }
 0x109   :  { %v1320_v40 = vadd.f32 %v1319_v38, %v1318_v36  ;;  %v1955_v41 = vadd.f32 %v1365_v39, %v1364_v37  ;;  %v305_v10 = vadd.f32 %v1317_v34, %v1962_v52  ;;  %v517_v34 = vadd.f32 %v1951_v29, %v1962_v52 }
 0x10b   :  { %v308_v16 = vadd.f32 %v1320_v40, %v1962_v52  ;;  %v509_v40 = vadd.f32 %v1947_v17, %v1962_v52 }
 0x10d   :  { %v1321_v42 = vpop.f32.mrb[12].mxu0  ;;  %v1367_v43 = vpop.f32.mrb[12].mxu1 }
 0x10e   :  { %v1322_v44 = vpop.f32.mrb[13].mxu0  ;;  %v1368_v45 = vpop.f32.mrb[13].mxu1 }
 0x10f   :  { %v1323_v46 = vadd.f32 %v1322_v44, %v1321_v42  ;;  %v1957_v47 = vadd.f32 %v1368_v45, %v1367_v43  ;;  %v1324_v48 = vpop.f32.mrb[14].mxu0  ;;  %v1370_v49 = vpop.f32.mrb[14].mxu1 }
 0x110   :  { %v1325_v50 = vpop.f32.mrb[15].mxu0  ;;  %v1371_v51 = vpop.f32.mrb[15].mxu1 }
 0x111   :  { %v313_v7 = vadd.f32 %v1323_v46, %v1962_v52  ;;  %v530_v17 = vadd.f32 %v1957_v47, %v1962_v52 }
 0x115   :  { %v1477_v54 = vpop.f32.mrb[16].mxu0  ;;  %v1395_v55 = vpop.f32.mrb[16].mxu1 }
 0x116   :  { %v361_v57 = vadd.f32 %v1477_v54, %v297_v53  ;;  %v352_v58 = vpop.f32.mrb[17].mxu0  ;;  %v1396_v59 = vpop.f32.mrb[17].mxu1 }
 0x117   :  { %v353_v61 = vadd.f32 %v352_v58, %v289_v56  ;;  %v1967_v62 = vadd.f32 %v1396_v59, %v1395_v55  ;;  %v1478_v63 = vpop.f32.mrb[18].mxu0  ;;  %v1398_v0 = vpop.f32.mrb[18].mxu1 }
 0x118   :  { %v364_v2 = vadd.f32 %v1478_v63, %v300_v60  ;;  %v355_v3 = vpop.f32.mrb[19].mxu0  ;;  %v1399_v4 = vpop.f32.mrb[19].mxu1  ;;  %v384_v23 = vmax.f32 %v361_v57, 0.0  ;;  %v522_v60 = vadd.f32 %v1953_v35, %v1962_v52 }
 0x119   :  { %v356_v5 = vadd.f32 %v355_v3, %v292_v1  ;;  %v1970_v6 = vadd.f32 %v1399_v4, %v1398_v0  ;;  %v382_v11 = vmax.f32 %v353_v61, 0.0 }
 0x11a   :  { %v385_v50 = vmax.f32 %v364_v2, 0.0 }
 0x11b   :  { %v383_v53 = vmax.f32 %v356_v5, 0.0  ;;  %v525_v5 = vadd.f32 %v1955_v41, %v1962_v52 }
 0x11d   :  { %v1481_v8 = vpop.f32.mrb[20].mxu0  ;;  %v1401_v9 = vpop.f32.mrb[20].mxu1 }
 0x11e   :  { %v377_v12 = vadd.f32 %v1481_v8, %v313_v7  ;;  %v368_v13 = vpop.f32.mrb[21].mxu0  ;;  %v1402_v14 = vpop.f32.mrb[21].mxu1 }
 0x11f   :  { %v369_v15 = vadd.f32 %v368_v13, %v305_v10  ;;  %v1403_v18 = vadd.f32 %v1402_v14, %v1401_v9  ;;  %v1482_v19 = vpop.f32.mrb[22].mxu0  ;;  %v1404_v20 = vpop.f32.mrb[22].mxu1 }
 0x120   :  { %v371_v21 = vpop.f32.mrb[23].mxu0  ;;  %v1405_v22 = vpop.f32.mrb[23].mxu1  ;;  %v388_v7 = vmax.f32 %v377_v12, 0.0 }
 0x121   :  { %v372_v24 = vadd.f32 %v371_v21, %v308_v16  ;;  %v1406_v25 = vadd.f32 %v1405_v22, %v1404_v20  ;;  %v386_v10 = vmax.f32 %v369_v15, 0.0  ;;  %v738_v21 = vadd.f32 %v1403_v18, %v1962_v52 }
 0x123   :  { %v387_v20 = vmax.f32 %v372_v24, 0.0  ;;  %v733_v24 = vadd.f32 %v1970_v6, %v1962_v52 }
 0x125   :  { %v1489_v27 = vpop.f32.mrb[24].mxu0  ;;  %v1407_v28 = vpop.f32.mrb[24].mxu1 }
 0x126   :  { %v578_v31 = vadd.f32 %v1489_v27, %v514_v26  ;;  %v569_v32 = vpop.f32.mrb[25].mxu0  ;;  %v1408_v33 = vpop.f32.mrb[25].mxu1 }
 0x127   :  { %v570_v36 = vadd.f32 %v569_v32, %v506_v30  ;;  %v1981_v37 = vadd.f32 %v1408_v33, %v1407_v28  ;;  %v1490_v38 = vpop.f32.mrb[26].mxu0  ;;  %v1410_v39 = vpop.f32.mrb[26].mxu1  ;;  %v730_v28 = vadd.f32 %v1967_v62, %v1962_v52 }
 0x128   :  { %v601_v42 = vmax.f32 %v578_v31, 0.0  ;;  %v581_v43 = vadd.f32 %v1490_v38, %v517_v34  ;;  %v572_v44 = vpop.f32.mrb[27].mxu0  ;;  %v1411_v45 = vpop.f32.mrb[27].mxu1  ;;  %v741_v31 = vadd.f32 %v1406_v25, %v1962_v52 }
 0x129   :  { %v599_v46 = vmax.f32 %v570_v36, 0.0  ;;  %v573_v48 = vadd.f32 %v572_v44, %v509_v40  ;;  %v1985_v49 = vadd.f32 %v1411_v45, %v1410_v39  ;;  %v746_v6 = vadd.f32 %v1981_v37, %v1962_v52 }
 0x12a   :  { %v608_v29 = vmax.f32 %v384_v23, %v601_v42  ;;  %v602_v51 = vmax.f32 %v581_v43, 0.0 }
 0x12b   :  { %v606_v54 = vmax.f32 %v382_v11, %v599_v46  ;;  %v600_v55 = vmax.f32 %v573_v48, 0.0 }
 0x12c   :  { %v609_v56 = vmax.f32 %v385_v50, %v602_v51 }
 0x12d   :  { %v607_v57 = vmax.f32 %v383_v53, %v600_v55  ;;  %v1493_v58 = vpop.f32.mrb[28].mxu0  ;;  %v1413_v59 = vpop.f32.mrb[28].mxu1 }
 0x12e   :  { %v594_v61 = vadd.f32 %v1493_v58, %v530_v17  ;;  %v585_v63 = vpop.f32.mrb[29].mxu0  ;;  %v1414_v0 = vpop.f32.mrb[29].mxu1 }
 0x12f   :  { %v586_v1 = vadd.f32 %v585_v63, %v522_v60  ;;  %v1415_v2 = vadd.f32 %v1414_v0, %v1413_v59  ;;  %v1494_v3 = vpop.f32.mrb[30].mxu0  ;;  %v1416_v4 = vpop.f32.mrb[30].mxu1 }
 0x130   :  { %v605_v8 = vmax.f32 %v594_v61, 0.0  ;;  %v588_v9 = vpop.f32.mrb[31].mxu0  ;;  %v1417_v47 = vpop.f32.mrb[31].mxu1 }
 0x131   :  { %v603_v13 = vmax.f32 %v586_v1, 0.0  ;;  %v589_v14 = vadd.f32 %v588_v9, %v525_v5  ;;  %v754_v25 = vadd.f32 %v1415_v2, %v1962_v52 }
 0x132   :  { %v612_v19 = vmax.f32 %v388_v7, %v605_v8 }
 0x133   :  { %v610_v35 = vmax.f32 %v386_v10, %v603_v13  ;;  %v604_v16 = vmax.f32 %v589_v14, 0.0 }
 0x135   :  { %v611_v22 = vmax.f32 %v387_v20, %v604_v16  ;;  %v1501_v26 = vpop.f32.mrb[32].mxu0  ;;  %v1441_v27 = vpop.f32.mrb[32].mxu1 }
 0x136   :  { %v802_v41 = vadd.f32 %v1501_v26, %v738_v21  ;;  %v793_v12 = vpop.f32.mrb[33].mxu0  ;;  %v1442_v30 = vpop.f32.mrb[33].mxu1 }
 0x137   :  { %v794_v15 = vadd.f32 %v793_v12, %v730_v28  ;;  %v1443_v32 = vadd.f32 %v1442_v30, %v1441_v27  ;;  %v1502_v33 = vpop.f32.mrb[34].mxu0  ;;  %v1444_v34 = vpop.f32.mrb[34].mxu1  ;;  %v1254_v27 = vld [vmem:[%s2038_s3] ss:$0 sm:$0xff] }
 0x138   :  { %v825_v36 = vmax.f32 %v802_v41, 0.0  ;;  %v805_v18 = vadd.f32 %v1502_v33, %v741_v31  ;;  %v796_v38 = vpop.f32.mrb[35].mxu0  ;;  %v1445_v39 = vpop.f32.mrb[35].mxu1 }
 0x139   :  { %v823_v40 = vmax.f32 %v794_v15, 0.0  ;;  %v797_v23 = vadd.f32 %v796_v38, %v733_v24  ;;  %v1446_v42 = vadd.f32 %v1445_v39, %v1444_v34  ;;  %v954_v8 = vadd.f32 %v1443_v32, %v1962_v52  ;;  %v1255_v24 = vld [vmem:[%s2039_s4] ss:$0 sm:$0xff] }
 0x13a   :  { %v832_v62 = vmax.f32 %v608_v29, %v825_v36  ;;  %v826_v43 = vmax.f32 %v805_v18, 0.0  ;;  %v749_v29 = vadd.f32 %v1985_v49, %v1962_v52 }
 0x13b   :  { %v830_v44 = vmax.f32 %v606_v54, %v823_v40  ;;  %v824_v45 = vmax.f32 %v797_v23, 0.0 }
 0x13c   :  { %v833_v11 = vmax.f32 %v609_v56, %v826_v43 }
 0x13d   :  { %v831_v46 = vmax.f32 %v607_v57, %v824_v45  ;;  %v1505_v48 = vpop.f32.mrb[36].mxu0  ;;  %v1447_v50 = vpop.f32.mrb[36].mxu1 }
 0x13e   :  { %v818_v51 = vadd.f32 %v1505_v48, %v754_v25  ;;  %v809_v53 = vpop.f32.mrb[37].mxu0  ;;  %v1448_v55 = vpop.f32.mrb[37].mxu1 }
 0x13f   :  { %v810_v17 = vadd.f32 %v809_v53, %v746_v6  ;;  %v1449_v58 = vadd.f32 %v1448_v55, %v1447_v50  ;;  %v1506_v59 = vpop.f32.mrb[38].mxu0  ;;  %v1450_v60 = vpop.f32.mrb[38].mxu1 }
 0x140   :  { %v829_v54 = vmax.f32 %v818_v51, 0.0  ;;  %v812_v56 = vpop.f32.mrb[39].mxu0  ;;  %v1451_v61 = vpop.f32.mrb[39].mxu1 }
 0x141   :  { %v827_v63 = vmax.f32 %v810_v17, 0.0  ;;  %v813_v57 = vadd.f32 %v812_v56, %v749_v29  ;;  %v1452_v0 = vadd.f32 %v1451_v61, %v1450_v60  ;;  %v962_v3 = vadd.f32 %v1449_v58, %v1962_v52 }
 0x142   :  { %v2004_v1 = vmax.f32 %v612_v19, %v829_v54 }
 0x143   :  { %v834_v2 = vmax.f32 %v610_v35, %v827_v63  ;;  %v828_v37 = vmax.f32 %v813_v57, 0.0  ;;  %v965_v10 = vadd.f32 %v1452_v0, %v1962_v52  ;;  %v957_v35 = vadd.f32 %v1446_v42, %v1962_v52 }
 0x145   :  { %v2007_v4 = vmax.f32 %v611_v22, %v828_v37  ;;  %v1453_v5 = vpop.f32.mrb[40].mxu1  ;;  %v1513_v7 = vpop.f32.mrb[40].mxu0 }
 0x146   :  { %v1026_v9 = vadd.f32 %v1513_v7, %v962_v3  ;;  %v1454_v49 = vpop.f32.mrb[41].mxu1  ;;  %v1017_v47 = vpop.f32.mrb[41].mxu0 }
 0x147   :  { %v1455_v13 = vadd.f32 %v1454_v49, %v1453_v5  ;;  %v1018_v14 = vadd.f32 %v1017_v47, %v954_v8  ;;  %v1456_v20 = vpop.f32.mrb[42].mxu1  ;;  %v1514_v19 = vpop.f32.mrb[42].mxu0 }
 0x148   :  { %v1049_v16 = vmax.f32 %v1026_v9, 0.0  ;;  %v1029_v21 = vadd.f32 %v1514_v19, %v965_v10  ;;  %v1457_v26 = vpop.f32.mrb[43].mxu1  ;;  %v1020_v22 = vpop.f32.mrb[43].mxu0 }
 0x149   :  { %v1047_v28 = vmax.f32 %v1018_v14, 0.0  ;;  %v1458_v41 = vadd.f32 %v1457_v26, %v1456_v20  ;;  %v1021_v12 = vadd.f32 %v1020_v22, %v957_v35  ;;  %v970_v40 = vadd.f32 %v1455_v13, %v1962_v52 }
 0x14a   :  { %v1056_v30 = vmax.f32 %v832_v62, %v1049_v16  ;;  %v1050_v31 = vmax.f32 %v1029_v21, 0.0 }
 0x14b   :  { %v1054_v15 = vmax.f32 %v830_v44, %v1047_v28  ;;  %v1048_v32 = vmax.f32 %v1021_v12, 0.0 }
 0x14c   :  { %v1070_v33 = vmul.f32 %v1254_v27, %v1056_v30  ;;  %v1057_v34 = vmax.f32 %v833_v11, %v1050_v31  ;;  %v973_v11 = vadd.f32 %v1458_v41, %v1962_v52 }
 0x14d   :  { %v1068_v36 = vmul.f32 %v1254_v27, %v1054_v15  ;;  %v1055_v18 = vmax.f32 %v831_v46, %v1048_v32  ;;  %v1459_v38 = vpop.f32.mrb[44].mxu1  ;;  %v1517_v39 = vpop.f32.mrb[44].mxu0 }
 0x14e   :  { %v1071_v23 = vmul.f32 %v1254_v27, %v1057_v34  ;;  %v1460_v42 = vpop.f32.mrb[45].mxu1  ;;  %v1033_v43 = vpop.f32.mrb[45].mxu0  ;;  %v1084_v50 = vadd.f32 %v1255_v24, %v1070_v33 }
 0x14f   :  { %v1069_v45 = vmul.f32 %v1254_v27, %v1055_v18  ;;  %v1461_v62 = vadd.f32 %v1460_v42, %v1459_v38  ;;  %v1034_v25 = vadd.f32 %v1033_v43, %v970_v40  ;;  %v1462_v44 = vpop.f32.mrb[46].mxu1  ;;  %v1518_v48 = vpop.f32.mrb[46].mxu0  ;;  %v1082_v6 = vadd.f32 %v1255_v24, %v1068_v36 }
 0x150   :  { %v1085_v51 = vadd.f32 %v1255_v24, %v1071_v23  ;;  %v1463_v53 = vpop.f32.mrb[47].mxu1  ;;  %v1036_v55 = vpop.f32.mrb[47].mxu0 }
 0x151   :  { %v1083_v46 = vadd.f32 %v1255_v24, %v1069_v45  ;;  %v978_v17 = vadd.f32 %v1461_v62, %v1962_v52  ;;  %v1051_v58 = vmax.f32 %v1034_v25, 0.0  ;;  %v1037_v59 = vadd.f32 %v1036_v55, %v973_v11 }
 0x152   :  { %v1278_v60 = vpack.c.bf16 %v1085_v51, %v1084_v50 }
 0x153   :  { %v1273_v29 = vpack.c.bf16 %v1083_v46, %v1082_v6  ;;  %v1042_v54 = vadd.f32 %v1517_v39, %v978_v17  ;;  %v1058_v56 = vmax.f32 %v834_v2, %v1051_v58  ;;  %v1052_v61 = vmax.f32 %v1037_v59, 0.0 }
 0x154   :  { %1285 = vst [vmem:[%s2040_s5 + $0x8] sm:$0xff] %v1278_v60  }
 0x155   :  { %1274 = vst [vmem:[%s2040_s5] sm:$0xff] %v1273_v29   ;;  %v1053_v63 = vmax.f32 %v1042_v54, 0.0  ;;  %v1072_v57 = vmul.f32 %v1254_v27, %v1058_v56  ;;  %v1059_v0 = vmax.f32 %v2007_v4, %v1052_v61 }
 0x157   :  { %v1060_v52 = vmax.f32 %v2004_v1, %v1053_v63  ;;  %v1073_v37 = vmul.f32 %v1254_v27, %v1059_v0  ;;  %v1086_v5 = vadd.f32 %v1255_v24, %v1072_v57 }
 0x159   :  { %v1074_v3 = vmul.f32 %v1254_v27, %v1060_v52  ;;  %v1087_v7 = vadd.f32 %v1255_v24, %v1073_v37 }
 0x15b   :  { %v1088_v2 = vadd.f32 %v1255_v24, %v1074_v3  ;;  %v1283_v8 = vpack.c.bf16 %v1087_v7, %v1086_v5 }
 0x15d   :  { %v1269_v9 = vpack.c.bf16 %v1088_v2, %v1088_v2  ;;  %1286 = vst [vmem:[%s2040_s5 + $0x10] sm:$0xff] %v1283_v8  }
 0x15f   :  { %1124 = vst [vmem:[%s2040_s5 + $0x18] sm:$0x1] %v1269_v9 }

// kernel: net_forward.7
= control target key start
LH: loop header
LB: loop body
LE: loop exit
PB: predicated region body
PF: predicated region fallthrough
CT: control target
= control target key end

     0   :  { %v325_v1 = vmov 0.0   ;;  %vm326_vm0 = vmmov 0   ;;  %s412_s0 = inlined_call_operand.vmem [shape: bf16[2,128], index: 0, kind: input, shape index: {}]   ;;  %s413_s1 = inlined_call_operand.vmem [shape: bf16[128,32], index: 1, kind: input, shape index: {}]   ;;  %s414_s2 = inlined_call_operand.vmem [shape: f32[1,32], index: 2, kind: input, shape index: {}]   ;;  %s415_s3 = inlined_call_operand.vmem [shape: bf16[32,10], index: 3, kind: input, shape index: {}]   ;;  %s416_s4 = inlined_call_operand.vmem [shape: f32[1,10], index: 4, kind: input, shape index: {}]   ;;  %s417_s5 = inlined_call_operand.hbm [shape: f32[2,10], index: 5, kind: output, shape index: {}]  }
   0x1   :  { %v287_v0 = vld [vmem:[%s413_s1] sm:$0xff]   ;;  %256 = vmatprep.subr.bf16.mxu0 %v325_v1  ;;  %276 = vmatprep.subr.bf16.mxu1 %v325_v1  ;;  %v288_v2 = vld [vmem:[%s413_s1 + $0x8] sm:$0xff]   ;;  %v289_v3 = vld [vmem:[%s413_s1 + $0x10] sm:$0xff]  }
   0x2   :  { %257 = vmatpush3.bf16.msra.mxu0 %v287_v0  ;;  %272 = vmatprep.mubr.msk.bf16.mxu0 %vm326_vm0, %v325_v1  ;;  %v290_v4 = vld [vmem:[%s413_s1 + $0x18] sm:$0xff]  }
   0x3   :  { %258 = vmatprep.subr.bf16.mxu0 %v325_v1  ;;  %280 = vmatprep.mubr.msk.bf16.mxu1 %vm326_vm0, %v325_v1 }
   0x6   :  { %259 = vmatpush3.bf16.msra.mxu0 %v288_v2 }
   0x7   :  { %260 = vmatprep.subr.bf16.mxu0 %v325_v1 }
   0xa   :  { %261 = vmatpush3.bf16.msra.mxu0 %v289_v3 }
   0xb   :  { %10 = vsyncpa [#allocation3], 0  ;;  %262 = vmatprep.subr.bf16.mxu0 %v325_v1  ;;  %v291_v5 = vld [vmem:[%s413_s1 + $0x20] sm:$0xff]   ;;  %v292_v6 = vld [vmem:[%s413_s1 + $0x28] sm:$0xff]   ;;  %vm159_vm1 = vcmask 261120   ;;  %vm203_vm2 = vcmask 74752  }
   0xc   :  { %v293_v7 = vld [vmem:[%s413_s1 + $0x30] sm:$0xff]   ;;  %v294_v8 = vld [vmem:[%s413_s1 + $0x38] sm:$0xff]   ;;  %v22_v9 = vld [vmem:[%s412_s0] sm:$0x1] }
   0xd   :  { %v295_v10 = vld [vmem:[%s415_s3] sm:$0xff]   ;;  %v296_v11 = vld [vmem:[%s415_s3 + $0x8] sm:$0xff]  }
   0xe   :  { %263 = vmatpush3.bf16.msra.mxu0 %v290_v4  ;;  %277 = vmatpush3.bf16.msra.mxu1 %v295_v10  ;;  %v231_v12 = vld [vmem:[%s414_s2] ss:$0 sm:$0xff]  ;;  %s327_s2 = smov [#allocation2]  }
   0xf   :  { %264 = vmatprep.subr.bf16.mxu0 %v325_v1  ;;  %278 = vmatprep.subr.bf16.mxu1 %v325_v1  ;;  %v240_v20 = vld [vmem:[%s416_s4] ss:$0 sm:$0xff]  ;;  %s223_s3 = sshll.u32 %s327_s2, 4  ;;  %s224_s3 = int_to_ptr.vmem [resolvable:$true] %s223_s3 }
  0x10   :  { %s301_s4 = scalar_lea.vmem %s224_s3, 32  ;;  %p306_p1 = scmp.lt.s32.totalorder %s224_s3, %s224_s3 }
  0x11   :  { %p302_p0 = scmp.ne.s32.totalorder %s224_s3, %s301_s4  ;;  %p307_p2 = scmp.lt.s32.totalorder %s301_s4, %s301_s4 }
  0x12   :  { %265 = vmatpush3.bf16.msra.mxu0 %v291_v5  ;;  %279 = vmatpush3.bf16.msra.mxu1 %v296_v11 }
  0x13   :  { %266 = vmatprep.subr.bf16.mxu0 %v325_v1  ;;  %p308_p3 = por %p307_p2, %p306_p1 }
  0x15   :  { %p309_p4 = pnand %p308_p3, %p302_p0 }
  0x16   :  { %267 = vmatpush3.bf16.msra.mxu0 %v292_v6 }
  0x17   :  { %268 = vmatprep.subr.bf16.mxu0 %v325_v1 }
  0x1a   :  { %269 = vmatpush3.bf16.msra.mxu0 %v293_v7 }
  0x1b   :  { %270 = vmatprep.subr.bf16.mxu0 %v325_v1 }
  0x1e   :  { %271 = vmatpush3.bf16.msra.mxu0 %v294_v8 }
  0x21   :  { %273 = vmatmul.mubr.bf16.vlgmr.msra.gmra.mrb[0].mxu0 %v22_v9 }
  0xf4   :  { %v128_v13 = vpop.f32.mrb[0].mxu0 }
  0xf5   :  { %v129_v14 = vadd.f32 %v231_v12, %v128_v13  ;;  %v274_v15 = vpop.f32.mrb[1].mxu0 }
  0xf6   :  { %v131_v16 = vpop.f32.mrb[2].mxu0 }
  0xf7   :  { %v134_v17 = vmax.f32 %v129_v14, 0.0  ;;  %v275_v18 = vpop.f32.mrb[3].mxu0 }
  0xf9   :  { %v140_v19 = vpack.c.bf16 %v134_v17, %v134_v17 }
  0xfb   :  { %281 = vmatmul.mubr.msk.bf16.vlgmr.msra.gmra.mrb[0].mxu1 %vm159_vm1, %v140_v19 }
 0x1ce   :  { %v197_v21 = vpop.f32.mrb[0].mxu1 }
 0x1cf   :  { %v198_v22 = vadd.f32 %v240_v20, %v197_v21  ;;  %v282_v23 = vpop.f32.mrb[1].mxu1 }
 0x1d0   :  { %v200_v24 = vpop.f32.mrb[2].mxu1 }
 0x1d1   :  { %v283_v25 = vpop.f32.mrb[3].mxu1  ;;  %v204_v26 = vsel %vm203_vm2, %v198_v22, -inf }
 0x1d2   :  { %205 = vmax.xlane.f32.xlu0 %v204_v26 }
 0x25f   :  { %v206_v27 = vpop.xlane.xlu0 %205 }
 0x260   :  { %v207_v28 = vsub.f32 %v198_v22, %v206_v27 }
 0x262   :  { %v208_v29 = vmul.f32 1.442695, %v207_v28 }
 0x264   :  { %297 = vpow2.f32 %v208_v29 }
 0x26e   :  { %v298_v30 = vpop.eup %297 }
 0x26f   :  { %v210_v31 = vsel %vm203_vm2, %v298_v30, 0.0 }
 0x270   :  { %211 = vadd.xlane.f32.xlu0 %v210_v31 }
 0x2fd   :  { %v212_v32 = vpop.xlane.xlu0 %211 }
 0x2fe   :  { %299 = vlog2.f32 %v212_v32 }
 0x308   :  { %v300_v33 = vpop.eup %299 }
 0x309   :  { %v214_v34 = vmul.f32 0.6931472, %v300_v33 }
 0x30b   :  { %v215_v35 = vsub.f32 %v207_v28, %v214_v34 }
 0x30d   :  { %216 = vst.msk [vmem:[#allocation2] sm:$0x3] %vm203_vm2, %v215_v35 }
 0x30e   :  { %312 = shalt.err (!%p309_p4)
}
 0x30f   :  { %s313_s19 = scalar_lea.hbm %s417_s5, 32 }
 0x310   :  { %p314_p5 = scmp.ne.s32.totalorder %s417_s5, %s313_s19  ;;  %p317_p6 = scmp.lt.u32.totalorder %s313_s19, %s417_s5 }
 0x312   :  { %p319_p7 = pnand %p317_p6, %p314_p5 }
 0x314   :  { %322 = shalt.err (!%p319_p7)
}
 0x315   :  { %226 = dma.vmem_to_hbm [thread:$0]  %s224_s3, 32, %s417_s5, [#allocation3]  }
 0x316   :  { %323 = dma.done.wait [#allocation3], 32  }
 0x317   :  { %324 = vsyncadd [#allocation3], 4294967264 }
 0x318   :  { %230 = vsyncpa [#allocation3], 1 }

// kernel: net_forward.6
= control target key start
LH: loop header
LB: loop body
LE: loop exit
PB: predicated region body
PF: predicated region fallthrough
CT: control target
= control target key end

     0   :  { %v1354_v21 = vmov 1966171168   ;;  %v106_v23 = vlaneseq  ;;  %v1355_v40 = vmov 0.0   ;;  %vm1356_vm0 = vmmov 0   ;;  %s1817_s1 = inlined_call_operand.vmem [shape: bf16[576,128], index: 1, kind: input, shape index: {}]   ;;  %s1818_s0 = inlined_call_operand.vmem [shape: bf16[4,2,576], index: 0, kind: input, shape index: {}]   ;;  %s1819_s2 = inlined_call_operand.vmem [shape: f32[1,128], index: 2, kind: input, shape index: {}]   ;;  %s1820_s3 = inlined_call_operand.vmem [shape: f32[1,128], index: 3, kind: input, shape index: {}]   ;;  %s1821_s4 = inlined_call_operand.vmem [shape: f32[1,128], index: 4, kind: input, shape index: {}]   ;;  %s1822_s5 = inlined_call_operand.vmem [shape: bf16[2,128], index: 5, kind: output, shape index: {}]  }
   0x1   :  { %v1390_v0 = vld [vmem:[%s1817_s1 + $0x40] sm:$0xff]   ;;  %v1413_v4 = vld [vmem:[%s1817_s1 + $0x48] sm:$0xff]   ;;  %v1437_v8 = vld [vmem:[%s1817_s1 + $0x50] sm:$0xff]   ;;  %v104_v22 = vunpack.c.l.s4 %v1354_v21  ;;  %vm361_vm1 = vcmask 523264  }
   0x2   :  { %v1395_v1 = vld [vmem:[%s1817_s1] sm:$0xff]   ;;  %1067 = vmatprep.subr.bf16.mxu0 %v1390_v0  ;;  %v1419_v5 = vld [vmem:[%s1817_s1 + $0x8] sm:$0xff]   ;;  %v1443_v9 = vld [vmem:[%s1817_s1 + $0x10] sm:$0xff]   ;;  %v107_v29 = vshrl.u32 %v106_v23, 7 }
   0x3   :  { %v1401_v2 = vld [vmem:[%s1817_s1 + $0xc0] sm:$0xff]   ;;  %1068 = vmatpush3.bf16.msra.mxu0 %v1395_v1  ;;  %v1425_v6 = vld [vmem:[%s1817_s1 + $0xc8] sm:$0xff]   ;;  %v1449_v10 = vld [vmem:[%s1817_s1 + $0xd0] sm:$0xff]   ;;  %v105_v28 = vunpack.c.0.s8 %v104_v22 }
   0x4   :  { %v1407_v3 = vld [vmem:[%s1817_s1 + $0x80] sm:$0xff]   ;;  %1089 = vmatprep.subr.bf16.mxu1 %v1401_v2  ;;  %1069 = vmatprep.subr.bf16.mxu0 %v1413_v4  ;;  %v1431_v7 = vld [vmem:[%s1817_s1 + $0x88] sm:$0xff]   ;;  %v1455_v11 = vld [vmem:[%s1817_s1 + $0x90] sm:$0xff]  }
   0x5   :  { %1090 = vmatpush3.bf16.msra.mxu1 %v1407_v3  ;;  %v1461_v12 = vld [vmem:[%s1817_s1 + $0x58] sm:$0xff]   ;;  %v1485_v16 = vld [vmem:[%s1817_s1 + $0x60] sm:$0xff]   ;;  %v1509_v20 = vld [vmem:[%s1817_s1 + $0x68] sm:$0xff]   ;;  %v1559_v34 = vsub.s32 %v105_v28, %v107_v29 }
   0x6   :  { %1091 = vmatprep.subr.bf16.mxu1 %v1425_v6  ;;  %v1467_v13 = vld [vmem:[%s1817_s1 + $0x18] sm:$0xff]   ;;  %v1491_v17 = vld [vmem:[%s1817_s1 + $0x20] sm:$0xff]   ;;  %v1515_v24 = vld [vmem:[%s1817_s1 + $0x28] sm:$0xff]  }
   0x7   :  { %1070 = vmatpush3.bf16.msra.mxu0 %v1419_v5  ;;  %v1473_v14 = vld [vmem:[%s1817_s1 + $0xd8] sm:$0xff]   ;;  %v1497_v18 = vld [vmem:[%s1817_s1 + $0xe0] sm:$0xff]   ;;  %v1521_v25 = vld [vmem:[%s1817_s1 + $0xe8] sm:$0xff]  }
   0x8   :  { %1071 = vmatprep.subr.bf16.mxu0 %v1437_v8  ;;  %v1479_v15 = vld [vmem:[%s1817_s1 + $0x98] sm:$0xff]   ;;  %v1503_v19 = vld [vmem:[%s1817_s1 + $0xa0] sm:$0xff]   ;;  %v1527_v26 = vld [vmem:[%s1817_s1 + $0xa8] sm:$0xff]  }
   0x9   :  { %1092 = vmatpush3.bf16.msra.mxu1 %v1431_v7  ;;  %v1533_v27 = vld [vmem:[%s1817_s1 + $0x70] sm:$0xff]   ;;  %v1557_v33 = vld [vmem:[%s1817_s1 + $0x78] sm:$0xff]   ;;  %v94_v37 = vld [vmem:[%s1818_s0] sm:$0x1f] }
   0xa   :  { %1093 = vmatprep.subr.bf16.mxu1 %v1449_v10  ;;  %v1539_v30 = vld [vmem:[%s1817_s1 + $0x30] sm:$0xff]   ;;  %v1565_v35 = vld [vmem:[%s1817_s1 + $0x38] sm:$0xff]   ;;  %v109_v38 = vrot.slane %v94_v37, %v1559_v34  ;;  %v1592_v44 = vld [vmem:[%s1817_s1 + $0x100] sm:$0xff]   ;;  %v102_v56 = vcombine.high %v94_v37, %v94_v37 }
   0xb   :  { %1072 = vmatpush3.bf16.msra.mxu0 %v1443_v9  ;;  %v1545_v31 = vld [vmem:[%s1817_s1 + $0xf0] sm:$0xff]   ;;  %v1571_v36 = vld [vmem:[%s1817_s1 + $0xf8] sm:$0xff]   ;;  %v1597_v45 = vld [vmem:[%s1818_s0 + $0x5] sm:$0x1f] }
   0xc   :  { %1073 = vmatprep.subr.bf16.mxu0 %v1461_v12  ;;  %v1551_v32 = vld [vmem:[%s1817_s1 + $0xb0] sm:$0xff]   ;;  %v1582_v39 = vld [vmem:[%s1817_s1 + $0xb8] sm:$0xff]   ;;  %v117_v41 = vcombine.high %v109_v38, %v109_v38  ;;  %v124_v42 = vrot.slane %v109_v38, %v1559_v34  ;;  %v496_v47 = vrot.slane %v1597_v45, %v1559_v34  ;;  %v1609_v53 = vld [vmem:[%s1817_s1 + $0x108] sm:$0xff]   ;;  %v116_v62 = vrot.slane %v102_v56, %v1559_v34 }
   0xd   :  { %1094 = vmatpush3.bf16.msra.mxu1 %v1455_v11  ;;  %v1063_v48 = vld [vmem:[%s1818_s0 + $0xf] sm:$0x1f]  ;;  %v1642_v63 = vld [vmem:[%s1817_s1 + $0x118] sm:$0xff]   ;;  %v1673_v28 = vld [vmem:[%s1818_s0 + $0xa] sm:$0x1f]  ;;  %v489_v37 = vcombine.high %v1597_v45, %v1597_v45 }
   0xe   :  { %1095 = vmatprep.subr.bf16.mxu1 %v1473_v14  ;;  %v138_v43 = vrot.slane %v117_v41, %v1559_v34  ;;  %v139_v46 = vcombine.high %v124_v42, %v124_v42  ;;  %v831_v50 = vcombine.high %v1063_v48, %v1063_v48  ;;  %v838_v51 = vrot.slane %v1063_v48, %v1559_v34  ;;  %v1627_v59 = vld [vmem:[%s1817_s1 + $0x110] sm:$0xff]  }
   0xf   :  { %1074 = vmatpush3.bf16.msra.mxu0 %v1467_v13  ;;  %v504_v52 = vcombine.high %v496_v47, %v496_v47  ;;  %v131_v21 = vrot.slane %v116_v62, %v1559_v34  ;;  %v511_v23 = vrot.slane %v496_v47, %v1559_v34  ;;  %v667_v29 = vrot.slane %v1673_v28, %v1559_v34 }
  0x10   :  { %1075 = vmatprep.subr.bf16.mxu0 %v1485_v16  ;;  %397 = vmatprep.mubr.bf16.mxu0 %v138_v43  ;;  %v140_v49 = vcombine.high %v138_v43, %v138_v43  ;;  %v1612_v54 = vrot.slane %v831_v50, %v1559_v34  ;;  %v846_v57 = vcombine.high %v838_v51, %v838_v51 }
  0x11   :  { %1096 = vmatpush3.bf16.msra.mxu1 %v1479_v15  ;;  %v525_v55 = vrot.slane %v504_v52, %v1559_v34  ;;  %v1621_v58 = vrot.slane %v838_v51, %v1559_v34  ;;  %v675_v38 = vcombine.high %v667_v29, %v667_v29  ;;  %v503_v41 = vrot.slane %v489_v37, %v1559_v34 }
  0x12   :  { %1097 = vmatprep.subr.bf16.mxu1 %v1497_v18  ;;  %437 = vmatprep.mubr.bf16.mxu1 %v140_v49  ;;  %v860_v60 = vrot.slane %v1612_v54, %v1559_v34  ;;  %v1633_v61 = vrot.slane %v846_v57, %v1559_v34  ;;  %v526_v43 = vcombine.high %v511_v23, %v511_v23 }
  0x13   :  { %1076 = vmatpush3.bf16.msra.mxu0 %v1491_v17  ;;  %v527_v22 = vcombine.high %v525_v55, %v525_v55  ;;  %v518_v45 = vrot.slane %v503_v41, %v1559_v34  ;;  %v682_v47 = vrot.slane %v667_v29, %v1559_v34  ;;  %v660_v49 = vcombine.high %v1673_v28, %v1673_v28 }
  0x14   :  { %1077 = vmatprep.subr.bf16.mxu0 %v1509_v20 }
  0x15   :  { %1098 = vmatpush3.bf16.msra.mxu1 %v1503_v19  ;;  %v697_v48 = vcombine.high %v682_v47, %v682_v47 }
  0x16   :  { %1099 = vmatprep.subr.bf16.mxu1 %v1521_v25 }
  0x17   :  { %1078 = vmatpush3.bf16.msra.mxu0 %v1515_v24 }
  0x18   :  { %1079 = vmatprep.subr.bf16.mxu0 %v1533_v27 }
  0x19   :  { %1100 = vmatpush3.bf16.msra.mxu1 %v1527_v26 }
  0x1a   :  { %1101 = vmatprep.subr.bf16.mxu1 %v1545_v31 }
  0x1b   :  { %1080 = vmatpush3.bf16.msra.mxu0 %v1539_v30 }
  0x1c   :  { %1081 = vmatprep.subr.bf16.mxu0 %v1557_v33 }
  0x1d   :  { %1102 = vmatpush3.bf16.msra.mxu1 %v1551_v32 }
  0x1e   :  { %1103 = vmatprep.subr.bf16.mxu1 %v1571_v36 }
  0x1f   :  { %1082 = vmatpush3.bf16.msra.mxu0 %v1565_v35 }
  0x20   :  { %1263 = vmatprep.subr.bf16.mxu0 %v1355_v40 }
  0x21   :  { %1104 = vmatpush3.bf16.msra.mxu1 %v1582_v39 }
  0x22   :  { %1116 = vmatprep.subr.bf16.mxu1 %v1390_v0  ;;  %398 = vmatmul.mubr.bf16.vlgmr.msra.gmra.mrb[0].mxu0 %v124_v42  ;;  %v696_v42 = vrot.slane %v675_v38, %v1559_v34 }
  0x23   :  { %1264 = vmatpush3.bf16.msra.mxu0 %v1592_v44  ;;  %1271 = vmatprep.mubr.msk.bf16.mxu0 %vm1356_vm0, %v1355_v40 }
  0x24   :  { %438 = vmatmul.mubr.bf16.vlgmr.msra.gmra.mrb[0].mxu1 %v139_v46  ;;  %1265 = vmatprep.subr.bf16.mxu0 %v1355_v40  ;;  %v698_v46 = vcombine.high %v696_v42, %v696_v42 }
  0x25   :  { %1117 = vmatpush3.bf16.msra.mxu1 %v1395_v1  ;;  %567 = vmatprep.mubr.bf16.mxu1 %v525_v55 }
  0x26   :  { %1118 = vmatprep.subr.bf16.mxu1 %v1413_v4 }
  0x27   :  { %1266 = vmatpush3.bf16.msra.mxu0 %v1609_v53 }
  0x28   :  { %1267 = vmatprep.subr.bf16.mxu0 %v1355_v40 }
  0x29   :  { %1119 = vmatpush3.bf16.msra.mxu1 %v1419_v5 }
  0x2a   :  { %1120 = vmatprep.subr.bf16.mxu1 %v1437_v8 }
  0x2b   :  { %1268 = vmatpush3.bf16.msra.mxu0 %v1627_v59 }
  0x2c   :  { %1269 = vmatprep.subr.bf16.mxu0 %v1355_v40 }
  0x2d   :  { %1121 = vmatpush3.bf16.msra.mxu1 %v1443_v9 }
  0x2e   :  { %1122 = vmatprep.subr.bf16.mxu1 %v1461_v12 }
  0x2f   :  { %1270 = vmatpush3.bf16.msra.mxu0 %v1642_v63 }
  0x30   :  { %1138 = vmatprep.subr.bf16.mxu0 %v1401_v2 }
  0x31   :  { %1123 = vmatpush3.bf16.msra.mxu1 %v1467_v13 }
  0x32   :  { %1272 = vmatmul.mubr.msk.bf16.vlgmr.msra.gmra.mrb[4].mxu0 %vm361_vm1, %v131_v21  ;;  %1124 = vmatprep.subr.bf16.mxu1 %v1485_v16 }
  0x33   :  { %1139 = vmatpush3.bf16.msra.mxu0 %v1407_v3  ;;  %607 = vmatprep.mubr.bf16.mxu0 %v527_v22 }
  0x34   :  { %1140 = vmatprep.subr.bf16.mxu0 %v1425_v6 }
  0x35   :  { %1125 = vmatpush3.bf16.msra.mxu1 %v1491_v17 }
  0x36   :  { %1126 = vmatprep.subr.bf16.mxu1 %v1509_v20 }
  0x37   :  { %1141 = vmatpush3.bf16.msra.mxu0 %v1431_v7 }
  0x38   :  { %1142 = vmatprep.subr.bf16.mxu0 %v1449_v10 }
  0x39   :  { %1127 = vmatpush3.bf16.msra.mxu1 %v1515_v24 }
  0x3a   :  { %1128 = vmatprep.subr.bf16.mxu1 %v1533_v27 }
  0x3b   :  { %1143 = vmatpush3.bf16.msra.mxu0 %v1455_v11 }
  0x3c   :  { %1144 = vmatprep.subr.bf16.mxu0 %v1473_v14 }
  0x3d   :  { %1129 = vmatpush3.bf16.msra.mxu1 %v1539_v30 }
  0x3e   :  { %1130 = vmatprep.subr.bf16.mxu1 %v1557_v33 }
  0x3f   :  { %1145 = vmatpush3.bf16.msra.mxu0 %v1479_v15 }
  0x40   :  { %1146 = vmatprep.subr.bf16.mxu0 %v1497_v18 }
  0x41   :  { %1131 = vmatpush3.bf16.msra.mxu1 %v1565_v35 }
  0x42   :  { %1275 = vmatprep.subr.bf16.mxu1 %v1355_v40 }
  0x43   :  { %1147 = vmatpush3.bf16.msra.mxu0 %v1503_v19 }
  0x44   :  { %568 = vmatmul.mubr.bf16.vlgmr.msra.gmra.mrb[4].mxu1 %v511_v23  ;;  %1148 = vmatprep.subr.bf16.mxu0 %v1521_v25 }
  0x45   :  { %1276 = vmatpush3.bf16.msra.mxu1 %v1592_v44  ;;  %1283 = vmatprep.mubr.msk.bf16.mxu1 %vm1356_vm0, %v1355_v40 }
  0x46   :  { %1277 = vmatprep.subr.bf16.mxu1 %v1355_v40 }
  0x47   :  { %1149 = vmatpush3.bf16.msra.mxu0 %v1527_v26 }
  0x48   :  { %1150 = vmatprep.subr.bf16.mxu0 %v1545_v31 }
  0x49   :  { %1278 = vmatpush3.bf16.msra.mxu1 %v1609_v53 }
  0x4a   :  { %1279 = vmatprep.subr.bf16.mxu1 %v1355_v40 }
  0x4b   :  { %1151 = vmatpush3.bf16.msra.mxu0 %v1551_v32 }
  0x4c   :  { %1152 = vmatprep.subr.bf16.mxu0 %v1571_v36 }
  0x4d   :  { %1280 = vmatpush3.bf16.msra.mxu1 %v1627_v59 }
  0x4e   :  { %1281 = vmatprep.subr.bf16.mxu1 %v1355_v40 }
  0x4f   :  { %1153 = vmatpush3.bf16.msra.mxu0 %v1582_v39 }
  0x50   :  { %1165 = vmatprep.subr.bf16.mxu0 %v1390_v0 }
  0x51   :  { %1282 = vmatpush3.bf16.msra.mxu1 %v1642_v63 }
  0x52   :  { %608 = vmatmul.mubr.bf16.vlgmr.msra.gmra.mrb[8].mxu0 %v526_v43  ;;  %1187 = vmatprep.subr.bf16.mxu1 %v1401_v2 }
  0x53   :  { %1166 = vmatpush3.bf16.msra.mxu0 %v1395_v1  ;;  %738 = vmatprep.mubr.bf16.mxu0 %v696_v42 }
  0x54   :  { %1284 = vmatmul.mubr.msk.bf16.vlgmr.msra.gmra.mrb[8].mxu1 %vm361_vm1, %v518_v45  ;;  %1167 = vmatprep.subr.bf16.mxu0 %v1413_v4 }
  0x55   :  { %1188 = vmatpush3.bf16.msra.mxu1 %v1407_v3  ;;  %778 = vmatprep.mubr.bf16.mxu1 %v698_v46 }
  0x56   :  { %1189 = vmatprep.subr.bf16.mxu1 %v1425_v6 }
  0x57   :  { %1168 = vmatpush3.bf16.msra.mxu0 %v1419_v5 }
  0x58   :  { %1169 = vmatprep.subr.bf16.mxu0 %v1437_v8 }
  0x59   :  { %1190 = vmatpush3.bf16.msra.mxu1 %v1431_v7 }
  0x5a   :  { %1191 = vmatprep.subr.bf16.mxu1 %v1449_v10 }
  0x5b   :  { %1170 = vmatpush3.bf16.msra.mxu0 %v1443_v9 }
  0x5c   :  { %1171 = vmatprep.subr.bf16.mxu0 %v1461_v12 }
  0x5d   :  { %1192 = vmatpush3.bf16.msra.mxu1 %v1455_v11 }
  0x5e   :  { %1193 = vmatprep.subr.bf16.mxu1 %v1473_v14 }
  0x5f   :  { %1172 = vmatpush3.bf16.msra.mxu0 %v1467_v13 }
  0x60   :  { %1173 = vmatprep.subr.bf16.mxu0 %v1485_v16 }
  0x61   :  { %1194 = vmatpush3.bf16.msra.mxu1 %v1479_v15 }
  0x62   :  { %1195 = vmatprep.subr.bf16.mxu1 %v1497_v18 }
  0x63   :  { %1174 = vmatpush3.bf16.msra.mxu0 %v1491_v17 }
  0x64   :  { %1175 = vmatprep.subr.bf16.mxu0 %v1509_v20 }
  0x65   :  { %1196 = vmatpush3.bf16.msra.mxu1 %v1503_v19 }
  0x66   :  { %1197 = vmatprep.subr.bf16.mxu1 %v1521_v25 }
  0x67   :  { %1176 = vmatpush3.bf16.msra.mxu0 %v1515_v24 }
  0x68   :  { %1177 = vmatprep.subr.bf16.mxu0 %v1533_v27 }
  0x69   :  { %1198 = vmatpush3.bf16.msra.mxu1 %v1527_v26 }
  0x6a   :  { %1199 = vmatprep.subr.bf16.mxu1 %v1545_v31 }
  0x6b   :  { %1178 = vmatpush3.bf16.msra.mxu0 %v1539_v30 }
  0x6c   :  { %1179 = vmatprep.subr.bf16.mxu0 %v1557_v33 }
  0x6d   :  { %1200 = vmatpush3.bf16.msra.mxu1 %v1551_v32 }
  0x6e   :  { %1201 = vmatprep.subr.bf16.mxu1 %v1571_v36 }
  0x6f   :  { %1180 = vmatpush3.bf16.msra.mxu0 %v1565_v35 }
  0x70   :  { %1287 = vmatprep.subr.bf16.mxu0 %v1355_v40 }
  0x71   :  { %1202 = vmatpush3.bf16.msra.mxu1 %v1582_v39 }
  0x72   :  { %739 = vmatmul.mubr.bf16.vlgmr.msra.gmra.mrb[12].mxu0 %v682_v47  ;;  %1214 = vmatprep.subr.bf16.mxu1 %v1390_v0  ;;  %v674_v0 = vrot.slane %v660_v49, %v1559_v34 }
  0x73   :  { %1288 = vmatpush3.bf16.msra.mxu0 %v1592_v44  ;;  %1295 = vmatprep.mubr.msk.bf16.mxu0 %vm1356_vm0, %v1355_v40 }
  0x74   :  { %779 = vmatmul.mubr.bf16.vlgmr.msra.gmra.mrb[12].mxu1 %v697_v48  ;;  %1289 = vmatprep.subr.bf16.mxu0 %v1355_v40 }
  0x75   :  { %1215 = vmatpush3.bf16.msra.mxu1 %v1395_v1  ;;  %909 = vmatprep.mubr.bf16.mxu1 %v1633_v61  ;;  %v689_v1 = vrot.slane %v674_v0, %v1559_v34 }
  0x76   :  { %1216 = vmatprep.subr.bf16.mxu1 %v1413_v4  ;;  %v869_v4 = vcombine.high %v1633_v61, %v1633_v61 }
  0x77   :  { %1290 = vmatpush3.bf16.msra.mxu0 %v1609_v53 }
  0x78   :  { %1291 = vmatprep.subr.bf16.mxu0 %v1355_v40 }
  0x79   :  { %1217 = vmatpush3.bf16.msra.mxu1 %v1419_v5  ;;  %v1802_v5 = vld [vmem:[%s1819_s2] ss:$0 sm:$0xff] }
  0x7a   :  { %1218 = vmatprep.subr.bf16.mxu1 %v1437_v8 }
  0x7b   :  { %1292 = vmatpush3.bf16.msra.mxu0 %v1627_v59 }
  0x7c   :  { %1293 = vmatprep.subr.bf16.mxu0 %v1355_v40 }
  0x7d   :  { %1219 = vmatpush3.bf16.msra.mxu1 %v1443_v9 }
  0x7e   :  { %1220 = vmatprep.subr.bf16.mxu1 %v1461_v12 }
  0x7f   :  { %1294 = vmatpush3.bf16.msra.mxu0 %v1642_v63 }
  0x80   :  { %1236 = vmatprep.subr.bf16.mxu0 %v1401_v2  ;;  %v868_v2 = vcombine.high %v1621_v58, %v1621_v58 }
  0x81   :  { %1221 = vmatpush3.bf16.msra.mxu1 %v1467_v13 }
  0x82   :  { %1296 = vmatmul.mubr.msk.bf16.vlgmr.msra.gmra.mrb[16].mxu0 %vm361_vm1, %v689_v1  ;;  %1222 = vmatprep.subr.bf16.mxu1 %v1485_v16 }
  0x83   :  { %1237 = vmatpush3.bf16.msra.mxu0 %v1407_v3  ;;  %949 = vmatprep.mubr.bf16.mxu0 %v869_v4 }
  0x84   :  { %1238 = vmatprep.subr.bf16.mxu0 %v1425_v6 }
  0x85   :  { %1223 = vmatpush3.bf16.msra.mxu1 %v1491_v17 }
  0x86   :  { %1224 = vmatprep.subr.bf16.mxu1 %v1509_v20 }
  0x87   :  { %1239 = vmatpush3.bf16.msra.mxu0 %v1431_v7 }
  0x88   :  { %1240 = vmatprep.subr.bf16.mxu0 %v1449_v10 }
  0x89   :  { %1225 = vmatpush3.bf16.msra.mxu1 %v1515_v24 }
  0x8a   :  { %1226 = vmatprep.subr.bf16.mxu1 %v1533_v27 }
  0x8b   :  { %1241 = vmatpush3.bf16.msra.mxu0 %v1455_v11 }
  0x8c   :  { %1242 = vmatprep.subr.bf16.mxu0 %v1473_v14 }
  0x8d   :  { %1227 = vmatpush3.bf16.msra.mxu1 %v1539_v30 }
  0x8e   :  { %1228 = vmatprep.subr.bf16.mxu1 %v1557_v33 }
  0x8f   :  { %1243 = vmatpush3.bf16.msra.mxu0 %v1479_v15 }
  0x90   :  { %1244 = vmatprep.subr.bf16.mxu0 %v1497_v18 }
  0x91   :  { %1229 = vmatpush3.bf16.msra.mxu1 %v1565_v35 }
  0x92   :  { %1299 = vmatprep.subr.bf16.mxu1 %v1355_v40 }
  0x93   :  { %1245 = vmatpush3.bf16.msra.mxu0 %v1503_v19 }
  0x94   :  { %910 = vmatmul.mubr.bf16.vlgmr.msra.gmra.mrb[16].mxu1 %v1621_v58  ;;  %1246 = vmatprep.subr.bf16.mxu0 %v1521_v25 }
  0x95   :  { %1300 = vmatpush3.bf16.msra.mxu1 %v1592_v44  ;;  %1307 = vmatprep.mubr.msk.bf16.mxu1 %vm1356_vm0, %v1355_v40 }
  0x96   :  { %1301 = vmatprep.subr.bf16.mxu1 %v1355_v40 }
  0x97   :  { %1247 = vmatpush3.bf16.msra.mxu0 %v1527_v26 }
  0x98   :  { %1248 = vmatprep.subr.bf16.mxu0 %v1545_v31 }
  0x99   :  { %1302 = vmatpush3.bf16.msra.mxu1 %v1609_v53 }
  0x9a   :  { %1303 = vmatprep.subr.bf16.mxu1 %v1355_v40 }
  0x9b   :  { %1249 = vmatpush3.bf16.msra.mxu0 %v1551_v32 }
  0x9c   :  { %1250 = vmatprep.subr.bf16.mxu0 %v1571_v36 }
  0x9d   :  { %1304 = vmatpush3.bf16.msra.mxu1 %v1627_v59 }
  0x9e   :  { %1305 = vmatprep.subr.bf16.mxu1 %v1355_v40 }
  0x9f   :  { %1251 = vmatpush3.bf16.msra.mxu0 %v1582_v39 }
  0xa1   :  { %1306 = vmatpush3.bf16.msra.mxu1 %v1642_v63 }
  0xa2   :  { %950 = vmatmul.mubr.bf16.vlgmr.msra.gmra.mrb[20].mxu0 %v868_v2 }
  0xa4   :  { %1308 = vmatmul.mubr.msk.bf16.vlgmr.msra.gmra.mrb[20].mxu1 %vm361_vm1, %v860_v60 }
  0xf5   :  { %v1083_v3 = vpop.f32.mrb[0].mxu0 }
  0xf6   :  { %v1084_v6 = vpop.f32.mrb[1].mxu0 }
  0xf7   :  { %v1085_v7 = vadd.f32 %v1084_v6, %v1083_v3  ;;  %v1086_v8 = vpop.f32.mrb[2].mxu0  ;;  %v1105_v9 = vpop.f32.mrb[0].mxu1 }
  0xf8   :  { %v1087_v10 = vpop.f32.mrb[3].mxu0  ;;  %v1106_v11 = vpop.f32.mrb[1].mxu1 }
  0xf9   :  { %v400_v12 = vadd.f32 %v1085_v7, %v1802_v5  ;;  %v1107_v13 = vadd.f32 %v1106_v11, %v1105_v9  ;;  %v1108_v14 = vpop.f32.mrb[2].mxu1 }
  0xfa   :  { %v1109_v15 = vpop.f32.mrb[3].mxu1 }
  0xfb   :  { %v440_v16 = vadd.f32 %v1107_v13, %v400_v12 }
 0x105   :  { %v479_v17 = vpop.f32.mrb[4].mxu0 }
 0x106   :  { %v480_v18 = vadd.f32 %v479_v17, %v440_v16  ;;  %v1273_v19 = vpop.f32.mrb[5].mxu0  ;;  %v1065_v16 = vld [vmem:[%s1820_s3] ss:$0 sm:$0xff] }
 0x107   :  { %v482_v20 = vpop.f32.mrb[6].mxu0 }
 0x108   :  { %v1274_v24 = vpop.f32.mrb[7].mxu0  ;;  %v485_v54 = vmax.f32 %v480_v18, 0.0  ;;  %v1066_v18 = vld [vmem:[%s1821_s4] ss:$0 sm:$0xff] }
 0x117   :  { %v1132_v25 = vpop.f32.mrb[4].mxu1 }
 0x118   :  { %v1133_v26 = vpop.f32.mrb[5].mxu1 }
 0x119   :  { %v1134_v27 = vadd.f32 %v1133_v26, %v1132_v25  ;;  %v1135_v30 = vpop.f32.mrb[6].mxu1 }
 0x11a   :  { %v1136_v31 = vpop.f32.mrb[7].mxu1 }
 0x11b   :  { %v570_v34 = vadd.f32 %v1134_v27, %v1802_v5 }
 0x125   :  { %v1154_v32 = vpop.f32.mrb[8].mxu0 }
 0x126   :  { %v1155_v33 = vpop.f32.mrb[9].mxu0 }
 0x127   :  { %v1156_v35 = vadd.f32 %v1155_v33, %v1154_v32  ;;  %v1157_v36 = vpop.f32.mrb[10].mxu0  ;;  %v649_v39 = vpop.f32.mrb[8].mxu1 }
 0x128   :  { %v1158_v40 = vpop.f32.mrb[11].mxu0  ;;  %v1285_v44 = vpop.f32.mrb[9].mxu1 }
 0x129   :  { %v610_v50 = vadd.f32 %v1156_v35, %v570_v34  ;;  %v652_v51 = vpop.f32.mrb[10].mxu1 }
 0x12a   :  { %v1286_v52 = vpop.f32.mrb[11].mxu1 }
 0x12b   :  { %v650_v53 = vadd.f32 %v649_v39, %v610_v50 }
 0x12d   :  { %v655_v55 = vmax.f32 %v650_v53, 0.0 }
 0x12f   :  { %v656_v56 = vmax.f32 %v485_v54, %v655_v55 }
 0x145   :  { %v1181_v57 = vpop.f32.mrb[12].mxu0 }
 0x146   :  { %v1182_v58 = vpop.f32.mrb[13].mxu0 }
 0x147   :  { %v1183_v59 = vadd.f32 %v1182_v58, %v1181_v57  ;;  %v1184_v60 = vpop.f32.mrb[14].mxu0  ;;  %v1203_v61 = vpop.f32.mrb[12].mxu1 }
 0x148   :  { %v1185_v62 = vpop.f32.mrb[15].mxu0  ;;  %v1204_v63 = vpop.f32.mrb[13].mxu1 }
 0x149   :  { %v741_v21 = vadd.f32 %v1183_v59, %v1802_v5  ;;  %v1205_v22 = vadd.f32 %v1204_v63, %v1203_v61  ;;  %v1206_v23 = vpop.f32.mrb[14].mxu1 }
 0x14a   :  { %v1207_v28 = vpop.f32.mrb[15].mxu1 }
 0x14b   :  { %v781_v29 = vadd.f32 %v1205_v22, %v741_v21 }
 0x155   :  { %v820_v37 = vpop.f32.mrb[16].mxu0 }
 0x156   :  { %v821_v38 = vadd.f32 %v820_v37, %v781_v29  ;;  %v1297_v41 = vpop.f32.mrb[17].mxu0 }
 0x157   :  { %v823_v42 = vpop.f32.mrb[18].mxu0 }
 0x158   :  { %v826_v43 = vmax.f32 %v821_v38, 0.0  ;;  %v1298_v45 = vpop.f32.mrb[19].mxu0 }
 0x15a   :  { %v827_v46 = vmax.f32 %v656_v56, %v826_v43 }
 0x167   :  { %v1230_v47 = vpop.f32.mrb[16].mxu1 }
 0x168   :  { %v1231_v48 = vpop.f32.mrb[17].mxu1 }
 0x169   :  { %v1232_v49 = vadd.f32 %v1231_v48, %v1230_v47  ;;  %v1233_v0 = vpop.f32.mrb[18].mxu1 }
 0x16a   :  { %v1234_v1 = vpop.f32.mrb[19].mxu1 }
 0x16b   :  { %v912_v3 = vadd.f32 %v1232_v49, %v1802_v5 }
 0x175   :  { %v1252_v4 = vpop.f32.mrb[20].mxu0 }
 0x176   :  { %v1253_v2 = vpop.f32.mrb[21].mxu0 }
 0x177   :  { %v1254_v6 = vadd.f32 %v1253_v2, %v1252_v4  ;;  %v1255_v7 = vpop.f32.mrb[22].mxu0  ;;  %v991_v8 = vpop.f32.mrb[20].mxu1 }
 0x178   :  { %v1256_v9 = vpop.f32.mrb[23].mxu0  ;;  %v1309_v10 = vpop.f32.mrb[21].mxu1 }
 0x179   :  { %v952_v11 = vadd.f32 %v1254_v6, %v912_v3  ;;  %v994_v12 = vpop.f32.mrb[22].mxu1 }
 0x17a   :  { %v1310_v13 = vpop.f32.mrb[23].mxu1 }
 0x17b   :  { %v992_v14 = vadd.f32 %v991_v8, %v952_v11 }
 0x17d   :  { %v997_v15 = vmax.f32 %v992_v14, 0.0 }
 0x17f   :  { %v998_v17 = vmax.f32 %v827_v46, %v997_v15 }
 0x181   :  { %v1006_v5 = vmul.f32 %v1065_v16, %v998_v17 }
 0x183   :  { %v1014_v19 = vadd.f32 %v1066_v18, %v1006_v5 }
 0x185   :  { %v1015_v20 = vpack.c.bf16 %v1014_v19, %v1014_v19 }
 0x187   :  { %1016 = vst [vmem:[%s1822_s5] sm:$0x1] %v1015_v20 }

</bundles_post_ra>
